<compile_context>
chip_gen: v6e
topology: v6e:2x2x1
jax: 0.10.0
libtpu: 0.0.40
codegen_flags: <defaults>
</compile_context>

<pallas_src>
import functools

import jax
import jax.numpy as jnp
from jax import lax
from jax.experimental import pallas as pl
from jax.experimental.pallas import tpu as pltpu

LANE = 128


def _vmem_capacity_bytes():
    try:
        return int(pltpu.get_tpu_info().vmem_capacity_bytes)
    except Exception:
        return 64 * 1024 * 1024            # conservative fallback (v7x per-TC)


_VMEM_CAP = _vmem_capacity_bytes()
# <=48 MiB on v7x (64 MiB physical), up to 96 MiB on v5e/v6e (128 MiB physical)
_VMEM_LIMIT = min(_VMEM_CAP * 3 // 4, 96 * 1024 * 1024)
# Budget for the "everything resident in VMEM" fused paths (leaves headroom
# for compiler temporaries / double buffers): ~40 MiB v7x, ~80 MiB v5e/v6e.
_FUSED_VMEM_BUDGET = min(_VMEM_CAP * 5 // 8, 80 * 1024 * 1024)


def _round_up(x, m):
    return ((x + m - 1) // m) * m


def _pad2(x, r, c):
    return jnp.pad(x, ((0, r - x.shape[0]), (0, c - x.shape[1])))


def _masked_row_softmax(z, n_valid_cols):
    """Row softmax over the first n_valid_cols columns (padded cols -> 0)."""
    col = lax.broadcasted_iota(jnp.int32, z.shape, 1)
    z = jnp.where(col < n_valid_cols, z, -1e30)
    m = jnp.max(z, axis=1, keepdims=True)
    e = jnp.exp(z - m)
    s = jnp.sum(e, axis=1, keepdims=True)
    return e * pl.reciprocal(s, approx=True)          # EUP divide (free slot)


# --------------------------- fully fused forward ----------------------------

def _fused_forward_kernel(*refs, num_layers, lpaiters, n_valid_out):
    # refs = [A_gcn, A_lpa, X, W0..WL-1, b0..bL-1, out, y_hat, h]
    a_gcn_ref, a_lpa_ref, x_ref = refs[0], refs[1], refs[2]
    w_refs = refs[3:3 + num_layers]
    b_refs = refs[3 + num_layers:3 + 2 * num_layers]
    out_ref, yhat_ref, h_ref = refs[3 + 2 * num_layers:3 + 2 * num_layers + 3]

    h = x_ref[...]                                         # bf16
    out = None
    for i in range(num_layers):
        xw = jnp.dot(h, w_refs[i][...], preferred_element_type=jnp.float32)
        z = jnp.dot(a_gcn_ref[...], xw.astype(jnp.bfloat16),
                    preferred_element_type=jnp.float32) + b_refs[i][...]
        if i < num_layers - 1:
            h = jnp.maximum(z, 0.0).astype(jnp.bfloat16)   # dropout == identity
        else:
            out = _masked_row_softmax(z, n_valid_out)

    h_ref[...] = h.astype(jnp.float32)      # hidden activation fed to last layer
    out_ref[...] = out
    yhat_ref[...] = out

    @pl.loop(0, lpaiters)
    def _(t):
        p = jnp.dot(a_lpa_ref[...], yhat_ref[...].astype(jnp.bfloat16),
                    preferred_element_type=jnp.float32)
        yhat_ref[...] = _masked_row_softmax(p, n_valid_out)


def fused_forward(a_gcn, a_lpa, x_p, ws_p, bs_p, *, lpaiters, n_valid_out,
                  hid_pad, fo_pad):
    n_pad = a_gcn.shape[0]
    f_in_pad = x_p.shape[1]
    num_layers = len(ws_p)
    kern = functools.partial(_fused_forward_kernel, num_layers=num_layers,
                             lpaiters=lpaiters, n_valid_out=n_valid_out)
    vmem = pl.BlockSpec(memory_space=pltpu.MemorySpace.VMEM)

    flops = lpaiters * 2 * n_pad * n_pad * fo_pad
    for w in ws_p:
        flops += 2 * n_pad * w.shape[0] * w.shape[1]       # X @ W
        flops += 2 * n_pad * n_pad * w.shape[1]            # A @ XW
    bytes_accessed = (2 * n_pad * n_pad * 2 + n_pad * f_in_pad * 2
                      + sum(int(w.size) * 2 for w in ws_p)
                      + n_pad * (2 * fo_pad + hid_pad) * 4)

    return pl.pallas_call(
        kern,
        out_shape=(jax.ShapeDtypeStruct((n_pad, fo_pad), jnp.float32),
                   jax.ShapeDtypeStruct((n_pad, fo_pad), jnp.float32),
                   jax.ShapeDtypeStruct((n_pad, hid_pad), jnp.float32)),
        in_specs=[vmem] * (3 + 2 * num_layers),
        out_specs=(vmem, vmem, vmem),
        compiler_params=pltpu.CompilerParams(vmem_limit_bytes=_VMEM_LIMIT),
        cost_estimate=pl.CostEstimate(
            flops=int(flops),
            transcendentals=int((1 + lpaiters) * n_pad * fo_pad),
            bytes_accessed=int(bytes_accessed)),
    )(a_gcn, a_lpa, x_p, *ws_p, *bs_p)


def _fused_vmem_bytes(n_pad, f_in_pad, hid_pad, fo_pad, ws_p):
    max_f = max(f_in_pad, hid_pad, fo_pad)
    a_bytes = 2 * n_pad * n_pad * 2                       # A_gcn + A_lpa (bf16)
    x_bytes = n_pad * f_in_pad * 2
    w_bytes = sum(int(w.size) * 2 + w.shape[1] * 4 for w in ws_p)
    out_bytes = n_pad * (2 * fo_pad + hid_pad) * 4
    tmp_bytes = 6 * n_pad * max_f * 4                     # temporaries headroom
    return a_bytes + x_bytes + w_bytes + out_bytes + tmp_bytes


# ------------------------ tiled path (large graphs) -------------------------

def _xw_kernel(x_ref, w_ref, o_ref):
    # XW = X @ W  (bf16 MXU inputs, f32 accumulation, bf16 intermediate out)
    o_ref[...] = jnp.dot(x_ref[...], w_ref[...],
                         preferred_element_type=jnp.float32).astype(o_ref.dtype)


def xw_matmul(x, w, *, tm):
    n_pad, f_in_pad = x.shape
    f_out_pad = w.shape[1]
    return pl.pallas_call(
        _xw_kernel,
        out_shape=jax.ShapeDtypeStruct((n_pad, f_out_pad), jnp.bfloat16),
        grid_spec=pltpu.PrefetchScalarGridSpec(
            num_scalar_prefetch=0,
            grid=(n_pad // tm,),
            in_specs=[pl.BlockSpec((tm, f_in_pad), lambda i: (i, 0)),
                      pl.BlockSpec((f_in_pad, f_out_pad), lambda i: (0, 0))],
            out_specs=pl.BlockSpec((tm, f_out_pad), lambda i: (i, 0))),
        compiler_params=pltpu.CompilerParams(
            dimension_semantics=("parallel",),
            vmem_limit_bytes=_VMEM_LIMIT),
        cost_estimate=pl.CostEstimate(
            flops=int(2 * n_pad * f_in_pad * f_out_pad),
            transcendentals=0,
            bytes_accessed=int(x.size) * 2 + int(w.size) * 2
                           + n_pad * f_out_pad * 2),
    )(x, w)


def _a_relu_kernel(a_ref, xw_ref, b_ref, o_ref, acc_ref, *, tk, resident_xw):
    # H = relu(A @ XW + b); f32 accumulator scratch, bf16 output.
    k = pl.program_id(1)

    @pl.when(k == 0)
    def _():
        acc_ref[...] = jnp.zeros_like(acc_ref)

    if resident_xw:
        kk = pl.multiple_of(k * tk, tk)
        xw = xw_ref[pl.ds(kk, tk), :]
    else:
        xw = xw_ref[...]
    acc_ref[...] += jnp.dot(a_ref[...], xw, preferred_element_type=jnp.float32)

    @pl.when(k == pl.num_programs(1) - 1)
    def _():
        o_ref[...] = jnp.maximum(acc_ref[...] + b_ref[...], 0.0).astype(o_ref.dtype)


def _a_softmax_kernel(a_ref, xw_ref, b_ref, o_ref, *, tk, resident_xw,
                      n_valid_cols):
    # out = softmax(A @ XW + b); accumulate directly into the resident f32
    # output block (no scratch / extra copy), epilogue in place at last k.
    k = pl.program_id(1)

    @pl.when(k == 0)
    def _():
        o_ref[...] = jnp.zeros_like(o_ref)

    if resident_xw:
        kk = pl.multiple_of(k * tk, tk)
        xw = xw_ref[pl.ds(kk, tk), :]
    else:
        xw = xw_ref[...]
    o_ref[...] += jnp.dot(a_ref[...], xw, preferred_element_type=jnp.float32)

    @pl.when(k == pl.num_programs(1) - 1)
    def _():
        o_ref[...] = _masked_row_softmax(o_ref[...] + b_ref[...], n_valid_cols)


def a_matmul(a, xw, b, *, epilogue, n_valid_cols, tm, tk):
    n_pad = a.shape[0]
    f_pad = xw.shape[1]
    grid = (n_pad // tm, n_pad // tk)

    # Keep XW resident in VMEM (constant block index -> fetched once) and
    # slice the k-block inside the kernel; only stream it per-step if huge.
    resident_xw = int(xw.size) * 2 <= _FUSED_VMEM_BUDGET // 4
    if resident_xw:
        xw_spec = pl.BlockSpec((n_pad, f_pad), lambda i, k: (0, 0))
    else:
        xw_spec = pl.BlockSpec((tk, f_pad), lambda i, k: (k, 0))

    if epilogue == "relu":
        kern = functools.partial(_a_relu_kernel, tk=tk, resident_xw=resident_xw)
        out_dtype, out_itemsize = jnp.bfloat16, 2
        scratch = [pltpu.VMEM((tm, f_pad), jnp.float32)]
        trans = 0
    else:                                                    # "softmax"
        kern = functools.partial(_a_softmax_kernel, tk=tk,
                                 resident_xw=resident_xw,
                                 n_valid_cols=n_valid_cols)
        out_dtype, out_itemsize = jnp.float32, 4
        scratch = []
        trans = n_pad * f_pad

    return pl.pallas_call(
        kern,
        out_shape=jax.ShapeDtypeStruct((n_pad, f_pad), out_dtype),
        grid_spec=pltpu.PrefetchScalarGridSpec(
            num_scalar_prefetch=0,
            grid=grid,
            in_specs=[pl.BlockSpec((tm, tk), lambda i, k: (i, k)),
                      xw_spec,
                      pl.BlockSpec((1, f_pad), lambda i, k: (0, 0))],
            out_specs=pl.BlockSpec((tm, f_pad), lambda i, k: (i, 0)),
            scratch_shapes=scratch),
        compiler_params=pltpu.CompilerParams(
            dimension_semantics=("parallel", "arbitrary"),
            vmem_limit_bytes=_VMEM_LIMIT),
        cost_estimate=pl.CostEstimate(
            flops=int(2 * n_pad * n_pad * f_pad),
            transcendentals=int(trans),
            bytes_accessed=int(a.size) * 2 + int(xw.size) * 2
                           + n_pad * f_pad * out_itemsize),
    )(a, xw, b)


def _lpa_fused_kernel(a_ref, y_ref, o_ref, *, iters, n_valid_cols):
    # All LPA iterations fused: A_lpa + Y resident in VMEM across iterations.
    o_ref[...] = y_ref[...]

    @pl.loop(0, iters)
    def _(t):
        p = jnp.dot(a_ref[...], o_ref[...].astype(jnp.bfloat16),
                    preferred_element_type=jnp.float32)
        o_ref[...] = _masked_row_softmax(p, n_valid_cols)


def lpa_propagate(a_lpa, y0, *, iters, n_valid_cols, tm, tk):
    n_pad, f_pad = y0.shape
    fused_bytes = int(a_lpa.size) * 2 + 4 * n_pad * f_pad * 4
    if fused_bytes <= _FUSED_VMEM_BUDGET:
        kern = functools.partial(_lpa_fused_kernel, iters=iters,
                                 n_valid_cols=n_valid_cols)
        vmem = pl.BlockSpec(memory_space=pltpu.MemorySpace.VMEM)
        return pl.pallas_call(
            kern,
            out_shape=jax.ShapeDtypeStruct((n_pad, f_pad), jnp.float32),
            in_specs=[vmem, vmem],
            out_specs=vmem,
            compiler_params=pltpu.CompilerParams(vmem_limit_bytes=_VMEM_LIMIT),
            cost_estimate=pl.CostEstimate(
                flops=int(2 * n_pad * n_pad * f_pad * iters),
                transcendentals=int(n_pad * f_pad * iters),
                bytes_accessed=int(a_lpa.size) * 2 + 2 * n_pad * f_pad * 4),
        )(a_lpa, y0)
    # Fallback for very large graphs: tiled per-iteration pass (A streamed).
    zero_b = jnp.zeros((1, f_pad), jnp.float32)
    y = y0
    for _ in range(iters):
        y = a_matmul(a_lpa, y.astype(jnp.bfloat16), zero_b,
                     epilogue="softmax", n_valid_cols=n_valid_cols,
                     tm=tm, tk=tk)
    return y


# ------------------------------ plain-JAX glue ------------------------------

def build_gcn_adj(edge_index, edge_weight, n, n_pad):
    """Dense D^-1/2 (A + I) D^-1/2 with learnable edge weights (bf16, padded)."""
    src, dst = edge_index[0], edge_index[1]
    a = jnp.zeros((n, n), jnp.float32).at[dst, src].add(edge_weight)
    a = a + jnp.eye(n, dtype=jnp.float32)            # self loops, weight 1
    deg = jnp.sum(a, axis=1)
    d_inv_sqrt = jnp.where(deg > 0, 1.0 / jnp.sqrt(deg), 0.0)
    a = a * d_inv_sqrt[:, None] * d_inv_sqrt[None, :]
    return _pad2(a, n_pad, n_pad).astype(jnp.bfloat16)


def build_lpa_adj(edge_index, edge_attr, n, n_pad):
    """Dense row-normalized D^-1 (A_attr + I) for label prop (bf16, padded)."""
    src, dst = edge_index[0], edge_index[1]
    a = jnp.zeros((n, n), jnp.float32).at[dst, src].add(edge_attr)
    a = a + jnp.eye(n, dtype=jnp.float32)
    deg = jnp.sum(a, axis=1, keepdims=True)
    a = a / jnp.where(deg > 0, deg, 1.0)
    return _pad2(a, n_pad, n_pad).astype(jnp.bfloat16)


def init_params(key, in_feature, hidden, out_feature, num_edges, gcnnum):
    dims = [in_feature] + [hidden] * (gcnnum - 1) + [out_feature]
    ws, bs = [], []
    for i in range(gcnnum):
        key, kw = jax.random.split(key)
        fan_in, fan_out = dims[i], dims[i + 1]
        scale = jnp.sqrt(6.0 / (fan_in + fan_out))       # glorot-uniform
        ws.append(jax.random.uniform(kw, (fan_in, fan_out), jnp.float32,
                                     -scale, scale))
        bs.append(jnp.zeros((1, fan_out), jnp.float32))
    return {"edge_weight": jnp.ones((num_edges,), jnp.float32),
            "gc_w": ws, "gc_b": bs}


def fcn_lp_forward(params, x, edge_index, edge_attr, *, lpaiters,
                   tm=512, tk=512, force_tiled=False):
    n, f_in = x.shape
    ws, bs = params["gc_w"], params["gc_b"]
    num_layers = len(ws)
    assert num_layers >= 2, "FCN_LP always has at least two GCN layers"
    hidden = ws[0].shape[1]
    f_out = ws[-1].shape[1]

    f_in_pad = _round_up(f_in, LANE)
    hid_pad = _round_up(hidden, LANE)
    fo_pad = _round_up(f_out, LANE)

    # Padded bf16 weights / f32 biases (pre-cast once, no per-step VPU casts).
    ws_p, bs_p = [], []
    for w, b in zip(ws, bs):
        fi_p = _round_up(w.shape[0], LANE)
        fo_p = _round_up(w.shape[1], LANE)
        ws_p.append(_pad2(w, fi_p, fo_p).astype(jnp.bfloat16))
        bs_p.append(_pad2(b, 1, fo_p).astype(jnp.float32))

    n_pad_fused = _round_up(n, LANE)
    fused_bytes = _fused_vmem_bytes(n_pad_fused, f_in_pad, hid_pad, fo_pad, ws_p)
    use_fused = (not force_tiled) and fused_bytes <= _FUSED_VMEM_BUDGET

    if use_fused:
        n_pad = n_pad_fused
    else:
        assert tm % tk == 0 or tk % tm == 0, "tk must divide tm (or vice versa)"
        n_pad = _round_up(n, max(tm, tk))
        tm = min(tm, n_pad)
        tk = min(tk, n_pad)

    a_gcn = build_gcn_adj(edge_index, params["edge_weight"], n, n_pad)
    a_lpa = build_lpa_adj(edge_index, edge_attr, n, n_pad)
    x_p = _pad2(x.astype(jnp.float32), n_pad, f_in_pad).astype(jnp.bfloat16)

    if use_fused:
        out_p, yhat_p, h_p = fused_forward(
            a_gcn, a_lpa, x_p, ws_p, bs_p, lpaiters=lpaiters,
            n_valid_out=f_out, hid_pad=hid_pad, fo_pad=fo_pad)
        out = out_p[:n, :f_out]
        y_hat = yhat_p[:n, :f_out]
        h_final = h_p[:n, :hidden]
        return jnp.squeeze(out), jnp.squeeze(y_hat), h_final

    # --------------------------- tiled path ---------------------------------
    h = x_p
    out_padded = None
    for i in range(num_layers):
        xw = xw_matmul(h, ws_p[i], tm=tm)                   # [n_pad, fo_pad] bf16
        if i < num_layers - 1:
            h = a_matmul(a_gcn, xw, bs_p[i], epilogue="relu",
                         n_valid_cols=ws[i].shape[1], tm=tm, tk=tk)
            # F.dropout(training=False) -> identity
        else:
            out_padded = a_matmul(a_gcn, xw, bs_p[i], epilogue="softmax",
                                  n_valid_cols=f_out, tm=tm, tk=tk)

    y_hat_padded = lpa_propagate(a_lpa, out_padded, iters=lpaiters,
                                 n_valid_cols=f_out, tm=tm, tk=tk)

    out = out_padded[:n, :f_out]
    y_hat = y_hat_padded[:n, :f_out]
    h_final = h[:n, :hidden].astype(jnp.float32)
    return jnp.squeeze(out), jnp.squeeze(y_hat), h_final


# ------------------------------ pure-JAX reference ---------------------------

def fcn_lp_reference(params, x, edge_index, edge_attr, *, lpaiters):
    n = x.shape[0]
    src, dst = edge_index[0], edge_index[1]
    a = jnp.zeros((n, n), jnp.float32).at[dst, src].add(params["edge_weight"])
    a = a + jnp.eye(n, dtype=jnp.float32)
    deg = jnp.sum(a, axis=1)
    dis = jnp.where(deg > 0, 1.0 / jnp.sqrt(deg), 0.0)
    a_gcn = a * dis[:, None] * dis[None, :]
    al = jnp.zeros((n, n), jnp.float32).at[dst, src].add(edge_attr)
    al = al + jnp.eye(n, dtype=jnp.float32)
    dl = jnp.sum(al, axis=1, keepdims=True)
    a_lpa = al / jnp.where(dl > 0, dl, 1.0)

    h = x.astype(jnp.float32)
    ws, bs = params["gc_w"], params["gc_b"]
    for i in range(len(ws) - 1):
        h = jnp.maximum(a_gcn @ (h @ ws[i]) + bs[i], 0.0)
    out = jax.nn.softmax(a_gcn @ (h @ ws[-1]) + bs[-1], axis=1)
    y = out
    for _ in range(lpaiters):
        y = jax.nn.softmax(a_lpa @ y, axis=1)
    return out, y, h


# ---------------------------------- main ------------------------------------

if __name__ == "__main__":
    N = 384           # number of graph nodes
    IN_FEATURE = 8
    HIDDEN = 32
    OUT_FEATURE = 8
    DROPOUT = 0.5     # unused at inference
    NUM_EDGES = 1536
    LPAITERS = 3
    GCNNUM = 3

    key = jax.random.PRNGKey(0)
    k_par, k_x, k_src, k_dst, k_attr = jax.random.split(key, 5)

    params = init_params(k_par, IN_FEATURE, HIDDEN, OUT_FEATURE,
                         NUM_EDGES, GCNNUM)

    x = jax.random.normal(k_x, (N, IN_FEATURE), jnp.float32)
    src = jax.random.randint(k_src, (NUM_EDGES,), 0, N, jnp.int32)
    dst = jax.random.randint(k_dst, (NUM_EDGES,), 0, N, jnp.int32)
    edge_index = jnp.stack([src, dst], axis=0)                # [2, E]
    edge_attr = jax.random.uniform(k_attr, (NUM_EDGES,), jnp.float32)

    ref_out, ref_y, ref_h = fcn_lp_reference(params, x, edge_index, edge_attr,
                                             lpaiters=LPAITERS)

    # Fast path: whole forward fused into a single pallas_call (all in VMEM).
    forward = jax.jit(functools.partial(fcn_lp_forward, lpaiters=LPAITERS))
    out, y_hat, h = forward(params, x, edge_index, edge_attr)
    jax.block_until_ready((out, y_hat, h))

    assert out.shape == (N, OUT_FEATURE)
    assert y_hat.shape == (N, OUT_FEATURE)
    assert h.shape == (N, HIDDEN)
    # softmax rows sum to ~1 (approx reciprocal -> loose tolerance)
    assert jnp.allclose(jnp.sum(out, axis=1), 1.0, atol=1e-2)
    assert jnp.allclose(jnp.sum(y_hat, axis=1), 1.0, atol=1e-2)
    # compare against a pure-JAX f32 reference (bf16 MXU inputs -> loose tol)
    assert jnp.max(jnp.abs(out - ref_out)) < 5e-2
    assert jnp.max(jnp.abs(y_hat - ref_y)) < 5e-2
    assert jnp.max(jnp.abs(h - ref_h)) < 5e-2

    # Also exercise the tiled large-graph path on the same inputs.
    forward_tiled = jax.jit(functools.partial(fcn_lp_forward, lpaiters=LPAITERS,
                                              tm=256, tk=256, force_tiled=True))
    out_t, y_t, h_t = forward_tiled(params, x, edge_index, edge_attr)
    jax.block_until_ready((out_t, y_t, h_t))
    assert jnp.max(jnp.abs(out_t - ref_out)) < 5e-2
    assert jnp.max(jnp.abs(y_t - ref_y)) < 5e-2
    assert jnp.max(jnp.abs(h_t - ref_h)) < 5e-2

    print("KERNEL_OK")
</pallas_src>

<mosaic_0001>
module attributes {stable_mosaic.version = 11 : i64} {
  func.func private @main(%arg0: i32) attributes {dimension_semantics = [#tpu.dimension_semantics<core_parallel>], iteration_bounds = array<i64: 2>, tpu.core_type = #tpu.core_type<sc_scalar_subcore>, window_params = []} {
    return
  }
}

module attributes {stable_mosaic.version = 11 : i64} {
  func.func private @main(%arg0: i32) attributes {dimension_semantics = [#tpu.dimension_semantics<core_parallel>], iteration_bounds = array<i64: 2>, tpu.core_type = #tpu.core_type<sc_scalar_subcore>, window_params = []} {
    return
  }
}

module attributes {stable_mosaic.version = 11 : i64} {
  func.func @_fused_forward_kernel(%arg0: memref<384x384xbf16, #tpu.memory_space<vmem>>, %arg1: memref<384x384xbf16, #tpu.memory_space<vmem>>, %arg2: memref<384x128xbf16, #tpu.memory_space<vmem>>, %arg3: memref<128x128xbf16, #tpu.memory_space<vmem>>, %arg4: memref<128x128xbf16, #tpu.memory_space<vmem>>, %arg5: memref<128x128xbf16, #tpu.memory_space<vmem>>, %arg6: memref<1x128xf32, #tpu.memory_space<vmem>>, %arg7: memref<1x128xf32, #tpu.memory_space<vmem>>, %arg8: memref<1x128xf32, #tpu.memory_space<vmem>>, %arg9: memref<384x128xf32, #tpu.memory_space<vmem>>, %arg10: memref<384x128xf32, #tpu.memory_space<vmem>>, %arg11: memref<384x128xf32, #tpu.memory_space<vmem>>) attributes {dimension_semantics = [], scalar_prefetch = 0 : i64, scratch_operands = 0 : i64, tpu.core_type = #tpu.core_type<tc>} {
    %c0 = arith.constant 0 : index
    %c0_0 = arith.constant 0 : index
    %0 = vector.load %arg2[%c0, %c0_0] : memref<384x128xbf16, #tpu.memory_space<vmem>>, vector<384x128xbf16>
    %c0_1 = arith.constant 0 : index
    %c0_2 = arith.constant 0 : index
    %1 = vector.load %arg3[%c0_1, %c0_2] : memref<128x128xbf16, #tpu.memory_space<vmem>>, vector<128x128xbf16>
    %cst = arith.constant dense<0.000000e+00> : vector<384x128xf32>
    %2 = tpu.matmul %0, %1, %cst {dimension_numbers = #tpu.dot_dimension_numbers<[1], [0], [0], [1], [0, 0, 1, 1], [], []>} : vector<384x128xbf16>, vector<128x128xbf16>, vector<384x128xf32> -> vector<384x128xf32>
    %c0_3 = arith.constant 0 : index
    %c0_4 = arith.constant 0 : index
    %3 = vector.load %arg0[%c0_3, %c0_4] : memref<384x384xbf16, #tpu.memory_space<vmem>>, vector<384x384xbf16>
    %4 = arith.truncf %2 : vector<384x128xf32> to vector<384x128xbf16>
    %cst_5 = arith.constant dense<0.000000e+00> : vector<384x128xf32>
    %5 = tpu.matmul %3, %4, %cst_5 {dimension_numbers = #tpu.dot_dimension_numbers<[1], [0], [0], [1], [0, 0, 1, 1], [], []>} : vector<384x384xbf16>, vector<384x128xbf16>, vector<384x128xf32> -> vector<384x128xf32>
    %c0_6 = arith.constant 0 : index
    %c0_7 = arith.constant 0 : index
    %6 = vector.load %arg6[%c0_6, %c0_7] : memref<1x128xf32, #tpu.memory_space<vmem>>, vector<1x128xf32>
    %7 = vector.broadcast %6 : vector<1x128xf32> to vector<384x128xf32>
    %8 = arith.addf %5, %7 : vector<384x128xf32>
    %cst_8 = arith.constant 0.000000e+00 : f32
    %9 = vector.broadcast %cst_8 : f32 to vector<384x128xf32>
    %10 = arith.maximumf %8, %9 : vector<384x128xf32>
    %11 = arith.truncf %10 : vector<384x128xf32> to vector<384x128xbf16>
    %c0_9 = arith.constant 0 : index
    %c0_10 = arith.constant 0 : index
    %12 = vector.load %arg4[%c0_9, %c0_10] : memref<128x128xbf16, #tpu.memory_space<vmem>>, vector<128x128xbf16>
    %cst_11 = arith.constant dense<0.000000e+00> : vector<384x128xf32>
    %13 = tpu.matmul %11, %12, %cst_11 {dimension_numbers = #tpu.dot_dimension_numbers<[1], [0], [0], [1], [0, 0, 1, 1], [], []>} : vector<384x128xbf16>, vector<128x128xbf16>, vector<384x128xf32> -> vector<384x128xf32>
    %c0_12 = arith.constant 0 : index
    %c0_13 = arith.constant 0 : index
    %14 = vector.load %arg0[%c0_12, %c0_13] : memref<384x384xbf16, #tpu.memory_space<vmem>>, vector<384x384xbf16>
    %15 = arith.truncf %13 : vector<384x128xf32> to vector<384x128xbf16>
    %cst_14 = arith.constant dense<0.000000e+00> : vector<384x128xf32>
    %16 = tpu.matmul %14, %15, %cst_14 {dimension_numbers = #tpu.dot_dimension_numbers<[1], [0], [0], [1], [0, 0, 1, 1], [], []>} : vector<384x384xbf16>, vector<384x128xbf16>, vector<384x128xf32> -> vector<384x128xf32>
    %c0_15 = arith.constant 0 : index
    %c0_16 = arith.constant 0 : index
    %17 = vector.load %arg7[%c0_15, %c0_16] : memref<1x128xf32, #tpu.memory_space<vmem>>, vector<1x128xf32>
    %18 = vector.broadcast %17 : vector<1x128xf32> to vector<384x128xf32>
    %19 = arith.addf %16, %18 : vector<384x128xf32>
    %cst_17 = arith.constant 0.000000e+00 : f32
    %20 = vector.broadcast %cst_17 : f32 to vector<384x128xf32>
    %21 = arith.maximumf %19, %20 : vector<384x128xf32>
    %22 = arith.truncf %21 : vector<384x128xf32> to vector<384x128xbf16>
    %c0_18 = arith.constant 0 : index
    %c0_19 = arith.constant 0 : index
    %23 = vector.load %arg5[%c0_18, %c0_19] : memref<128x128xbf16, #tpu.memory_space<vmem>>, vector<128x128xbf16>
    %cst_20 = arith.constant dense<0.000000e+00> : vector<384x128xf32>
    %24 = tpu.matmul %22, %23, %cst_20 {dimension_numbers = #tpu.dot_dimension_numbers<[1], [0], [0], [1], [0, 0, 1, 1], [], []>} : vector<384x128xbf16>, vector<128x128xbf16>, vector<384x128xf32> -> vector<384x128xf32>
    %c0_21 = arith.constant 0 : index
    %c0_22 = arith.constant 0 : index
    %25 = vector.load %arg0[%c0_21, %c0_22] : memref<384x384xbf16, #tpu.memory_space<vmem>>, vector<384x384xbf16>
    %26 = arith.truncf %24 : vector<384x128xf32> to vector<384x128xbf16>
    %cst_23 = arith.constant dense<0.000000e+00> : vector<384x128xf32>
    %27 = tpu.matmul %25, %26, %cst_23 {dimension_numbers = #tpu.dot_dimension_numbers<[1], [0], [0], [1], [0, 0, 1, 1], [], []>} : vector<384x384xbf16>, vector<384x128xbf16>, vector<384x128xf32> -> vector<384x128xf32>
    %c0_24 = arith.constant 0 : index
    %c0_25 = arith.constant 0 : index
    %28 = vector.load %arg8[%c0_24, %c0_25] : memref<1x128xf32, #tpu.memory_space<vmem>>, vector<1x128xf32>
    %29 = vector.broadcast %28 : vector<1x128xf32> to vector<384x128xf32>
    %30 = arith.addf %27, %29 : vector<384x128xf32>
    %31 = tpu.iota {dimensions = array<i32: 1>} : vector<384x128xi32>
    %c8_i32 = arith.constant 8 : i32
    %32 = vector.broadcast %c8_i32 : i32 to vector<384x128xi32>
    %33 = arith.cmpi slt, %31, %32 : vector<384x128xi32>
    %cst_26 = arith.constant -1.000000e+30 : f32
    %34 = vector.broadcast %cst_26 : f32 to vector<384x128xf32>
    %35 = arith.select %33, %30, %34 : vector<384x128xi1>, vector<384x128xf32>
    %cst_27 = arith.constant dense<0xFF800000> : vector<384xf32>
    %36 = vector.multi_reduction <maximumf>, %35, %cst_27 [1] : vector<384x128xf32> to vector<384xf32>
    %37 = vector.shape_cast %36 : vector<384xf32> to vector<384x1xf32>
    %38 = vector.broadcast %37 : vector<384x1xf32> to vector<384x128xf32>
    %39 = arith.subf %35, %38 : vector<384x128xf32>
    %40 = math.exp %39 : vector<384x128xf32>
    %cst_28 = arith.constant dense<0.000000e+00> : vector<384xf32>
    %41 = vector.multi_reduction <add>, %40, %cst_28 [1] : vector<384x128xf32> to vector<384xf32>
    %42 = vector.shape_cast %41 : vector<384xf32> to vector<384x1xf32>
    %43 = tpu.reciprocal %42 {approx = true} : vector<384x1xf32> -> vector<384x1xf32>
    %44 = vector.broadcast %43 : vector<384x1xf32> to vector<384x128xf32>
    %45 = arith.mulf %40, %44 : vector<384x128xf32>
    %46 = arith.extf %22 : vector<384x128xbf16> to vector<384x128xf32>
    %c0_29 = arith.constant 0 : index
    %c0_30 = arith.constant 0 : index
    %47 = vector.load %arg11[%c0_29, %c0_30] : memref<384x128xf32, #tpu.memory_space<vmem>>, vector<384x128xf32>
    tpu.vector_store %arg11[%c0_29, %c0_30], %46 {strides = array<i32>} : memref<384x128xf32, #tpu.memory_space<vmem>>, vector<384x128xf32>,
    %c0_31 = arith.constant 0 : index
    %c0_32 = arith.constant 0 : index
    %48 = vector.load %arg9[%c0_31, %c0_32] : memref<384x128xf32, #tpu.memory_space<vmem>>, vector<384x128xf32>
    tpu.vector_store %arg9[%c0_31, %c0_32], %45 {strides = array<i32>} : memref<384x128xf32, #tpu.memory_space<vmem>>, vector<384x128xf32>,
    %c0_33 = arith.constant 0 : index
    %c0_34 = arith.constant 0 : index
    %49 = vector.load %arg10[%c0_33, %c0_34] : memref<384x128xf32, #tpu.memory_space<vmem>>, vector<384x128xf32>
    tpu.vector_store %arg10[%c0_33, %c0_34], %45 {strides = array<i32>} : memref<384x128xf32, #tpu.memory_space<vmem>>, vector<384x128xf32>,
    %c0_i32 = arith.constant 0 : i32
    %c3_i32 = arith.constant 3 : i32
    %50 = arith.addi %c0_i32, %c3_i32 : i32
    %c1_i32 = arith.constant 1 : i32
    scf.for %arg12 = %c0_i32 to %50 step %c1_i32  : i32 {
      %c0_35 = arith.constant 0 : index
      %c0_36 = arith.constant 0 : index
      %51 = vector.load %arg1[%c0_35, %c0_36] : memref<384x384xbf16, #tpu.memory_space<vmem>>, vector<384x384xbf16>
      %c0_37 = arith.constant 0 : index
      %c0_38 = arith.constant 0 : index
      %52 = vector.load %arg10[%c0_37, %c0_38] : memref<384x128xf32, #tpu.memory_space<vmem>>, vector<384x128xf32>
      %53 = arith.truncf %52 : vector<384x128xf32> to vector<384x128xbf16>
      %cst_39 = arith.constant dense<0.000000e+00> : vector<384x128xf32>
      %54 = tpu.matmul %51, %53, %cst_39 {dimension_numbers = #tpu.dot_dimension_numbers<[1], [0], [0], [1], [0, 0, 1, 1], [], []>} : vector<384x384xbf16>, vector<384x128xbf16>, vector<384x128xf32> -> vector<384x128xf32>
      %55 = tpu.iota {dimensions = array<i32: 1>} : vector<384x128xi32>
      %c8_i32_40 = arith.constant 8 : i32
      %56 = vector.broadcast %c8_i32_40 : i32 to vector<384x128xi32>
      %57 = arith.cmpi slt, %55, %56 : vector<384x128xi32>
      %cst_41 = arith.constant -1.000000e+30 : f32
      %58 = vector.broadcast %cst_41 : f32 to vector<384x128xf32>
      %59 = arith.select %57, %54, %58 : vector<384x128xi1>, vector<384x128xf32>
      %cst_42 = arith.constant dense<0xFF800000> : vector<384xf32>
      %60 = vector.multi_reduction <maximumf>, %59, %cst_42 [1] : vector<384x128xf32> to vector<384xf32>
      %61 = vector.shape_cast %60 : vector<384xf32> to vector<384x1xf32>
      %62 = vector.broadcast %61 : vector<384x1xf32> to vector<384x128xf32>
      %63 = arith.subf %59, %62 : vector<384x128xf32>
      %64 = math.exp %63 : vector<384x128xf32>
      %cst_43 = arith.constant dense<0.000000e+00> : vector<384xf32>
      %65 = vector.multi_reduction <add>, %64, %cst_43 [1] : vector<384x128xf32> to vector<384xf32>
      %66 = vector.shape_cast %65 : vector<384xf32> to vector<384x1xf32>
      %67 = tpu.reciprocal %66 {approx = true} : vector<384x1xf32> -> vector<384x1xf32>
      %68 = vector.broadcast %67 : vector<384x1xf32> to vector<384x128xf32>
      %69 = arith.mulf %64, %68 : vector<384x128xf32>
      %c0_44 = arith.constant 0 : index
      %c0_45 = arith.constant 0 : index
      %70 = vector.load %arg10[%c0_44, %c0_45] : memref<384x128xf32, #tpu.memory_space<vmem>>, vector<384x128xf32>
      tpu.vector_store %arg10[%c0_44, %c0_45], %69 {strides = array<i32>} : memref<384x128xf32, #tpu.memory_space<vmem>>, vector<384x128xf32>,
    }
    return
  }
}

</mosaic_0001>

<bundles_post_ra>
// kernel: fcn_lp_forward.1
= control target key start
LH: loop header
LB: loop body
LE: loop exit
PB: predicated region body
PF: predicated region fallthrough
CT: control target
= control target key end

     0   :  { %v7074_v32 = vmov 0   ;;  %s9189_s16 = smov 0   ;;  %s10267_s1 = inlined_call_operand.vmem [shape: bf16[384,384], index: 1, kind: input, shape index: {}]   ;;  %s10268_s3 = inlined_call_operand.vmem [shape: bf16[128,128], index: 3, kind: input, shape index: {}]   ;;  %s10269_s2 = inlined_call_operand.vmem [shape: bf16[384,128], index: 2, kind: input, shape index: {}]   ;;  %s10270_s0 = inlined_call_operand.vmem [shape: bf16[384,384], index: 0, kind: input, shape index: {}]   ;;  %s10271_s4 = inlined_call_operand.vmem [shape: bf16[128,128], index: 4, kind: input, shape index: {}]   ;;  %s10272_s6 = inlined_call_operand.vmem [shape: f32[1,128], index: 6, kind: input, shape index: {}]   ;;  %s10273_s5 = inlined_call_operand.vmem [shape: bf16[128,128], index: 5, kind: input, shape index: {}]   ;;  %s10274_s7 = inlined_call_operand.vmem [shape: f32[1,128], index: 7, kind: input, shape index: {}]   ;;  %s10275_s11 = inlined_call_operand.vmem [shape: f32[384,128], index: 11, kind: output, shape index: {2}]   ;;  %s10276_s8 = inlined_call_operand.vmem [shape: f32[1,128], index: 8, kind: input, shape index: {}]   ;;  %s10277_s9 = inlined_call_operand.vmem [shape: f32[384,128], index: 9, kind: output, shape index: {0}]   ;;  %s10278_s10 = inlined_call_operand.vmem [shape: f32[384,128], index: 10, kind: output, shape index: {1}]  }
   0x1   :  { %v6299_v0 = vld [vmem:[%s10268_s3 + $0x38] sm:$0xff]   ;;  %v6300_v1 = vld [vmem:[%s10268_s3 + $0x30] sm:$0xff]   ;;  %v6301_v2 = vld [vmem:[%s10268_s3 + $0x28] sm:$0xff]   ;;  %1028 = vmatprep.subr.bf16.mxu1 %v7074_v32 }
   0x2   :  { %5809 = vmatprep.subr.bf16.mxu0 %v6299_v0  ;;  %v6302_v3 = vld [vmem:[%s10268_s3 + $0x20] sm:$0xff]   ;;  %v6303_v5 = vld [vmem:[%s10268_s3 + $0x18] sm:$0xff]   ;;  %v6304_v6 = vld [vmem:[%s10268_s3 + $0x10] sm:$0xff]  }
   0x3   :  { %5810 = vmatpush3.bf16.msra.mxu0 %v6299_v0  ;;  %v6307_v4 = vld [vmem:[%s10269_s2] sm:$0xff]   ;;  %v6305_v7 = vld [vmem:[%s10268_s3 + $0x8] sm:$0xff]   ;;  %v6309_v10 = vld [vmem:[%s10269_s2 + $0x10] sm:$0xff]  }
   0x4   :  { %5811 = vmatprep.subr.bf16.mxu0 %v6300_v1  ;;  %5825 = vmatprep.mubr.bf16.mxu0 %v6307_v4  ;;  %v6306_v8 = vld [vmem:[%s10268_s3] sm:$0xff]   ;;  %v6308_v9 = vld [vmem:[%s10269_s2 + $0x8] sm:$0xff]   ;;  %v6310_v11 = vld [vmem:[%s10269_s2 + $0x18] sm:$0xff]  }
   0x5   :  { %v6311_v12 = vld [vmem:[%s10269_s2 + $0x20] sm:$0xff]   ;;  %v6312_v13 = vld [vmem:[%s10269_s2 + $0x28] sm:$0xff]   ;;  %v6313_v14 = vld [vmem:[%s10269_s2 + $0x30] sm:$0xff]  }
   0x6   :  { %v6314_v15 = vld [vmem:[%s10269_s2 + $0x38] sm:$0xff]   ;;  %v6315_v16 = vld [vmem:[%s10269_s2 + $0x40] sm:$0xff]   ;;  %v6316_v17 = vld [vmem:[%s10269_s2 + $0x48] sm:$0xff]  }
   0x7   :  { %5812 = vmatpush3.bf16.msra.mxu0 %v6300_v1  ;;  %v6317_v18 = vld [vmem:[%s10269_s2 + $0x50] sm:$0xff]   ;;  %v6318_v19 = vld [vmem:[%s10269_s2 + $0x58] sm:$0xff]   ;;  %v6319_v20 = vld [vmem:[%s10269_s2 + $0x60] sm:$0xff]  }
   0x8   :  { %5813 = vmatprep.subr.bf16.mxu0 %v6301_v2  ;;  %v6320_v21 = vld [vmem:[%s10269_s2 + $0x68] sm:$0xff]   ;;  %v6321_v22 = vld [vmem:[%s10269_s2 + $0x70] sm:$0xff]   ;;  %v6322_v23 = vld [vmem:[%s10269_s2 + $0x78] sm:$0xff]  }
   0x9   :  { %v6323_v24 = vld [vmem:[%s10269_s2 + $0x80] sm:$0xff]   ;;  %v6324_v25 = vld [vmem:[%s10269_s2 + $0x88] sm:$0xff]   ;;  %v6325_v26 = vld [vmem:[%s10269_s2 + $0x90] sm:$0xff]  }
   0xa   :  { %v6326_v27 = vld [vmem:[%s10269_s2 + $0x98] sm:$0xff]   ;;  %v6327_v28 = vld [vmem:[%s10269_s2 + $0xa0] sm:$0xff]   ;;  %v6328_v29 = vld [vmem:[%s10269_s2 + $0xa8] sm:$0xff]  }
   0xb   :  { %5814 = vmatpush3.bf16.msra.mxu0 %v6301_v2  ;;  %v6329_v30 = vld [vmem:[%s10269_s2 + $0xb0] sm:$0xff]   ;;  %v6330_v31 = vld [vmem:[%s10269_s2 + $0xb8] sm:$0xff]  }
   0xc   :  { %5815 = vmatprep.subr.bf16.mxu0 %v6302_v3  ;;  %v7236_v33 = vld [vmem:[%s10270_s0 + $0x4] ss:$12 sps:$4 sm:$0xff]   ;;  %v6346_v34 = vld [vmem:[%s10270_s0 + $0x8] ss:$12 sps:$4 sm:$0xff]  }
   0xd   :  { %1060 = vmatprep.mubr.bf16.mxu1 %v7236_v33 }
   0xf   :  { %5816 = vmatpush3.bf16.msra.mxu0 %v6302_v3 }
  0x10   :  { %5817 = vmatprep.subr.bf16.mxu0 %v6303_v5 }
  0x13   :  { %5818 = vmatpush3.bf16.msra.mxu0 %v6303_v5 }
  0x14   :  { %5819 = vmatprep.subr.bf16.mxu0 %v6304_v6 }
  0x17   :  { %5820 = vmatpush3.bf16.msra.mxu0 %v6304_v6 }
  0x18   :  { %5821 = vmatprep.subr.bf16.mxu0 %v6305_v7 }
  0x1b   :  { %5822 = vmatpush3.bf16.msra.mxu0 %v6305_v7 }
  0x1c   :  { %5823 = vmatprep.subr.bf16.mxu0 %v6306_v8 }
  0x1f   :  { %5824 = vmatpush3.bf16.msra.mxu0 %v6306_v8 }
  0x22   :  { %5826 = vmatmul.mubr.bf16.vlgmr.msra.gmra.mxu0 %v6308_v9 }
  0x23   :  { %5829 = vmatprep.mubr.bf16.mxu0 %v6309_v10 }
  0x2a   :  { %5830 = vmatmul.mubr.bf16.gmra.mxu0 %v6310_v11 }
  0x2b   :  { %5833 = vmatprep.mubr.bf16.mxu0 %v6311_v12 }
  0x32   :  { %5834 = vmatmul.mubr.bf16.gmra.mxu0 %v6312_v13 }
  0x33   :  { %5837 = vmatprep.mubr.bf16.mxu0 %v6313_v14 }
  0x3a   :  { %5838 = vmatmul.mubr.bf16.gmra.mxu0 %v6314_v15 }
  0x3b   :  { %5841 = vmatprep.mubr.bf16.mxu0 %v6315_v16 }
  0x42   :  { %5842 = vmatmul.mubr.bf16.gmra.mxu0 %v6316_v17 }
  0x43   :  { %5845 = vmatprep.mubr.bf16.mxu0 %v6317_v18 }
  0x4a   :  { %5846 = vmatmul.mubr.bf16.gmra.mxu0 %v6318_v19 }
  0x4b   :  { %5849 = vmatprep.mubr.bf16.mxu0 %v6319_v20 }
  0x52   :  { %5850 = vmatmul.mubr.bf16.gmra.mxu0 %v6320_v21 }
  0x53   :  { %5853 = vmatprep.mubr.bf16.mxu0 %v6321_v22 }
  0x5a   :  { %5854 = vmatmul.mubr.bf16.gmra.mxu0 %v6322_v23 }
  0x5b   :  { %5857 = vmatprep.mubr.bf16.mxu0 %v6323_v24 }
  0x62   :  { %5858 = vmatmul.mubr.bf16.gmra.mxu0 %v6324_v25 }
  0x63   :  { %5861 = vmatprep.mubr.bf16.mxu0 %v6325_v26 }
  0x6a   :  { %5862 = vmatmul.mubr.bf16.gmra.mxu0 %v6326_v27 }
  0x6b   :  { %5865 = vmatprep.mubr.bf16.mxu0 %v6327_v28 }
  0x72   :  { %5866 = vmatmul.mubr.bf16.gmra.mxu0 %v6328_v29 }
  0x73   :  { %5869 = vmatprep.mubr.bf16.mxu0 %v6329_v30 }
  0x7a   :  { %5870 = vmatmul.mubr.bf16.gmra.mxu0 %v6330_v31 }
  0x7b   :  { %5889 = vmatprep.mubr.bf16.mxu0 %v6346_v34 }
  0xe2   :  { %v5827_v35 = vpop.f32.mrf.mxu0 }
  0xe4   :  { %v326_v36 = vpop.f32.mrf.mxu0 }
  0xe6   :  { %v5828_v37 = vpop.f32.mrf.mxu0 }
  0xe7   :  { %v614_v4 = vpack.c.bf16 %v5828_v37, %v5827_v35  ;;  %v6333_v35 = vld [vmem:[%s10270_s0] ss:$12 sps:$4 sm:$0xff]  }
  0xe8   :  { %v329_v38 = vpop.f32.mrf.mxu0 }
  0xe9   :  { %v613_v7 = vpack.c.bf16 %v329_v38, %v326_v36  ;;  %v6334_v36 = vld [vmem:[%s10270_s0 + $0x1c] ss:$12 sps:$4 sm:$0xff]  }
  0xea   :  { %v5831_v39 = vpop.f32.mrf.mxu0 }
  0xec   :  { %v342_v40 = vpop.f32.mrf.mxu0 }
  0xee   :  { %v5832_v41 = vpop.f32.mrf.mxu0 }
  0xef   :  { %v616_v62 = vpack.c.bf16 %v5832_v41, %v5831_v39 }
  0xf0   :  { %v345_v42 = vpop.f32.mrf.mxu0 }
  0xf1   :  { %v615_v1 = vpack.c.bf16 %v345_v42, %v342_v40  ;;  %v6336_v42 = vld [vmem:[%s10270_s0 + $0x18] ss:$12 sps:$4 sm:$0xff]  }
  0xf2   :  { %v5835_v43 = vpop.f32.mrf.mxu0 }
  0xf4   :  { %v358_v44 = vpop.f32.mrf.mxu0 }
  0xf6   :  { %v5836_v45 = vpop.f32.mrf.mxu0 }
  0xf7   :  { %v618_v56 = vpack.c.bf16 %v5836_v45, %v5835_v43  ;;  %v6337_v43 = vld [vmem:[%s10270_s0 + $0x34] ss:$12 sps:$4 sm:$0xff]   ;;  %v6339_v45 = vld [vmem:[%s10270_s0 + $0x30] ss:$12 sps:$4 sm:$0xff]  }
  0xf8   :  { %v361_v46 = vpop.f32.mrf.mxu0 }
  0xf9   :  { %v617_v59 = vpack.c.bf16 %v361_v46, %v358_v44 }
  0xfa   :  { %v5839_v47 = vpop.f32.mrf.mxu0 }
  0xfc   :  { %v374_v48 = vpop.f32.mrf.mxu0 }
  0xfe   :  { %v5840_v49 = vpop.f32.mrf.mxu0 }
  0xff   :  { %v620_v50 = vpack.c.bf16 %v5840_v49, %v5839_v47  ;;  %v6340_v47 = vld [vmem:[%s10270_s0 + $0x4c] ss:$12 sps:$4 sm:$0xff]   ;;  %v6342_v49 = vld [vmem:[%s10270_s0 + $0x48] ss:$12 sps:$4 sm:$0xff]  }
 0x100   :  { %v377_v51 = vpop.f32.mrf.mxu0 }
 0x101   :  { %1029 = vmatpush1.bf16.msra.mxu1 %v620_v50  ;;  %v619_v53 = vpack.c.bf16 %v377_v51, %v374_v48  ;;  %v6343_v51 = vld [vmem:[%s10270_s0 + $0x64] ss:$12 sps:$4 sm:$0xff]  }
 0x102   :  { %v7242_v52 = vpop.f32.mrf.mxu0  ;;  %1030 = vmatprep.subr.bf16.mxu1 %v7074_v32 }
 0x104   :  { %v7245_v54 = vpop.f32.mrf.mxu0 }
 0x105   :  { %1031 = vmatpush1.bf16.msra.mxu1 %v619_v53  ;;  %v6345_v53 = vld [vmem:[%s10270_s0 + $0x60] ss:$12 sps:$4 sm:$0xff]  }
 0x106   :  { %v7247_v55 = vpop.f32.mrf.mxu0  ;;  %1032 = vmatprep.subr.bf16.mxu1 %v7074_v32 }
 0x107   :  { %v622_v28 = vpack.c.bf16 %v7247_v55, %v7242_v52  ;;  %v6348_v55 = vld [vmem:[%s10270_s0 + $0x7c] ss:$12 sps:$4 sm:$0xff]  }
 0x108   :  { %v7250_v57 = vpop.f32.mrf.mxu0 }
 0x109   :  { %1033 = vmatpush1.bf16.msra.mxu1 %v618_v56  ;;  %v621_v31 = vpack.c.bf16 %v7250_v57, %v7245_v54  ;;  %v6347_v54 = vld [vmem:[%s10270_s0 + $0x20] ss:$12 sps:$4 sm:$0xff]   ;;  %v6351_v56 = vld [vmem:[%s10270_s0 + $0x38] ss:$12 sps:$4 sm:$0xff]  }
 0x10a   :  { %v5847_v58 = vpop.f32.mrf.mxu0  ;;  %1034 = vmatprep.subr.bf16.mxu1 %v7074_v32  ;;  %v6350_v57 = vld [vmem:[%s10270_s0 + $0x78] ss:$12 sps:$4 sm:$0xff]  }
 0x10c   :  { %v406_v60 = vpop.f32.mrf.mxu0 }
 0x10d   :  { %1035 = vmatpush1.bf16.msra.mxu1 %v617_v59  ;;  %v6353_v59 = vld [vmem:[%s10270_s0 + $0x94] ss:$12 sps:$4 sm:$0xff]  }
 0x10e   :  { %v5848_v61 = vpop.f32.mrf.mxu0  ;;  %1036 = vmatprep.subr.bf16.mxu1 %v7074_v32 }
 0x10f   :  { %v624_v22 = vpack.c.bf16 %v5848_v61, %v5847_v58  ;;  %v6352_v58 = vld [vmem:[%s10270_s0 + $0x50] ss:$12 sps:$4 sm:$0xff]  }
 0x110   :  { %v409_v63 = vpop.f32.mrf.mxu0  ;;  %v6355_v61 = vld [vmem:[%s10270_s0 + $0x90] ss:$12 sps:$4 sm:$0xff]  }
 0x111   :  { %1037 = vmatpush1.bf16.msra.mxu1 %v616_v62  ;;  %v623_v25 = vpack.c.bf16 %v409_v63, %v406_v60  ;;  %v6356_v60 = vld [vmem:[%s10270_s0 + $0x68] ss:$12 sps:$4 sm:$0xff]   ;;  %v6357_v62 = vld [vmem:[%s10270_s0 + $0x80] ss:$12 sps:$4 sm:$0xff]  }
 0x112   :  { %v5851_v0 = vpop.f32.mrf.mxu0  ;;  %1038 = vmatprep.subr.bf16.mxu1 %v7074_v32  ;;  %v6358_v63 = vld [vmem:[%s10270_s0 + $0xac] ss:$12 sps:$4 sm:$0xff]  }
 0x114   :  { %v422_v2 = vpop.f32.mrf.mxu0 }
 0x115   :  { %1039 = vmatpush1.bf16.msra.mxu1 %v615_v1  ;;  %v6360_v1 = vld [vmem:[%s10270_s0 + $0xa8] ss:$12 sps:$4 sm:$0xff]  }
 0x116   :  { %v5852_v3 = vpop.f32.mrf.mxu0  ;;  %1040 = vmatprep.subr.bf16.mxu1 %v7074_v32 }
 0x117   :  { %v626_v16 = vpack.c.bf16 %v5852_v3, %v5851_v0  ;;  %v6361_v0 = vld [vmem:[%s10270_s0 + $0x98] ss:$12 sps:$4 sm:$0xff]  }
 0x118   :  { %v425_v5 = vpop.f32.mrf.mxu0  ;;  %v6363_v3 = vld [vmem:[%s10270_s0 + $0xc4] ss:$12 sps:$4 sm:$0xff]  }
 0x119   :  { %1041 = vmatpush1.bf16.msra.mxu1 %v614_v4  ;;  %v625_v19 = vpack.c.bf16 %v425_v5, %v422_v2  ;;  %v6362_v2 = vld [vmem:[%s10270_s0 + $0xb0] ss:$12 sps:$4 sm:$0xff]   ;;  %v6366_v4 = vld [vmem:[%s10270_s0 + $0xc8] ss:$12 sps:$4 sm:$0xff]   ;;  %v6365_v5 = vld [vmem:[%s10270_s0 + $0xc0] ss:$12 sps:$4 sm:$0xff]  }
 0x11a   :  { %v5855_v6 = vpop.f32.mrf.mxu0  ;;  %1042 = vmatprep.subr.bf16.mxu1 %v7074_v32 }
 0x11c   :  { %v438_v8 = vpop.f32.mrf.mxu0 }
 0x11d   :  { %1043 = vmatpush1.bf16.msra.mxu1 %v613_v7  ;;  %v6368_v7 = vld [vmem:[%s10270_s0 + $0xdc] ss:$12 sps:$4 sm:$0xff]  }
 0x11e   :  { %v5856_v9 = vpop.f32.mrf.mxu0  ;;  %1044 = vmatprep.subr.bf16.mxu1 %v7074_v32 }
 0x11f   :  { %v628_v10 = vpack.c.bf16 %v5856_v9, %v5855_v6  ;;  %v6367_v6 = vld [vmem:[%s10270_s0 + $0xe0] ss:$12 sps:$4 sm:$0xff]   ;;  %v6370_v9 = vld [vmem:[%s10270_s0 + $0xd8] ss:$12 sps:$4 sm:$0xff]  }
 0x120   :  { %v441_v11 = vpop.f32.mrf.mxu0 }
 0x121   :  { %1045 = vmatpush2.bf16.msra.mxu1 %v628_v10  ;;  %v627_v13 = vpack.c.bf16 %v441_v11, %v438_v8  ;;  %v6373_v8 = vld [vmem:[%s10270_s0 + $0xf8] ss:$12 sps:$4 sm:$0xff]   ;;  %v6371_v10 = vld [vmem:[%s10270_s0 + $0xf4] ss:$12 sps:$4 sm:$0xff]   ;;  %v6375_v11 = vld [vmem:[%s10270_s0 + $0x110] ss:$12 sps:$4 sm:$0xff]  }
 0x122   :  { %v7258_v12 = vpop.f32.mrf.mxu0  ;;  %1046 = vmatprep.subr.bf16.mxu1 %v7074_v32 }
 0x124   :  { %v7261_v14 = vpop.f32.mrf.mxu0 }
 0x125   :  { %1047 = vmatpush2.bf16.msra.mxu1 %v627_v13  ;;  %v6374_v13 = vld [vmem:[%s10270_s0 + $0xf0] ss:$12 sps:$4 sm:$0xff]  }
 0x126   :  { %v7263_v15 = vpop.f32.mrf.mxu0  ;;  %1048 = vmatprep.subr.bf16.mxu1 %v7074_v32 }
 0x127   :  { %v630_v50 = vpack.c.bf16 %v7263_v15, %v7258_v12  ;;  %v6381_v12 = vld [vmem:[%s10270_s0 + $0x128] ss:$12 sps:$4 sm:$0xff]   ;;  %v6383_v15 = vld [vmem:[%s10270_s0 + $0x140] ss:$12 sps:$4 sm:$0xff]  }
 0x128   :  { %v7266_v17 = vpop.f32.mrf.mxu0 }
 0x129   :  { %1049 = vmatpush2.bf16.msra.mxu1 %v626_v16  ;;  %v629_v52 = vpack.c.bf16 %v7266_v17, %v7261_v14  ;;  %v6376_v14 = vld [vmem:[%s10270_s0 + $0x10c] ss:$12 sps:$4 sm:$0xff]  }
 0x12a   :  { %v5863_v18 = vpop.f32.mrf.mxu0  ;;  %1050 = vmatprep.subr.bf16.mxu1 %v7074_v32  ;;  %v6389_v16 = vld [vmem:[%s10270_s0 + $0x158] ss:$12 sps:$4 sm:$0xff]  }
 0x12b   :  { %v6427_v17 = vld [vmem:[%s10271_s4 + $0x38] sm:$0xff]  }
 0x12c   :  { %v470_v20 = vpop.f32.mrf.mxu0 }
 0x12d   :  { %1051 = vmatpush2.bf16.msra.mxu1 %v625_v19  ;;  %v6378_v19 = vld [vmem:[%s10270_s0 + $0x108] ss:$12 sps:$4 sm:$0xff]  }
 0x12e   :  { %v5864_v21 = vpop.f32.mrf.mxu0  ;;  %1052 = vmatprep.subr.bf16.mxu1 %v7074_v32 }
 0x12f   :  { %v632_v46 = vpack.c.bf16 %v5864_v21, %v5863_v18  ;;  %v6428_v18 = vld [vmem:[%s10271_s4 + $0x30] sm:$0xff]  }
 0x130   :  { %v473_v23 = vpop.f32.mrf.mxu0  ;;  %v6391_v21 = vld [vmem:[%s10270_s0 + $0x170] ss:$12 sps:$4 sm:$0xff]  }
 0x131   :  { %1053 = vmatpush2.bf16.msra.mxu1 %v624_v22  ;;  %v631_v48 = vpack.c.bf16 %v473_v23, %v470_v20  ;;  %v6379_v20 = vld [vmem:[%s10270_s0 + $0x124] ss:$12 sps:$4 sm:$0xff]   ;;  %v6429_v22 = vld [vmem:[%s10271_s4 + $0x28] sm:$0xff]  }
 0x132   :  { %v5867_v24 = vpop.f32.mrf.mxu0  ;;  %1054 = vmatprep.subr.bf16.mxu1 %v7074_v32  ;;  %v6397_v23 = vld [vmem:[%s10270_s0 + $0x188] ss:$12 sps:$4 sm:$0xff]  }
 0x134   :  { %v486_v26 = vpop.f32.mrf.mxu0 }
 0x135   :  { %1055 = vmatpush2.bf16.msra.mxu1 %v623_v25  ;;  %v6382_v25 = vld [vmem:[%s10270_s0 + $0x120] ss:$12 sps:$4 sm:$0xff]  }
 0x136   :  { %v5868_v27 = vpop.f32.mrf.mxu0  ;;  %1056 = vmatprep.subr.bf16.mxu1 %v7074_v32 }
 0x137   :  { %v634_v41 = vpack.c.bf16 %v5868_v27, %v5867_v24  ;;  %v6430_v24 = vld [vmem:[%s10271_s4 + $0x20] sm:$0xff]  }
 0x138   :  { %v489_v29 = vpop.f32.mrf.mxu0  ;;  %v6399_v27 = vld [vmem:[%s10270_s0 + $0x1a0] ss:$12 sps:$4 sm:$0xff]  }
 0x139   :  { %1057 = vmatpush2.bf16.msra.mxu1 %v622_v28  ;;  %v633_v44 = vpack.c.bf16 %v489_v29, %v486_v26  ;;  %v6384_v26 = vld [vmem:[%s10270_s0 + $0x13c] ss:$12 sps:$4 sm:$0xff]   ;;  %v6405_v29 = vld [vmem:[%s10270_s0 + $0x1b8] ss:$12 sps:$4 sm:$0xff]  }
 0x13a   :  { %v5871_v30 = vpop.f32.mrf.mxu0  ;;  %1058 = vmatprep.subr.bf16.mxu1 %v7074_v32  ;;  %v6431_v28 = vld [vmem:[%s10271_s4 + $0x18] sm:$0xff]  }
 0x13c   :  { %v502_v34 = vpop.f32.mrf.mxu0 }
 0x13d   :  { %1059 = vmatpush2.bf16.msra.mxu1 %v621_v31  ;;  %v6386_v31 = vld [vmem:[%s10270_s0 + $0x138] ss:$12 sps:$4 sm:$0xff]  }
 0x13e   :  { %v5872_v37 = vpop.f32.mrf.mxu0  ;;  %1870 = vmatprep.subr.bf16.mxu1 %v7074_v32 }
 0x13f   :  { %v636_v38 = vpack.c.bf16 %v5872_v37, %v5871_v30  ;;  %v6432_v30 = vld [vmem:[%s10271_s4 + $0x10] sm:$0xff]  }
 0x140   :  { %1061 = vmatmul.mubr.bf16.vlgmr.msra.gmra.mxu1 %v6333_v35  ;;  %v505_v39 = vpop.f32.mrf.mxu0  ;;  %v6407_v35 = vld [vmem:[%s10270_s0 + $0x1d0] ss:$12 sps:$4 sm:$0xff]   ;;  %v6413_v37 = vld [vmem:[%s10270_s0 + $0x1e8] ss:$12 sps:$4 sm:$0xff]  }
 0x141   :  { %5873 = vmatprep.subr.bf16.mxu0 %v636_v38  ;;  %v635_v40 = vpack.c.bf16 %v505_v39, %v502_v34  ;;  %1068 = vmatprep.mubr.bf16.mxu1 %v6334_v36  ;;  %v6387_v34 = vld [vmem:[%s10270_s0 + $0x154] ss:$12 sps:$4 sm:$0xff]   ;;  %v6433_v36 = vld [vmem:[%s10271_s4 + $0x8] sm:$0xff]   ;;  %v6390_v39 = vld [vmem:[%s10270_s0 + $0x150] ss:$12 sps:$4 sm:$0xff]  }
 0x142   :  { %5874 = vmatpush3.bf16.msra.mxu0 %v636_v38  ;;  %v6434_v38 = vld [vmem:[%s10271_s4] sm:$0xff]  }
 0x143   :  { %5875 = vmatprep.subr.bf16.mxu0 %v635_v40 }
 0x146   :  { %5876 = vmatpush3.bf16.msra.mxu0 %v635_v40  ;;  %v6392_v40 = vld [vmem:[%s10270_s0 + $0x16c] ss:$12 sps:$4 sm:$0xff]  }
 0x147   :  { %5877 = vmatprep.subr.bf16.mxu0 %v634_v41 }
 0x148   :  { %1069 = vmatmul.mubr.bf16.gmra.mxu1 %v6336_v42  ;;  %v6421_v42 = vld [vmem:[%s10270_s0 + $0x218] ss:$12 sps:$4 sm:$0xff]  }
 0x149   :  { %1076 = vmatprep.mubr.bf16.mxu1 %v6337_v43  ;;  %v6394_v43 = vld [vmem:[%s10270_s0 + $0x168] ss:$12 sps:$4 sm:$0xff]  }
 0x14a   :  { %5878 = vmatpush3.bf16.msra.mxu0 %v634_v41  ;;  %v6415_v41 = vld [vmem:[%s10270_s0 + $0x200] ss:$12 sps:$4 sm:$0xff]  }
 0x14b   :  { %5879 = vmatprep.subr.bf16.mxu0 %v633_v44 }
 0x14e   :  { %5880 = vmatpush3.bf16.msra.mxu0 %v633_v44  ;;  %v6395_v44 = vld [vmem:[%s10270_s0 + $0x184] ss:$12 sps:$4 sm:$0xff]  }
 0x14f   :  { %5881 = vmatprep.subr.bf16.mxu0 %v632_v46 }
 0x150   :  { %1077 = vmatmul.mubr.bf16.gmra.mxu1 %v6339_v45  ;;  %v6423_v45 = vld [vmem:[%s10270_s0 + $0x230] ss:$12 sps:$4 sm:$0xff]  }
 0x151   :  { %1084 = vmatprep.mubr.bf16.mxu1 %v6340_v47  ;;  %v6400_v47 = vld [vmem:[%s10270_s0 + $0x19c] ss:$12 sps:$4 sm:$0xff]  }
 0x152   :  { %5882 = vmatpush3.bf16.msra.mxu0 %v632_v46  ;;  %v6398_v46 = vld [vmem:[%s10270_s0 + $0x180] ss:$12 sps:$4 sm:$0xff]  }
 0x153   :  { %5883 = vmatprep.subr.bf16.mxu0 %v631_v48 }
 0x156   :  { %5884 = vmatpush3.bf16.msra.mxu0 %v631_v48  ;;  %v6402_v48 = vld [vmem:[%s10270_s0 + $0x198] ss:$12 sps:$4 sm:$0xff]  }
 0x157   :  { %5885 = vmatprep.subr.bf16.mxu0 %v630_v50 }
 0x158   :  { %1085 = vmatmul.mubr.bf16.gmra.mxu1 %v6342_v49  ;;  %v6403_v49 = vld [vmem:[%s10270_s0 + $0x1b4] ss:$12 sps:$4 sm:$0xff]  }
 0x159   :  { %1092 = vmatprep.mubr.bf16.mxu1 %v6343_v51  ;;  %v6408_v51 = vld [vmem:[%s10270_s0 + $0x1cc] ss:$12 sps:$4 sm:$0xff]  }
 0x15a   :  { %5886 = vmatpush3.bf16.msra.mxu0 %v630_v50  ;;  %v6406_v50 = vld [vmem:[%s10270_s0 + $0x1b0] ss:$12 sps:$4 sm:$0xff]  }
 0x15b   :  { %5887 = vmatprep.subr.bf16.mxu0 %v629_v52 }
 0x15e   :  { %5888 = vmatpush3.bf16.msra.mxu0 %v629_v52  ;;  %v6410_v52 = vld [vmem:[%s10270_s0 + $0x1c8] ss:$12 sps:$4 sm:$0xff]  }
 0x15f   :  { %5937 = vmatprep.subr.bf16.mxu0 %v6427_v17 }
 0x160   :  { %1093 = vmatmul.mubr.bf16.gmra.mxu1 %v6345_v53  ;;  %v6411_v53 = vld [vmem:[%s10270_s0 + $0x1e4] ss:$12 sps:$4 sm:$0xff]  }
 0x161   :  { %5890 = vmatmul.mubr.bf16.vlgmr.msra.gmra.mxu0 %v6347_v54  ;;  %1100 = vmatprep.mubr.bf16.mxu1 %v6348_v55  ;;  %v6414_v54 = vld [vmem:[%s10270_s0 + $0x1e0] ss:$12 sps:$4 sm:$0xff]   ;;  %v6416_v55 = vld [vmem:[%s10270_s0 + $0x1fc] ss:$12 sps:$4 sm:$0xff]  }
 0x162   :  { %5893 = vmatprep.mubr.bf16.mxu0 %v6351_v56  ;;  %5938 = vmatpush3.bf16.msra.mxu0 %v6427_v17  ;;  %v6418_v56 = vld [vmem:[%s10270_s0 + $0x1f8] ss:$12 sps:$4 sm:$0xff]  }
 0x163   :  { %5939 = vmatprep.subr.bf16.mxu0 %v6428_v18 }
 0x166   :  { %5940 = vmatpush3.bf16.msra.mxu0 %v6428_v18 }
 0x167   :  { %5941 = vmatprep.subr.bf16.mxu0 %v6429_v22 }
 0x168   :  { %1101 = vmatmul.mubr.bf16.gmra.mxu1 %v6350_v57  ;;  %v6419_v57 = vld [vmem:[%s10270_s0 + $0x214] ss:$12 sps:$4 sm:$0xff]  }
 0x169   :  { %5894 = vmatmul.mubr.bf16.gmra.mxu0 %v6352_v58  ;;  %1108 = vmatprep.mubr.bf16.mxu1 %v6353_v59  ;;  %v6422_v58 = vld [vmem:[%s10270_s0 + $0x210] ss:$12 sps:$4 sm:$0xff]   ;;  %v6424_v59 = vld [vmem:[%s10270_s0 + $0x22c] ss:$12 sps:$4 sm:$0xff]  }
 0x16a   :  { %5897 = vmatprep.mubr.bf16.mxu0 %v6356_v60  ;;  %5942 = vmatpush3.bf16.msra.mxu0 %v6429_v22  ;;  %v6426_v60 = vld [vmem:[%s10270_s0 + $0x228] ss:$12 sps:$4 sm:$0xff]  }
 0x16b   :  { %5943 = vmatprep.subr.bf16.mxu0 %v6430_v24 }
 0x16e   :  { %5944 = vmatpush3.bf16.msra.mxu0 %v6430_v24 }
 0x16f   :  { %5945 = vmatprep.subr.bf16.mxu0 %v6431_v28 }
 0x170   :  { %1109 = vmatmul.mubr.bf16.gmra.mxu1 %v6355_v61 }
 0x171   :  { %5898 = vmatmul.mubr.bf16.gmra.mxu0 %v6357_v62  ;;  %1116 = vmatprep.mubr.bf16.mxu1 %v6358_v63 }
 0x172   :  { %5901 = vmatprep.mubr.bf16.mxu0 %v6361_v0  ;;  %5946 = vmatpush3.bf16.msra.mxu0 %v6431_v28 }
 0x173   :  { %5947 = vmatprep.subr.bf16.mxu0 %v6432_v30 }
 0x176   :  { %5948 = vmatpush3.bf16.msra.mxu0 %v6432_v30 }
 0x177   :  { %5949 = vmatprep.subr.bf16.mxu0 %v6433_v36 }
 0x178   :  { %1117 = vmatmul.mubr.bf16.gmra.mxu1 %v6360_v1 }
 0x179   :  { %5902 = vmatmul.mubr.bf16.gmra.mxu0 %v6362_v2  ;;  %1124 = vmatprep.mubr.bf16.mxu1 %v6363_v3 }
 0x17a   :  { %5905 = vmatprep.mubr.bf16.mxu0 %v6366_v4  ;;  %5950 = vmatpush3.bf16.msra.mxu0 %v6433_v36 }
 0x17b   :  { %5951 = vmatprep.subr.bf16.mxu0 %v6434_v38 }
 0x17e   :  { %5952 = vmatpush3.bf16.msra.mxu0 %v6434_v38 }
 0x180   :  { %1125 = vmatmul.mubr.bf16.gmra.mxu1 %v6365_v5 }
 0x181   :  { %5906 = vmatmul.mubr.bf16.gmra.mxu0 %v6367_v6  ;;  %1132 = vmatprep.mubr.bf16.mxu1 %v6368_v7 }
 0x182   :  { %5909 = vmatprep.mubr.bf16.mxu0 %v6373_v8 }
 0x188   :  { %1133 = vmatmul.mubr.bf16.gmra.mxu1 %v6370_v9 }
 0x189   :  { %1140 = vmatprep.mubr.bf16.mxu1 %v6371_v10  ;;  %5910 = vmatmul.mubr.bf16.gmra.mxu0 %v6375_v11 }
 0x18a   :  { %5913 = vmatprep.mubr.bf16.mxu0 %v6381_v12 }
 0x190   :  { %1141 = vmatmul.mubr.bf16.gmra.mxu1 %v6374_v13 }
 0x191   :  { %1148 = vmatprep.mubr.bf16.mxu1 %v6376_v14  ;;  %5914 = vmatmul.mubr.bf16.gmra.mxu0 %v6383_v15 }
 0x192   :  { %5917 = vmatprep.mubr.bf16.mxu0 %v6389_v16 }
 0x198   :  { %1149 = vmatmul.mubr.bf16.gmra.mxu1 %v6378_v19 }
 0x199   :  { %1156 = vmatprep.mubr.bf16.mxu1 %v6379_v20  ;;  %5918 = vmatmul.mubr.bf16.gmra.mxu0 %v6391_v21 }
 0x19a   :  { %5921 = vmatprep.mubr.bf16.mxu0 %v6397_v23 }
 0x1a0   :  { %1157 = vmatmul.mubr.bf16.gmra.mxu1 %v6382_v25 }
 0x1a1   :  { %1164 = vmatprep.mubr.bf16.mxu1 %v6384_v26  ;;  %5922 = vmatmul.mubr.bf16.gmra.mxu0 %v6399_v27 }
 0x1a2   :  { %5925 = vmatprep.mubr.bf16.mxu0 %v6405_v29 }
 0x1a8   :  { %1165 = vmatmul.mubr.bf16.gmra.mxu1 %v6386_v31 }
 0x1a9   :  { %1172 = vmatprep.mubr.bf16.mxu1 %v6387_v34  ;;  %5926 = vmatmul.mubr.bf16.gmra.mxu0 %v6407_v35 }
 0x1aa   :  { %5929 = vmatprep.mubr.bf16.mxu0 %v6413_v37 }
 0x1b0   :  { %1173 = vmatmul.mubr.bf16.gmra.mxu1 %v6390_v39 }
 0x1b1   :  { %1180 = vmatprep.mubr.bf16.mxu1 %v6392_v40  ;;  %5930 = vmatmul.mubr.bf16.gmra.mxu0 %v6415_v41 }
 0x1b2   :  { %5933 = vmatprep.mubr.bf16.mxu0 %v6421_v42 }
 0x1b8   :  { %1181 = vmatmul.mubr.bf16.gmra.mxu1 %v6394_v43 }
 0x1b9   :  { %1188 = vmatprep.mubr.bf16.mxu1 %v6395_v44  ;;  %5934 = vmatmul.mubr.bf16.gmra.mxu0 %v6423_v45 }
 0x1c0   :  { %1189 = vmatmul.mubr.bf16.gmra.mxu1 %v6398_v46 }
 0x1c1   :  { %1196 = vmatprep.mubr.bf16.mxu1 %v6400_v47 }
 0x1c8   :  { %1197 = vmatmul.mubr.bf16.gmra.mxu1 %v6402_v48 }
 0x1c9   :  { %1204 = vmatprep.mubr.bf16.mxu1 %v6403_v49 }
 0x1d0   :  { %1205 = vmatmul.mubr.bf16.gmra.mxu1 %v6406_v50 }
 0x1d1   :  { %1212 = vmatprep.mubr.bf16.mxu1 %v6408_v51 }
 0x1d8   :  { %1213 = vmatmul.mubr.bf16.gmra.mxu1 %v6410_v52 }
 0x1d9   :  { %1220 = vmatprep.mubr.bf16.mxu1 %v6411_v53 }
 0x1e0   :  { %1221 = vmatmul.mubr.bf16.gmra.mxu1 %v6414_v54 }
 0x1e1   :  { %1228 = vmatprep.mubr.bf16.mxu1 %v6416_v55 }
 0x1e8   :  { %1229 = vmatmul.mubr.bf16.gmra.mxu1 %v6418_v56 }
 0x1e9   :  { %1236 = vmatprep.mubr.bf16.mxu1 %v6419_v57 }
 0x1f0   :  { %1237 = vmatmul.mubr.bf16.gmra.mxu1 %v6422_v58 }
 0x1f1   :  { %1244 = vmatprep.mubr.bf16.mxu1 %v6424_v59 }
 0x1f8   :  { %1245 = vmatmul.mubr.bf16.gmra.mxu1 %v6426_v60 }
 0x1f9   :  { %1902 = vmatprep.mubr.bf16.mxu1 %v7236_v33  ;;  %v7520_v33 = vld [vmem:[%s10272_s6] ss:$0 sm:$0xff] }
 0x200   :  { %v1062_v61 = vpop.f32.mrf.mxu1 }
 0x201   :  { %v1063_v17 = vadd.f32 %v7520_v33, %v1062_v61 }
 0x202   :  { %v1064_v62 = vpop.f32.mrf.mxu1 }
 0x204   :  { %v1065_v63 = vpop.f32.mrf.mxu1 }
 0x205   :  { %v1066_v22 = vadd.f32 %v7520_v33, %v1065_v63 }
 0x206   :  { %v1067_v0 = vpop.f32.mrf.mxu1 }
 0x208   :  { %v1070_v1 = vpop.f32.mrf.mxu1 }
 0x209   :  { %v1071_v20 = vadd.f32 %v7520_v33, %v1070_v1 }
 0x20a   :  { %v1072_v2 = vpop.f32.mrf.mxu1 }
 0x20c   :  { %v1073_v3 = vpop.f32.mrf.mxu1 }
 0x20d   :  { %v1074_v18 = vadd.f32 %v7520_v33, %v1073_v3 }
 0x20e   :  { %v1075_v4 = vpop.f32.mrf.mxu1 }
 0x210   :  { %v1078_v5 = vpop.f32.mrf.mxu1 }
 0x211   :  { %v1079_v39 = vadd.f32 %v7520_v33, %v1078_v5 }
 0x212   :  { %v1080_v6 = vpop.f32.mrf.mxu1 }
 0x214   :  { %v1081_v7 = vpop.f32.mrf.mxu1 }
 0x215   :  { %v1082_v46 = vadd.f32 %v7520_v33, %v1081_v7 }
 0x216   :  { %v1083_v8 = vpop.f32.mrf.mxu1 }
 0x218   :  { %v1086_v9 = vpop.f32.mrf.mxu1 }
 0x219   :  { %v1087_v43 = vadd.f32 %v7520_v33, %v1086_v9 }
 0x21a   :  { %v1088_v10 = vpop.f32.mrf.mxu1 }
 0x21c   :  { %v1089_v11 = vpop.f32.mrf.mxu1 }
 0x21d   :  { %v1090_v40 = vadd.f32 %v7520_v33, %v1089_v11 }
 0x21e   :  { %v1091_v12 = vpop.f32.mrf.mxu1 }
 0x220   :  { %v1094_v13 = vpop.f32.mrf.mxu1 }
 0x221   :  { %v5891_v14 = vpop.f32.mrf.mxu0  ;;  %v1095_v61 = vadd.f32 %v7520_v33, %v1094_v13 }
 0x222   :  { %v1096_v15 = vpop.f32.mrf.mxu1  ;;  %v1296_v26 = vadd.f32 %v5891_v14, %v1071_v20 }
 0x223   :  { %v1287_v16 = vpop.f32.mrf.mxu0 }
 0x224   :  { %v1097_v19 = vpop.f32.mrf.mxu1  ;;  %v1288_v23 = vadd.f32 %v1287_v16, %v1063_v17  ;;  %v1480_v37 = vmax.f32 %v1296_v26, 0.0 }
 0x225   :  { %v5892_v21 = vpop.f32.mrf.mxu0  ;;  %v1098_v4 = vadd.f32 %v7520_v33, %v1097_v19 }
 0x226   :  { %v1299_v24 = vadd.f32 %v5892_v21, %v1074_v18  ;;  %v1099_v25 = vpop.f32.mrf.mxu1  ;;  %v1478_v34 = vmax.f32 %v1288_v23, 0.0 }
 0x227   :  { %v1290_v27 = vpop.f32.mrf.mxu0 }
 0x228   :  { %v1291_v28 = vadd.f32 %v1290_v27, %v1066_v22  ;;  %v1102_v29 = vpop.f32.mrf.mxu1  ;;  %v1481_v30 = vmax.f32 %v1299_v24, 0.0 }
 0x229   :  { %v5895_v31 = vpop.f32.mrf.mxu0  ;;  %v1103_v1 = vadd.f32 %v7520_v33, %v1102_v29 }
 0x22a   :  { %v1479_v35 = vmax.f32 %v1291_v28, 0.0  ;;  %v1104_v36 = vpop.f32.mrf.mxu1  ;;  %v1527_v44 = vpack.c.bf16 %v1481_v30, %v1480_v37  ;;  %v1312_v50 = vadd.f32 %v5895_v31, %v1087_v43 }
 0x22b   :  { %v1303_v38 = vpop.f32.mrf.mxu0 }
 0x22c   :  { %v1105_v41 = vpop.f32.mrf.mxu1  ;;  %v1526_v42 = vpack.c.bf16 %v1479_v35, %v1478_v34  ;;  %v1304_v47 = vadd.f32 %v1303_v38, %v1079_v39  ;;  %v1484_v59 = vmax.f32 %v1312_v50, 0.0 }
 0x22d   :  { %v5896_v45 = vpop.f32.mrf.mxu0  ;;  %v1106_v62 = vadd.f32 %v7520_v33, %v1105_v41 }
 0x22e   :  { %v1315_v48 = vadd.f32 %v5896_v45, %v1090_v40  ;;  %v1107_v49 = vpop.f32.mrf.mxu1  ;;  %5953 = vmatprep.mubr.bf16.mxu0 %v1526_v42  ;;  %v1482_v56 = vmax.f32 %v1304_v47, 0.0 }
 0x22f   :  { %v1306_v51 = vpop.f32.mrf.mxu0  ;;  %5954 = vmatmul.mubr.bf16.vlgmr.msra.gmra.mxu0 %v1527_v44 }
 0x230   :  { %v1307_v52 = vadd.f32 %v1306_v51, %v1082_v46  ;;  %v1110_v53 = vpop.f32.mrf.mxu1  ;;  %v1485_v54 = vmax.f32 %v1315_v48, 0.0 }
 0x231   :  { %v5899_v55 = vpop.f32.mrf.mxu0  ;;  %v1111_v19 = vadd.f32 %v7520_v33, %v1110_v53 }
 0x232   :  { %v1483_v57 = vmax.f32 %v1307_v52, 0.0  ;;  %v1112_v58 = vpop.f32.mrf.mxu1  ;;  %v1529_v2 = vpack.c.bf16 %v1485_v54, %v1484_v59  ;;  %v1328_v8 = vadd.f32 %v5899_v55, %v1103_v1 }
 0x233   :  { %v1319_v60 = vpop.f32.mrf.mxu0 }
 0x234   :  { %v1113_v63 = vpop.f32.mrf.mxu1  ;;  %v1528_v0 = vpack.c.bf16 %v1483_v57, %v1482_v56  ;;  %v1320_v5 = vadd.f32 %v1319_v60, %v1095_v61  ;;  %v1488_v17 = vmax.f32 %v1328_v8, 0.0 }
 0x235   :  { %v5900_v3 = vpop.f32.mrf.mxu0  ;;  %v1114_v26 = vadd.f32 %v7520_v33, %v1113_v63 }
 0x236   :  { %v1331_v6 = vadd.f32 %v5900_v3, %v1106_v62  ;;  %v1115_v7 = vpop.f32.mrf.mxu1  ;;  %5957 = vmatprep.mubr.bf16.mxu0 %v1528_v0  ;;  %v1486_v14 = vmax.f32 %v1320_v5, 0.0 }
 0x237   :  { %v1322_v9 = vpop.f32.mrf.mxu0  ;;  %5958 = vmatmul.mubr.bf16.gmra.mxu0 %v1529_v2 }
 0x238   :  { %v1323_v10 = vadd.f32 %v1322_v9, %v1098_v4  ;;  %v1118_v11 = vpop.f32.mrf.mxu1  ;;  %v1489_v12 = vmax.f32 %v1331_v6, 0.0 }
 0x239   :  { %v5903_v13 = vpop.f32.mrf.mxu0  ;;  %v1119_v18 = vadd.f32 %v7520_v33, %v1118_v11 }
 0x23a   :  { %v1487_v15 = vmax.f32 %v1323_v10, 0.0  ;;  %v1120_v16 = vpop.f32.mrf.mxu1  ;;  %v1531_v23 = vpack.c.bf16 %v1489_v12, %v1488_v17 }
 0x23b   :  { %v1335_v20 = vpop.f32.mrf.mxu0  ;;  %v1344_v29 = vadd.f32 %v5903_v13, %v1119_v18 }
 0x23c   :  { %v1121_v21 = vpop.f32.mrf.mxu1  ;;  %v1530_v22 = vpack.c.bf16 %v1487_v15, %v1486_v14  ;;  %v1336_v27 = vadd.f32 %v1335_v20, %v1111_v19 }
 0x23d   :  { %v1122_v24 = vadd.f32 %v7520_v33, %v1121_v21  ;;  %v5904_v25 = vpop.f32.mrf.mxu0  ;;  %v1492_v42 = vmax.f32 %v1344_v29, 0.0 }
 0x23e   :  { %v1123_v28 = vpop.f32.mrf.mxu1  ;;  %5961 = vmatprep.mubr.bf16.mxu0 %v1530_v22  ;;  %v1490_v38 = vmax.f32 %v1336_v27, 0.0 }
 0x23f   :  { %v1347_v30 = vadd.f32 %v5904_v25, %v1122_v24  ;;  %v1338_v31 = vpop.f32.mrf.mxu0  ;;  %5962 = vmatmul.mubr.bf16.gmra.mxu0 %v1531_v23 }
 0x240   :  { %v1339_v34 = vadd.f32 %v1338_v31, %v1114_v26  ;;  %v1126_v35 = vpop.f32.mrf.mxu1 }
 0x241   :  { %v1493_v36 = vmax.f32 %v1347_v30, 0.0  ;;  %v5907_v37 = vpop.f32.mrf.mxu0  ;;  %v1127_v40 = vadd.f32 %v7520_v33, %v1126_v35 }
 0x242   :  { %v1491_v39 = vmax.f32 %v1339_v34, 0.0  ;;  %v1128_v41 = vpop.f32.mrf.mxu1 }
 0x243   :  { %v1351_v43 = vpop.f32.mrf.mxu0  ;;  %v1533_v46 = vpack.c.bf16 %v1493_v36, %v1492_v42 }
 0x244   :  { %v1129_v44 = vpop.f32.mrf.mxu1  ;;  %v1532_v45 = vpack.c.bf16 %v1491_v39, %v1490_v38  ;;  %v1352_v49 = vadd.f32 %v1351_v43, %v1127_v40 }
 0x245   :  { %v1130_v47 = vadd.f32 %v7520_v33, %v1129_v44  ;;  %v5908_v48 = vpop.f32.mrf.mxu0 }
 0x246   :  { %v1131_v50 = vpop.f32.mrf.mxu1  ;;  %5965 = vmatprep.mubr.bf16.mxu0 %v1532_v45  ;;  %v1494_v56 = vmax.f32 %v1352_v49, 0.0 }
 0x247   :  { %v1354_v51 = vpop.f32.mrf.mxu0  ;;  %5966 = vmatmul.mubr.bf16.gmra.mxu0 %v1533_v46 }
 0x248   :  { %v1355_v52 = vadd.f32 %v1354_v51, %v1130_v47  ;;  %v1134_v53 = vpop.f32.mrf.mxu1 }
 0x249   :  { %v1135_v54 = vadd.f32 %v7520_v33, %v1134_v53  ;;  %v5911_v55 = vpop.f32.mrf.mxu0 }
 0x24a   :  { %v1495_v57 = vmax.f32 %v1355_v52, 0.0  ;;  %v1136_v58 = vpop.f32.mrf.mxu1 }
 0x24b   :  { %v1367_v61 = vpop.f32.mrf.mxu0  ;;  %v1360_v62 = vadd.f32 %v5907_v37, %v1135_v54 }
 0x24c   :  { %v1137_v59 = vpop.f32.mrf.mxu1  ;;  %v1534_v60 = vpack.c.bf16 %v1495_v57, %v1494_v56 }
 0x24d   :  { %v1138_v63 = vadd.f32 %v7520_v33, %v1137_v59  ;;  %v5912_v3 = vpop.f32.mrf.mxu0  ;;  %v1496_v4 = vmax.f32 %v1360_v62, 0.0 }
 0x24e   :  { %v1139_v0 = vpop.f32.mrf.mxu1  ;;  %5969 = vmatprep.mubr.bf16.mxu0 %v1534_v60 }
 0x24f   :  { %v1363_v1 = vadd.f32 %v5908_v48, %v1138_v63  ;;  %v1370_v10 = vpop.f32.mrf.mxu0 }
 0x250   :  { %v1142_v2 = vpop.f32.mrf.mxu1 }
 0x251   :  { %v1497_v5 = vmax.f32 %v1363_v1, 0.0  ;;  %v1143_v6 = vadd.f32 %v7520_v33, %v1142_v2  ;;  %v5915_v16 = vpop.f32.mrf.mxu0 }
 0x252   :  { %v1144_v7 = vpop.f32.mrf.mxu1 }
 0x253   :  { %v1535_v8 = vpack.c.bf16 %v1497_v5, %v1496_v4  ;;  %v1368_v11 = vadd.f32 %v1367_v61, %v1143_v6  ;;  %v1383_v23 = vpop.f32.mrf.mxu0 }
 0x254   :  { %v1145_v9 = vpop.f32.mrf.mxu1 }
 0x255   :  { %v1146_v12 = vadd.f32 %v7520_v33, %v1145_v9  ;;  %5970 = vmatmul.mubr.bf16.gmra.mxu0 %v1535_v8  ;;  %v1498_v17 = vmax.f32 %v1368_v11, 0.0  ;;  %v5916_v29 = vpop.f32.mrf.mxu0 }
 0x256   :  { %v1147_v13 = vpop.f32.mrf.mxu1 }
 0x257   :  { %v1371_v14 = vadd.f32 %v1370_v10, %v1146_v12  ;;  %v1386_v38 = vpop.f32.mrf.mxu0 }
 0x258   :  { %v1150_v15 = vpop.f32.mrf.mxu1 }
 0x259   :  { %v1499_v18 = vmax.f32 %v1371_v14, 0.0  ;;  %v1151_v20 = vadd.f32 %v7520_v33, %v1150_v15  ;;  %v5919_v44 = vpop.f32.mrf.mxu0 }
 0x25a   :  { %v1152_v19 = vpop.f32.mrf.mxu1 }
 0x25b   :  { %v1536_v21 = vpack.c.bf16 %v1499_v18, %v1498_v17  ;;  %v1376_v24 = vadd.f32 %v5911_v55, %v1151_v20  ;;  %v1399_v51 = vpop.f32.mrf.mxu0 }
 0x25c   :  { %v1153_v22 = vpop.f32.mrf.mxu1 }
 0x25d   :  { %v1154_v25 = vadd.f32 %v7520_v33, %v1153_v22  ;;  %5973 = vmatprep.mubr.bf16.mxu0 %v1536_v21  ;;  %v1500_v30 = vmax.f32 %v1376_v24, 0.0  ;;  %v5920_v57 = vpop.f32.mrf.mxu0 }
 0x25e   :  { %v1155_v26 = vpop.f32.mrf.mxu1 }
 0x25f   :  { %v1379_v27 = vadd.f32 %v5912_v3, %v1154_v25  ;;  %v1402_v0 = vpop.f32.mrf.mxu0 }
 0x260   :  { %v1158_v28 = vpop.f32.mrf.mxu1 }
 0x261   :  { %v1501_v31 = vmax.f32 %v1379_v27, 0.0  ;;  %v1159_v34 = vadd.f32 %v7520_v33, %v1158_v28  ;;  %v5923_v6 = vpop.f32.mrf.mxu0 }
 0x262   :  { %v1160_v35 = vpop.f32.mrf.mxu1 }
 0x263   :  { %v1537_v36 = vpack.c.bf16 %v1501_v31, %v1500_v30  ;;  %v1384_v39 = vadd.f32 %v1383_v23, %v1159_v34  ;;  %v1415_v13 = vpop.f32.mrf.mxu0 }
 0x264   :  { %v1161_v37 = vpop.f32.mrf.mxu1 }
 0x265   :  { %v1162_v40 = vadd.f32 %v7520_v33, %v1161_v37  ;;  %5974 = vmatmul.mubr.bf16.gmra.mxu0 %v1537_v36  ;;  %v1502_v45 = vmax.f32 %v1384_v39, 0.0  ;;  %v5924_v20 = vpop.f32.mrf.mxu0 }
 0x266   :  { %v1163_v41 = vpop.f32.mrf.mxu1 }
 0x267   :  { %v1387_v42 = vadd.f32 %v1386_v38, %v1162_v40  ;;  %v1418_v26 = vpop.f32.mrf.mxu0 }
 0x268   :  { %v1166_v43 = vpop.f32.mrf.mxu1 }
 0x269   :  { %v1503_v46 = vmax.f32 %v1387_v42, 0.0  ;;  %v1167_v47 = vadd.f32 %v7520_v33, %v1166_v43  ;;  %v5927_v34 = vpop.f32.mrf.mxu0 }
 0x26a   :  { %v1168_v48 = vpop.f32.mrf.mxu1 }
 0x26b   :  { %v1538_v49 = vpack.c.bf16 %v1503_v46, %v1502_v45  ;;  %v1392_v52 = vadd.f32 %v5915_v16, %v1167_v47  ;;  %v1431_v41 = vpop.f32.mrf.mxu0 }
 0x26c   :  { %v1169_v50 = vpop.f32.mrf.mxu1 }
 0x26d   :  { %v1170_v53 = vadd.f32 %v7520_v33, %v1169_v50  ;;  %5977 = vmatprep.mubr.bf16.mxu0 %v1538_v49  ;;  %v1504_v58 = vmax.f32 %v1392_v52, 0.0  ;;  %v5928_v47 = vpop.f32.mrf.mxu0 }
 0x26e   :  { %v1171_v54 = vpop.f32.mrf.mxu1 }
 0x26f   :  { %v1395_v55 = vadd.f32 %v5916_v29, %v1170_v53  ;;  %v1434_v54 = vpop.f32.mrf.mxu0 }
 0x270   :  { %v1174_v56 = vpop.f32.mrf.mxu1 }
 0x271   :  { %v1505_v59 = vmax.f32 %v1395_v55, 0.0  ;;  %v1175_v60 = vadd.f32 %v7520_v33, %v1174_v56 }
 0x272   :  { %v1176_v61 = vpop.f32.mrf.mxu1 }
 0x273   :  { %v1539_v62 = vpack.c.bf16 %v1505_v59, %v1504_v58  ;;  %v1400_v1 = vadd.f32 %v1399_v51, %v1175_v60  ;;  %v5931_v60 = vpop.f32.mrf.mxu0 }
 0x274   :  { %v1177_v63 = vpop.f32.mrf.mxu1 }
 0x275   :  { %v1178_v2 = vadd.f32 %v7520_v33, %v1177_v63  ;;  %5978 = vmatmul.mubr.bf16.gmra.mxu0 %v1539_v62  ;;  %v1506_v7 = vmax.f32 %v1400_v1, 0.0 }
 0x276   :  { %v1179_v3 = vpop.f32.mrf.mxu1 }
 0x277   :  { %v1403_v4 = vadd.f32 %v1402_v0, %v1178_v2  ;;  %v1447_v3 = vpop.f32.mrf.mxu0 }
 0x278   :  { %v1182_v5 = vpop.f32.mrf.mxu1 }
 0x279   :  { %v1507_v8 = vmax.f32 %v1403_v4, 0.0  ;;  %v1183_v9 = vadd.f32 %v7520_v33, %v1182_v5 }
 0x27a   :  { %v1184_v10 = vpop.f32.mrf.mxu1 }
 0x27b   :  { %v1540_v11 = vpack.c.bf16 %v1507_v8, %v1506_v7  ;;  %v1408_v14 = vadd.f32 %v5919_v44, %v1183_v9  ;;  %v5932_v9 = vpop.f32.mrf.mxu0 }
 0x27c   :  { %v1185_v12 = vpop.f32.mrf.mxu1 }
 0x27d   :  { %v1186_v15 = vadd.f32 %v7520_v33, %v1185_v12  ;;  %5981 = vmatprep.mubr.bf16.mxu0 %v1540_v11  ;;  %v1508_v19 = vmax.f32 %v1408_v14, 0.0 }
 0x27e   :  { %v1187_v16 = vpop.f32.mrf.mxu1 }
 0x27f   :  { %v1411_v17 = vadd.f32 %v5920_v57, %v1186_v15  ;;  %v1450_v16 = vpop.f32.mrf.mxu0 }
 0x280   :  { %v1190_v18 = vpop.f32.mrf.mxu1 }
 0x281   :  { %v1509_v21 = vmax.f32 %v1411_v17, 0.0  ;;  %v1191_v22 = vadd.f32 %v7520_v33, %v1190_v18 }
 0x282   :  { %v1192_v23 = vpop.f32.mrf.mxu1 }
 0x283   :  { %v1541_v24 = vpack.c.bf16 %v1509_v21, %v1508_v19  ;;  %v1416_v27 = vadd.f32 %v1415_v13, %v1191_v22  ;;  %v5935_v22 = vpop.f32.mrf.mxu0 }
 0x284   :  { %v1193_v25 = vpop.f32.mrf.mxu1 }
 0x285   :  { %v1194_v28 = vadd.f32 %v7520_v33, %v1193_v25  ;;  %5982 = vmatmul.mubr.bf16.gmra.mxu0 %v1541_v24  ;;  %v1510_v35 = vmax.f32 %v1416_v27, 0.0 }
 0x286   :  { %v1195_v29 = vpop.f32.mrf.mxu1 }
 0x287   :  { %v1419_v30 = vadd.f32 %v1418_v26, %v1194_v28  ;;  %v1463_v29 = vpop.f32.mrf.mxu0 }
 0x288   :  { %v1198_v31 = vpop.f32.mrf.mxu1 }
 0x289   :  { %v1511_v36 = vmax.f32 %v1419_v30, 0.0  ;;  %v1199_v37 = vadd.f32 %v7520_v33, %v1198_v31 }
 0x28a   :  { %v1200_v38 = vpop.f32.mrf.mxu1 }
 0x28b   :  { %v1542_v39 = vpack.c.bf16 %v1511_v36, %v1510_v35  ;;  %v1424_v42 = vadd.f32 %v5923_v6, %v1199_v37  ;;  %v5936_v37 = vpop.f32.mrf.mxu0 }
 0x28c   :  { %v1201_v40 = vpop.f32.mrf.mxu1 }
 0x28d   :  { %v1202_v43 = vadd.f32 %v7520_v33, %v1201_v40  ;;  %5985 = vmatprep.mubr.bf16.mxu0 %v1542_v39  ;;  %v1512_v48 = vmax.f32 %v1424_v42, 0.0 }
 0x28e   :  { %v1203_v44 = vpop.f32.mrf.mxu1 }
 0x28f   :  { %v1427_v45 = vadd.f32 %v5924_v20, %v1202_v43  ;;  %v1466_v44 = vpop.f32.mrf.mxu0 }
 0x290   :  { %v1206_v46 = vpop.f32.mrf.mxu1 }
 0x291   :  { %v1513_v49 = vmax.f32 %v1427_v45, 0.0  ;;  %v1207_v50 = vadd.f32 %v7520_v33, %v1206_v46 }
 0x292   :  { %v1208_v51 = vpop.f32.mrf.mxu1 }
 0x293   :  { %v1543_v52 = vpack.c.bf16 %v1513_v49, %v1512_v48  ;;  %v1432_v55 = vadd.f32 %v1431_v41, %v1207_v50 }
 0x294   :  { %v1209_v53 = vpop.f32.mrf.mxu1 }
 0x295   :  { %v1210_v56 = vadd.f32 %v7520_v33, %v1209_v53  ;;  %5986 = vmatmul.mubr.bf16.gmra.mxu0 %v1543_v52  ;;  %v1514_v61 = vmax.f32 %v1432_v55, 0.0 }
 0x296   :  { %v1211_v57 = vpop.f32.mrf.mxu1 }
 0x297   :  { %v1435_v58 = vadd.f32 %v1434_v54, %v1210_v56 }
 0x298   :  { %v1214_v59 = vpop.f32.mrf.mxu1 }
 0x299   :  { %v1515_v62 = vmax.f32 %v1435_v58, 0.0  ;;  %v1215_v63 = vadd.f32 %v7520_v33, %v1214_v59 }
 0x29a   :  { %v1216_v0 = vpop.f32.mrf.mxu1 }
 0x29b   :  { %v1544_v1 = vpack.c.bf16 %v1515_v62, %v1514_v61  ;;  %v1440_v4 = vadd.f32 %v5927_v34, %v1215_v63  ;;  %v6635_v63 = vld [vmem:[%s10270_s0 + $0x8] ss:$12 sps:$4 sm:$0xff]  }
 0x29c   :  { %v1217_v2 = vpop.f32.mrf.mxu1 }
 0x29d   :  { %v1218_v5 = vadd.f32 %v7520_v33, %v1217_v2  ;;  %5989 = vmatprep.mubr.bf16.mxu0 %v1544_v1  ;;  %v1516_v10 = vmax.f32 %v1440_v4, 0.0 }
 0x29e   :  { %v1219_v6 = vpop.f32.mrf.mxu1 }
 0x29f   :  { %v1443_v7 = vadd.f32 %v5928_v47, %v1218_v5 }
 0x2a0   :  { %v1222_v8 = vpop.f32.mrf.mxu1 }
 0x2a1   :  { %v1517_v11 = vmax.f32 %v1443_v7, 0.0  ;;  %v1223_v12 = vadd.f32 %v7520_v33, %v1222_v8 }
 0x2a2   :  { %v1224_v13 = vpop.f32.mrf.mxu1 }
 0x2a3   :  { %v1545_v14 = vpack.c.bf16 %v1517_v11, %v1516_v10  ;;  %v1448_v17 = vadd.f32 %v1447_v3, %v1223_v12 }
 0x2a4   :  { %v1225_v15 = vpop.f32.mrf.mxu1 }
 0x2a5   :  { %v1226_v18 = vadd.f32 %v7520_v33, %v1225_v15  ;;  %5990 = vmatmul.mubr.bf16.gmra.mxu0 %v1545_v14  ;;  %v1518_v23 = vmax.f32 %v1448_v17, 0.0 }
 0x2a6   :  { %v1227_v20 = vpop.f32.mrf.mxu1 }
 0x2a7   :  { %v1451_v19 = vadd.f32 %v1450_v16, %v1226_v18 }
 0x2a8   :  { %v1230_v21 = vpop.f32.mrf.mxu1 }
 0x2a9   :  { %v1519_v24 = vmax.f32 %v1451_v19, 0.0  ;;  %v1231_v25 = vadd.f32 %v7520_v33, %v1230_v21 }
 0x2aa   :  { %v1232_v26 = vpop.f32.mrf.mxu1 }
 0x2ab   :  { %v1546_v27 = vpack.c.bf16 %v1519_v24, %v1518_v23  ;;  %v1456_v30 = vadd.f32 %v5931_v60, %v1231_v25 }
 0x2ac   :  { %v1233_v28 = vpop.f32.mrf.mxu1 }
 0x2ad   :  { %v1234_v31 = vadd.f32 %v7520_v33, %v1233_v28  ;;  %5993 = vmatprep.mubr.bf16.mxu0 %v1546_v27  ;;  %v1520_v38 = vmax.f32 %v1456_v30, 0.0 }
 0x2ae   :  { %v1235_v34 = vpop.f32.mrf.mxu1 }
 0x2af   :  { %v1459_v35 = vadd.f32 %v5932_v9, %v1234_v31 }
 0x2b0   :  { %v1238_v36 = vpop.f32.mrf.mxu1 }
 0x2b1   :  { %v1521_v39 = vmax.f32 %v1459_v35, 0.0  ;;  %v1239_v40 = vadd.f32 %v7520_v33, %v1238_v36 }
 0x2b2   :  { %v1240_v41 = vpop.f32.mrf.mxu1 }
 0x2b3   :  { %v1547_v42 = vpack.c.bf16 %v1521_v39, %v1520_v38  ;;  %v1464_v45 = vadd.f32 %v1463_v29, %v1239_v40 }
 0x2b4   :  { %v1241_v43 = vpop.f32.mrf.mxu1 }
 0x2b5   :  { %v1242_v46 = vadd.f32 %v7520_v33, %v1241_v43  ;;  %5994 = vmatmul.mubr.bf16.gmra.mxu0 %v1547_v42  ;;  %v1522_v50 = vmax.f32 %v1464_v45, 0.0 }
 0x2b6   :  { %v1243_v47 = vpop.f32.mrf.mxu1 }
 0x2b7   :  { %v1467_v48 = vadd.f32 %v1466_v44, %v1242_v46 }
 0x2b8   :  { %v1246_v49 = vpop.f32.mrf.mxu1 }
 0x2b9   :  { %v1523_v51 = vmax.f32 %v1467_v48, 0.0  ;;  %v1247_v52 = vadd.f32 %v7520_v33, %v1246_v49 }
 0x2ba   :  { %v1248_v53 = vpop.f32.mrf.mxu1 }
 0x2bb   :  { %v1548_v54 = vpack.c.bf16 %v1523_v51, %v1522_v50  ;;  %v1472_v56 = vadd.f32 %v5935_v22, %v1247_v52 }
 0x2bc   :  { %v1249_v55 = vpop.f32.mrf.mxu1 }
 0x2bd   :  { %v1250_v57 = vadd.f32 %v7520_v33, %v1249_v55  ;;  %5997 = vmatprep.mubr.bf16.mxu0 %v1548_v54  ;;  %v1524_v60 = vmax.f32 %v1472_v56, 0.0  ;;  %v6636_v54 = vld [vmem:[%s10270_s0] ss:$12 sps:$4 sm:$0xff]   ;;  %v6637_v55 = vld [vmem:[%s10270_s0 + $0x1c] ss:$12 sps:$4 sm:$0xff]  }
 0x2be   :  { %v1251_v58 = vpop.f32.mrf.mxu1 }
 0x2bf   :  { %v1475_v59 = vadd.f32 %v5936_v37, %v1250_v57  ;;  %v6638_v58 = vld [vmem:[%s10270_s0 + $0x18] ss:$12 sps:$4 sm:$0xff]  }
 0x2c1   :  { %v1525_v61 = vmax.f32 %v1475_v59, 0.0  ;;  %v6639_v59 = vld [vmem:[%s10270_s0 + $0x34] ss:$12 sps:$4 sm:$0xff]  }
 0x2c3   :  { %v1549_v62 = vpack.c.bf16 %v1525_v61, %v1524_v60 }
 0x2c5   :  { %5998 = vmatmul.mubr.bf16.gmra.mxu0 %v1549_v62 }
 0x2c6   :  { %6017 = vmatprep.mubr.bf16.mxu0 %v6635_v63  ;;  %v6640_v63 = vld [vmem:[%s10270_s0 + $0x30] ss:$12 sps:$4 sm:$0xff]  }
 0x2ef   :  { %v5955_v0 = vpop.f32.mrf.mxu0 }
 0x2f1   :  { %v1648_v1 = vpop.f32.mrf.mxu0 }
 0x2f3   :  { %v5956_v2 = vpop.f32.mrf.mxu0 }
 0x2f4   :  { %v1840_v24 = vpack.c.bf16 %v5956_v2, %v5955_v0  ;;  %v6641_v0 = vld [vmem:[%s10270_s0 + $0x4c] ss:$12 sps:$4 sm:$0xff]  }
 0x2f5   :  { %v1651_v3 = vpop.f32.mrf.mxu0 }
 0x2f6   :  { %v1839_v26 = vpack.c.bf16 %v1651_v3, %v1648_v1  ;;  %v6642_v3 = vld [vmem:[%s10270_s0 + $0x48] ss:$12 sps:$4 sm:$0xff]  }
 0x2f7   :  { %v5959_v4 = vpop.f32.mrf.mxu0 }
 0x2f9   :  { %v1664_v5 = vpop.f32.mrf.mxu0 }
 0x2fb   :  { %v5960_v6 = vpop.f32.mrf.mxu0 }
 0x2fc   :  { %v1842_v19 = vpack.c.bf16 %v5960_v6, %v5959_v4  ;;  %v6643_v4 = vld [vmem:[%s10270_s0 + $0x64] ss:$12 sps:$4 sm:$0xff]  }
 0x2fd   :  { %v1667_v33 = vpop.f32.mrf.mxu0 }
 0x2fe   :  { %v1841_v22 = vpack.c.bf16 %v1667_v33, %v1664_v5 }
 0x2ff   :  { %v5963_v7 = vpop.f32.mrf.mxu0 }
 0x301   :  { %v1680_v8 = vpop.f32.mrf.mxu0 }
 0x303   :  { %v5964_v9 = vpop.f32.mrf.mxu0 }
 0x304   :  { %v1844_v17 = vpack.c.bf16 %v5964_v9, %v5963_v7  ;;  %v6644_v9 = vld [vmem:[%s10270_s0 + $0x60] ss:$12 sps:$4 sm:$0xff]  }
 0x305   :  { %v1683_v10 = vpop.f32.mrf.mxu0 }
 0x306   :  { %v1843_v18 = vpack.c.bf16 %v1683_v10, %v1680_v8 }
 0x307   :  { %v5967_v11 = vpop.f32.mrf.mxu0 }
 0x309   :  { %v1696_v12 = vpop.f32.mrf.mxu0 }
 0x30b   :  { %v5968_v13 = vpop.f32.mrf.mxu0 }
 0x30c   :  { %v1846_v14 = vpack.c.bf16 %v5968_v13, %v5967_v11  ;;  %v6645_v11 = vld [vmem:[%s10270_s0 + $0x7c] ss:$12 sps:$4 sm:$0xff]   ;;  %v6646_v13 = vld [vmem:[%s10270_s0 + $0x78] ss:$12 sps:$4 sm:$0xff]  }
 0x30d   :  { %v1699_v15 = vpop.f32.mrf.mxu0 }
 0x30e   :  { %1871 = vmatpush1.bf16.msra.mxu1 %v1846_v14  ;;  %v1845_v16 = vpack.c.bf16 %v1699_v15, %v1696_v12  ;;  %v6647_v15 = vld [vmem:[%s10270_s0 + $0x94] ss:$12 sps:$4 sm:$0xff]  }
 0x30f   :  { %1872 = vmatprep.subr.bf16.mxu1 %v7074_v32 }
 0x312   :  { %1873 = vmatpush1.bf16.msra.mxu1 %v1845_v16 }
 0x313   :  { %1874 = vmatprep.subr.bf16.mxu1 %v7074_v32 }
 0x315   :  { %v5971_v20 = vpop.f32.mrf.mxu0 }
 0x316   :  { %1875 = vmatpush1.bf16.msra.mxu1 %v1844_v17  ;;  %v6648_v17 = vld [vmem:[%s10270_s0 + $0x90] ss:$12 sps:$4 sm:$0xff]  }
 0x317   :  { %1876 = vmatprep.subr.bf16.mxu1 %v7074_v32  ;;  %v1712_v21 = vpop.f32.mrf.mxu0 }
 0x319   :  { %v5972_v23 = vpop.f32.mrf.mxu0 }
 0x31a   :  { %1877 = vmatpush1.bf16.msra.mxu1 %v1843_v18  ;;  %v1848_v49 = vpack.c.bf16 %v5972_v23, %v5971_v20  ;;  %v6649_v20 = vld [vmem:[%s10270_s0 + $0xac] ss:$12 sps:$4 sm:$0xff]   ;;  %v6651_v23 = vld [vmem:[%s10270_s0 + $0xc4] ss:$12 sps:$4 sm:$0xff]  }
 0x31b   :  { %1878 = vmatprep.subr.bf16.mxu1 %v7074_v32  ;;  %v1715_v25 = vpop.f32.mrf.mxu0 }
 0x31c   :  { %v1847_v51 = vpack.c.bf16 %v1715_v25, %v1712_v21  ;;  %v6650_v21 = vld [vmem:[%s10270_s0 + $0xa8] ss:$12 sps:$4 sm:$0xff]   ;;  %v6653_v25 = vld [vmem:[%s10270_s0 + $0x20] ss:$12 sps:$4 sm:$0xff]  }
 0x31e   :  { %1879 = vmatpush1.bf16.msra.mxu1 %v1842_v19 }
 0x31f   :  { %1880 = vmatprep.subr.bf16.mxu1 %v7074_v32 }
 0x322   :  { %1881 = vmatpush1.bf16.msra.mxu1 %v1841_v22 }
 0x323   :  { %1882 = vmatprep.subr.bf16.mxu1 %v7074_v32 }
 0x325   :  { %v5975_v27 = vpop.f32.mrf.mxu0 }
 0x326   :  { %1883 = vmatpush1.bf16.msra.mxu1 %v1840_v24  ;;  %v6652_v24 = vld [vmem:[%s10270_s0 + $0xc0] ss:$12 sps:$4 sm:$0xff]  }
 0x327   :  { %1884 = vmatprep.subr.bf16.mxu1 %v7074_v32  ;;  %v1728_v28 = vpop.f32.mrf.mxu0 }
 0x329   :  { %v5976_v29 = vpop.f32.mrf.mxu0 }
 0x32a   :  { %1885 = vmatpush1.bf16.msra.mxu1 %v1839_v26  ;;  %v1850_v45 = vpack.c.bf16 %v5976_v29, %v5975_v27  ;;  %v6654_v26 = vld [vmem:[%s10270_s0 + $0xdc] ss:$12 sps:$4 sm:$0xff]   ;;  %v6655_v27 = vld [vmem:[%s10270_s0 + $0x38] ss:$12 sps:$4 sm:$0xff]  }
 0x32b   :  { %1886 = vmatprep.subr.bf16.mxu1 %v7074_v32  ;;  %v1731_v30 = vpop.f32.mrf.mxu0  ;;  %v6657_v29 = vld [vmem:[%s10270_s0 + $0x50] ss:$12 sps:$4 sm:$0xff]  }
 0x32c   :  { %v1849_v47 = vpack.c.bf16 %v1731_v30, %v1728_v28  ;;  %v6656_v28 = vld [vmem:[%s10270_s0 + $0xd8] ss:$12 sps:$4 sm:$0xff]   ;;  %v6658_v30 = vld [vmem:[%s10270_s0 + $0xf4] ss:$12 sps:$4 sm:$0xff]  }
 0x335   :  { %v5979_v31 = vpop.f32.mrf.mxu0 }
 0x337   :  { %v1744_v34 = vpop.f32.mrf.mxu0 }
 0x339   :  { %v5980_v35 = vpop.f32.mrf.mxu0 }
 0x33a   :  { %v1852_v43 = vpack.c.bf16 %v5980_v35, %v5979_v31  ;;  %v6659_v31 = vld [vmem:[%s10270_s0 + $0x68] ss:$12 sps:$4 sm:$0xff]   ;;  %v6661_v35 = vld [vmem:[%s10270_s0 + $0x80] ss:$12 sps:$4 sm:$0xff]  }
 0x33b   :  { %v1747_v36 = vpop.f32.mrf.mxu0 }
 0x33c   :  { %v1851_v44 = vpack.c.bf16 %v1747_v36, %v1744_v34  ;;  %v6660_v34 = vld [vmem:[%s10270_s0 + $0xf0] ss:$12 sps:$4 sm:$0xff]   ;;  %v6662_v36 = vld [vmem:[%s10270_s0 + $0x10c] ss:$12 sps:$4 sm:$0xff]  }
 0x345   :  { %v5983_v37 = vpop.f32.mrf.mxu0 }
 0x347   :  { %v1760_v38 = vpop.f32.mrf.mxu0 }
 0x349   :  { %v5984_v39 = vpop.f32.mrf.mxu0 }
 0x34a   :  { %v1854_v40 = vpack.c.bf16 %v5984_v39, %v5983_v37  ;;  %v6663_v37 = vld [vmem:[%s10270_s0 + $0x98] ss:$12 sps:$4 sm:$0xff]   ;;  %v6665_v39 = vld [vmem:[%s10270_s0 + $0xb0] ss:$12 sps:$4 sm:$0xff]  }
 0x34b   :  { %v1763_v41 = vpop.f32.mrf.mxu0 }
 0x34c   :  { %1887 = vmatpush2.bf16.msra.mxu1 %v1854_v40  ;;  %v1853_v42 = vpack.c.bf16 %v1763_v41, %v1760_v38  ;;  %v6664_v38 = vld [vmem:[%s10270_s0 + $0x108] ss:$12 sps:$4 sm:$0xff]   ;;  %v6666_v40 = vld [vmem:[%s10270_s0 + $0x124] ss:$12 sps:$4 sm:$0xff]  }
 0x34d   :  { %1888 = vmatprep.subr.bf16.mxu1 %v7074_v32  ;;  %v6667_v41 = vld [vmem:[%s10270_s0 + $0xc8] ss:$12 sps:$4 sm:$0xff]  }
 0x350   :  { %1889 = vmatpush2.bf16.msra.mxu1 %v1853_v42  ;;  %v6668_v42 = vld [vmem:[%s10270_s0 + $0x120] ss:$12 sps:$4 sm:$0xff]  }
 0x351   :  { %1890 = vmatprep.subr.bf16.mxu1 %v7074_v32 }
 0x354   :  { %1891 = vmatpush2.bf16.msra.mxu1 %v1852_v43  ;;  %v6669_v43 = vld [vmem:[%s10270_s0 + $0xe0] ss:$12 sps:$4 sm:$0xff]  }
 0x355   :  { %1892 = vmatprep.subr.bf16.mxu1 %v7074_v32  ;;  %v7585_v46 = vpop.f32.mrf.mxu0 }
 0x357   :  { %v7588_v48 = vpop.f32.mrf.mxu0 }
 0x358   :  { %1893 = vmatpush2.bf16.msra.mxu1 %v1851_v44  ;;  %v6670_v44 = vld [vmem:[%s10270_s0 + $0x13c] ss:$12 sps:$4 sm:$0xff]  }
 0x359   :  { %1894 = vmatprep.subr.bf16.mxu1 %v7074_v32  ;;  %v7591_v50 = vpop.f32.mrf.mxu0 }
 0x35a   :  { %v1856_v19 = vpack.c.bf16 %v7591_v50, %v7585_v46  ;;  %v6672_v46 = vld [vmem:[%s10270_s0 + $0x138] ss:$12 sps:$4 sm:$0xff]  }
 0x35b   :  { %v7594_v52 = vpop.f32.mrf.mxu0  ;;  %v6435_v50 = vld [vmem:[%s10273_s5 + $0x38] sm:$0xff]  }
 0x35c   :  { %1895 = vmatpush2.bf16.msra.mxu1 %v1850_v45  ;;  %v1855_v22 = vpack.c.bf16 %v7594_v52, %v7588_v48  ;;  %v6671_v45 = vld [vmem:[%s10270_s0 + $0xf8] ss:$12 sps:$4 sm:$0xff]   ;;  %v6674_v48 = vld [vmem:[%s10270_s0 + $0x154] ss:$12 sps:$4 sm:$0xff]  }
 0x35d   :  { %1896 = vmatprep.subr.bf16.mxu1 %v7074_v32  ;;  %v6677_v52 = vld [vmem:[%s10270_s0 + $0x140] ss:$12 sps:$4 sm:$0xff]  }
 0x360   :  { %1897 = vmatpush2.bf16.msra.mxu1 %v1849_v47  ;;  %v6673_v47 = vld [vmem:[%s10270_s0 + $0x110] ss:$12 sps:$4 sm:$0xff]  }
 0x361   :  { %1898 = vmatprep.subr.bf16.mxu1 %v7074_v32 }
 0x364   :  { %1899 = vmatpush2.bf16.msra.mxu1 %v1848_v49  ;;  %v6675_v49 = vld [vmem:[%s10270_s0 + $0x128] ss:$12 sps:$4 sm:$0xff]  }
 0x365   :  { %1900 = vmatprep.subr.bf16.mxu1 %v7074_v32  ;;  %v5991_v53 = vpop.f32.mrf.mxu0 }
 0x367   :  { %v1792_v56 = vpop.f32.mrf.mxu0 }
 0x368   :  { %1901 = vmatpush2.bf16.msra.mxu1 %v1847_v51  ;;  %v6676_v51 = vld [vmem:[%s10270_s0 + $0x150] ss:$12 sps:$4 sm:$0xff]  }
 0x369   :  { %2712 = vmatprep.subr.bf16.mxu1 %v7074_v32  ;;  %v5992_v57 = vpop.f32.mrf.mxu0 }
 0x36a   :  { %v1858_v16 = vpack.c.bf16 %v5992_v57, %v5991_v53  ;;  %v6678_v53 = vld [vmem:[%s10270_s0 + $0x16c] ss:$12 sps:$4 sm:$0xff]   ;;  %v6680_v57 = vld [vmem:[%s10270_s0 + $0x168] ss:$12 sps:$4 sm:$0xff]  }
 0x36b   :  { %1903 = vmatmul.mubr.bf16.vlgmr.msra.gmra.mxu1 %v6636_v54  ;;  %v1795_v60 = vpop.f32.mrf.mxu0  ;;  %v6436_v54 = vld [vmem:[%s10273_s5 + $0x30] sm:$0xff]  }
 0x36c   :  { %1910 = vmatprep.mubr.bf16.mxu1 %v6637_v55  ;;  %v1857_v18 = vpack.c.bf16 %v1795_v60, %v1792_v56  ;;  %v6679_v55 = vld [vmem:[%s10270_s0 + $0x158] ss:$12 sps:$4 sm:$0xff]   ;;  %v6437_v56 = vld [vmem:[%s10273_s5 + $0x28] sm:$0xff]  }
 0x36d   :  { %v6438_v60 = vld [vmem:[%s10273_s5 + $0x20] sm:$0xff]  }
 0x373   :  { %1911 = vmatmul.mubr.bf16.gmra.mxu1 %v6638_v58  ;;  %v6681_v58 = vld [vmem:[%s10270_s0 + $0x170] ss:$12 sps:$4 sm:$0xff]  }
 0x374   :  { %1918 = vmatprep.mubr.bf16.mxu1 %v6639_v59  ;;  %v6682_v59 = vld [vmem:[%s10270_s0 + $0x184] ss:$12 sps:$4 sm:$0xff]  }
 0x375   :  { %v5995_v61 = vpop.f32.mrf.mxu0 }
 0x377   :  { %v1808_v62 = vpop.f32.mrf.mxu0 }
 0x379   :  { %v5996_v1 = vpop.f32.mrf.mxu0 }
 0x37a   :  { %v1860_v12 = vpack.c.bf16 %v5996_v1, %v5995_v61  ;;  %v6683_v61 = vld [vmem:[%s10270_s0 + $0x188] ss:$12 sps:$4 sm:$0xff]   ;;  %v6686_v1 = vld [vmem:[%s10270_s0 + $0x1a0] ss:$12 sps:$4 sm:$0xff]  }
 0x37b   :  { %1919 = vmatmul.mubr.bf16.gmra.mxu1 %v6640_v63  ;;  %v1811_v2 = vpop.f32.mrf.mxu0  ;;  %v6684_v63 = vld [vmem:[%s10270_s0 + $0x180] ss:$12 sps:$4 sm:$0xff]  }
 0x37c   :  { %1926 = vmatprep.mubr.bf16.mxu1 %v6641_v0  ;;  %v1859_v14 = vpack.c.bf16 %v1811_v2, %v1808_v62  ;;  %v6439_v62 = vld [vmem:[%s10273_s5 + $0x18] sm:$0xff]   ;;  %v6440_v2 = vld [vmem:[%s10273_s5 + $0x10] sm:$0xff]  }
 0x37d   :  { %v6685_v0 = vld [vmem:[%s10270_s0 + $0x19c] ss:$12 sps:$4 sm:$0xff]  }
 0x383   :  { %1927 = vmatmul.mubr.bf16.gmra.mxu1 %v6642_v3  ;;  %v6687_v3 = vld [vmem:[%s10270_s0 + $0x1b8] ss:$12 sps:$4 sm:$0xff]  }
 0x384   :  { %1934 = vmatprep.mubr.bf16.mxu1 %v6643_v4  ;;  %v6441_v4 = vld [vmem:[%s10273_s5 + $0x8] sm:$0xff]  }
 0x385   :  { %v5999_v5 = vpop.f32.mrf.mxu0 }
 0x387   :  { %v1824_v6 = vpop.f32.mrf.mxu0 }
 0x389   :  { %v6000_v33 = vpop.f32.mrf.mxu0 }
 0x38a   :  { %v1862_v7 = vpack.c.bf16 %v6000_v33, %v5999_v5  ;;  %v6688_v5 = vld [vmem:[%s10270_s0 + $0x198] ss:$12 sps:$4 sm:$0xff]   ;;  %v6690_v33 = vld [vmem:[%s10270_s0 + $0x1d0] ss:$12 sps:$4 sm:$0xff]  }
 0x38b   :  { %v1827_v8 = vpop.f32.mrf.mxu0  ;;  %1935 = vmatmul.mubr.bf16.gmra.mxu1 %v6644_v9  ;;  %v6692_v9 = vld [vmem:[%s10270_s0 + $0x1b0] ss:$12 sps:$4 sm:$0xff]  }
 0x38c   :  { %v1861_v10 = vpack.c.bf16 %v1827_v8, %v1824_v6  ;;  %6001 = vmatprep.subr.bf16.mxu0 %v1862_v7  ;;  %1942 = vmatprep.mubr.bf16.mxu1 %v6645_v11  ;;  %v6689_v6 = vld [vmem:[%s10270_s0 + $0x1b4] ss:$12 sps:$4 sm:$0xff]  }
 0x38d   :  { %6002 = vmatpush3.bf16.msra.mxu0 %v1862_v7  ;;  %v6442_v7 = vld [vmem:[%s10273_s5] sm:$0xff]   ;;  %v6691_v8 = vld [vmem:[%s10270_s0 + $0x1e8] ss:$12 sps:$4 sm:$0xff]  }
 0x38e   :  { %6003 = vmatprep.subr.bf16.mxu0 %v1861_v10  ;;  %v6694_v11 = vld [vmem:[%s10270_s0 + $0x200] ss:$12 sps:$4 sm:$0xff]  }
 0x391   :  { %6004 = vmatpush3.bf16.msra.mxu0 %v1861_v10  ;;  %v6693_v10 = vld [vmem:[%s10270_s0 + $0x1cc] ss:$12 sps:$4 sm:$0xff]  }
 0x392   :  { %6005 = vmatprep.subr.bf16.mxu0 %v1860_v12 }
 0x393   :  { %1943 = vmatmul.mubr.bf16.gmra.mxu1 %v6646_v13  ;;  %v6696_v13 = vld [vmem:[%s10270_s0 + $0x1c8] ss:$12 sps:$4 sm:$0xff]  }
 0x394   :  { %1950 = vmatprep.mubr.bf16.mxu1 %v6647_v15  ;;  %v6698_v15 = vld [vmem:[%s10270_s0 + $0x230] ss:$12 sps:$4 sm:$0xff]  }
 0x395   :  { %6006 = vmatpush3.bf16.msra.mxu0 %v1860_v12  ;;  %v6695_v12 = vld [vmem:[%s10270_s0 + $0x218] ss:$12 sps:$4 sm:$0xff]  }
 0x396   :  { %6007 = vmatprep.subr.bf16.mxu0 %v1859_v14 }
 0x399   :  { %6008 = vmatpush3.bf16.msra.mxu0 %v1859_v14  ;;  %v6697_v14 = vld [vmem:[%s10270_s0 + $0x1e4] ss:$12 sps:$4 sm:$0xff]  }
 0x39a   :  { %6009 = vmatprep.subr.bf16.mxu0 %v1858_v16 }
 0x39b   :  { %1951 = vmatmul.mubr.bf16.gmra.mxu1 %v6648_v17  ;;  %v6700_v17 = vld [vmem:[%s10270_s0 + $0x1fc] ss:$12 sps:$4 sm:$0xff]  }
 0x39c   :  { %1958 = vmatprep.mubr.bf16.mxu1 %v6649_v20  ;;  %v6702_v20 = vld [vmem:[%s10270_s0 + $0x214] ss:$12 sps:$4 sm:$0xff]  }
 0x39d   :  { %6010 = vmatpush3.bf16.msra.mxu0 %v1858_v16  ;;  %v6699_v16 = vld [vmem:[%s10270_s0 + $0x1e0] ss:$12 sps:$4 sm:$0xff]  }
 0x39e   :  { %6011 = vmatprep.subr.bf16.mxu0 %v1857_v18 }
 0x3a1   :  { %6012 = vmatpush3.bf16.msra.mxu0 %v1857_v18  ;;  %v6701_v18 = vld [vmem:[%s10270_s0 + $0x1f8] ss:$12 sps:$4 sm:$0xff]  }
 0x3a2   :  { %6013 = vmatprep.subr.bf16.mxu0 %v1856_v19 }
 0x3a3   :  { %1959 = vmatmul.mubr.bf16.gmra.mxu1 %v6650_v21  ;;  %v6704_v21 = vld [vmem:[%s10270_s0 + $0x22c] ss:$12 sps:$4 sm:$0xff]  }
 0x3a4   :  { %1966 = vmatprep.mubr.bf16.mxu1 %v6651_v23  ;;  %v6706_v23 = vld [vmem:[%s10270_s0 + $0x4] ss:$12 sps:$4 sm:$0xff]  }
 0x3a5   :  { %6014 = vmatpush3.bf16.msra.mxu0 %v1856_v19  ;;  %v6703_v19 = vld [vmem:[%s10270_s0 + $0x210] ss:$12 sps:$4 sm:$0xff]  }
 0x3a6   :  { %6015 = vmatprep.subr.bf16.mxu0 %v1855_v22 }
 0x3a9   :  { %6016 = vmatpush3.bf16.msra.mxu0 %v1855_v22  ;;  %v6705_v22 = vld [vmem:[%s10270_s0 + $0x228] ss:$12 sps:$4 sm:$0xff]  }
 0x3aa   :  { %6065 = vmatprep.subr.bf16.mxu0 %v6435_v50 }
 0x3ab   :  { %1967 = vmatmul.mubr.bf16.gmra.mxu1 %v6652_v24 }
 0x3ac   :  { %6018 = vmatmul.mubr.bf16.vlgmr.msra.gmra.mxu0 %v6653_v25  ;;  %1974 = vmatprep.mubr.bf16.mxu1 %v6654_v26 }
 0x3ad   :  { %6021 = vmatprep.mubr.bf16.mxu0 %v6655_v27  ;;  %6066 = vmatpush3.bf16.msra.mxu0 %v6435_v50 }
 0x3ae   :  { %6067 = vmatprep.subr.bf16.mxu0 %v6436_v54 }
 0x3b1   :  { %6068 = vmatpush3.bf16.msra.mxu0 %v6436_v54 }
 0x3b2   :  { %6069 = vmatprep.subr.bf16.mxu0 %v6437_v56 }
 0x3b3   :  { %1975 = vmatmul.mubr.bf16.gmra.mxu1 %v6656_v28 }
 0x3b4   :  { %6022 = vmatmul.mubr.bf16.gmra.mxu0 %v6657_v29  ;;  %1982 = vmatprep.mubr.bf16.mxu1 %v6658_v30 }
 0x3b5   :  { %6025 = vmatprep.mubr.bf16.mxu0 %v6659_v31  ;;  %6070 = vmatpush3.bf16.msra.mxu0 %v6437_v56 }
 0x3b6   :  { %6071 = vmatprep.subr.bf16.mxu0 %v6438_v60 }
 0x3b9   :  { %6072 = vmatpush3.bf16.msra.mxu0 %v6438_v60 }
 0x3ba   :  { %6073 = vmatprep.subr.bf16.mxu0 %v6439_v62 }
 0x3bb   :  { %1983 = vmatmul.mubr.bf16.gmra.mxu1 %v6660_v34 }
 0x3bc   :  { %6026 = vmatmul.mubr.bf16.gmra.mxu0 %v6661_v35  ;;  %1990 = vmatprep.mubr.bf16.mxu1 %v6662_v36 }
 0x3bd   :  { %6029 = vmatprep.mubr.bf16.mxu0 %v6663_v37  ;;  %6074 = vmatpush3.bf16.msra.mxu0 %v6439_v62 }
 0x3be   :  { %6075 = vmatprep.subr.bf16.mxu0 %v6440_v2 }
 0x3c1   :  { %6076 = vmatpush3.bf16.msra.mxu0 %v6440_v2 }
 0x3c2   :  { %6077 = vmatprep.subr.bf16.mxu0 %v6441_v4 }
 0x3c3   :  { %1991 = vmatmul.mubr.bf16.gmra.mxu1 %v6664_v38 }
 0x3c4   :  { %6030 = vmatmul.mubr.bf16.gmra.mxu0 %v6665_v39  ;;  %1998 = vmatprep.mubr.bf16.mxu1 %v6666_v40 }
 0x3c5   :  { %6033 = vmatprep.mubr.bf16.mxu0 %v6667_v41  ;;  %6078 = vmatpush3.bf16.msra.mxu0 %v6441_v4 }
 0x3c6   :  { %6079 = vmatprep.subr.bf16.mxu0 %v6442_v7 }
 0x3c9   :  { %6080 = vmatpush3.bf16.msra.mxu0 %v6442_v7 }
 0x3cb   :  { %1999 = vmatmul.mubr.bf16.gmra.mxu1 %v6668_v42 }
 0x3cc   :  { %6034 = vmatmul.mubr.bf16.gmra.mxu0 %v6669_v43  ;;  %2006 = vmatprep.mubr.bf16.mxu1 %v6670_v44 }
 0x3cd   :  { %6037 = vmatprep.mubr.bf16.mxu0 %v6671_v45 }
 0x3d3   :  { %2007 = vmatmul.mubr.bf16.gmra.mxu1 %v6672_v46 }
 0x3d4   :  { %6038 = vmatmul.mubr.bf16.gmra.mxu0 %v6673_v47  ;;  %2014 = vmatprep.mubr.bf16.mxu1 %v6674_v48 }
 0x3d5   :  { %6041 = vmatprep.mubr.bf16.mxu0 %v6675_v49 }
 0x3db   :  { %2015 = vmatmul.mubr.bf16.gmra.mxu1 %v6676_v51 }
 0x3dc   :  { %6042 = vmatmul.mubr.bf16.gmra.mxu0 %v6677_v52  ;;  %2022 = vmatprep.mubr.bf16.mxu1 %v6678_v53 }
 0x3dd   :  { %6045 = vmatprep.mubr.bf16.mxu0 %v6679_v55 }
 0x3e3   :  { %2023 = vmatmul.mubr.bf16.gmra.mxu1 %v6680_v57 }
 0x3e4   :  { %6046 = vmatmul.mubr.bf16.gmra.mxu0 %v6681_v58  ;;  %2030 = vmatprep.mubr.bf16.mxu1 %v6682_v59  ;;  %v7859_v59 = vld [vmem:[%s10274_s7] ss:$0 sm:$0xff] }
 0x3e5   :  { %6049 = vmatprep.mubr.bf16.mxu0 %v6683_v61 }
 0x3eb   :  { %2031 = vmatmul.mubr.bf16.gmra.mxu1 %v6684_v63 }
 0x3ec   :  { %2038 = vmatprep.mubr.bf16.mxu1 %v6685_v0  ;;  %6050 = vmatmul.mubr.bf16.gmra.mxu0 %v6686_v1 }
 0x3ed   :  { %6053 = vmatprep.mubr.bf16.mxu0 %v6687_v3 }
 0x3f3   :  { %2039 = vmatmul.mubr.bf16.gmra.mxu1 %v6688_v5 }
 0x3f4   :  { %2046 = vmatprep.mubr.bf16.mxu1 %v6689_v6  ;;  %6054 = vmatmul.mubr.bf16.gmra.mxu0 %v6690_v33 }
 0x3f5   :  { %6057 = vmatprep.mubr.bf16.mxu0 %v6691_v8 }
 0x3fb   :  { %2047 = vmatmul.mubr.bf16.gmra.mxu1 %v6692_v9 }
 0x3fc   :  { %2054 = vmatprep.mubr.bf16.mxu1 %v6693_v10  ;;  %6058 = vmatmul.mubr.bf16.gmra.mxu0 %v6694_v11 }
 0x3fd   :  { %6061 = vmatprep.mubr.bf16.mxu0 %v6695_v12 }
 0x403   :  { %2055 = vmatmul.mubr.bf16.gmra.mxu1 %v6696_v13 }
 0x404   :  { %2062 = vmatprep.mubr.bf16.mxu1 %v6697_v14  ;;  %6062 = vmatmul.mubr.bf16.gmra.mxu0 %v6698_v15 }
 0x40b   :  { %2063 = vmatmul.mubr.bf16.gmra.mxu1 %v6699_v16 }
 0x40c   :  { %2070 = vmatprep.mubr.bf16.mxu1 %v6700_v17 }
 0x413   :  { %2071 = vmatmul.mubr.bf16.gmra.mxu1 %v6701_v18 }
 0x414   :  { %2078 = vmatprep.mubr.bf16.mxu1 %v6702_v20 }
 0x41b   :  { %2079 = vmatmul.mubr.bf16.gmra.mxu1 %v6703_v19 }
 0x41c   :  { %2086 = vmatprep.mubr.bf16.mxu1 %v6704_v21 }
 0x423   :  { %2087 = vmatmul.mubr.bf16.gmra.mxu1 %v6705_v22 }
 0x424   :  { %2744 = vmatprep.mubr.bf16.mxu1 %v6706_v23 }
 0x42b   :  { %v1904_v24 = vpop.f32.mrf.mxu1 }
 0x42c   :  { %v1905_v3 = vadd.f32 %v7859_v59, %v1904_v24 }
 0x42d   :  { %v1906_v25 = vpop.f32.mrf.mxu1 }
 0x42f   :  { %v1907_v26 = vpop.f32.mrf.mxu1 }
 0x430   :  { %v1908_v5 = vadd.f32 %v7859_v59, %v1907_v26 }
 0x431   :  { %v1909_v27 = vpop.f32.mrf.mxu1 }
 0x433   :  { %v1912_v28 = vpop.f32.mrf.mxu1 }
 0x434   :  { %v1913_v61 = vadd.f32 %v7859_v59, %v1912_v28 }
 0x435   :  { %v1914_v29 = vpop.f32.mrf.mxu1 }
 0x437   :  { %v1915_v30 = vpop.f32.mrf.mxu1 }
 0x438   :  { %v1916_v0 = vadd.f32 %v7859_v59, %v1915_v30 }
 0x439   :  { %v1917_v31 = vpop.f32.mrf.mxu1 }
 0x43b   :  { %v1920_v34 = vpop.f32.mrf.mxu1 }
 0x43c   :  { %v1921_v25 = vadd.f32 %v7859_v59, %v1920_v34 }
 0x43d   :  { %v1922_v35 = vpop.f32.mrf.mxu1 }
 0x43f   :  { %v1923_v36 = vpop.f32.mrf.mxu1 }
 0x440   :  { %v1924_v28 = vadd.f32 %v7859_v59, %v1923_v36 }
 0x441   :  { %v1925_v37 = vpop.f32.mrf.mxu1 }
 0x443   :  { %v1928_v38 = vpop.f32.mrf.mxu1 }
 0x444   :  { %v1929_v14 = vadd.f32 %v7859_v59, %v1928_v38 }
 0x445   :  { %v1930_v39 = vpop.f32.mrf.mxu1 }
 0x447   :  { %v1931_v40 = vpop.f32.mrf.mxu1 }
 0x448   :  { %v1932_v19 = vadd.f32 %v7859_v59, %v1931_v40 }
 0x449   :  { %v1933_v41 = vpop.f32.mrf.mxu1 }
 0x44b   :  { %v7838_v42 = vpop.f32.mrf.mxu1 }
 0x44d   :  { %v1938_v43 = vpop.f32.mrf.mxu1 }
 0x44f   :  { %v7840_v44 = vpop.f32.mrf.mxu1 }
 0x451   :  { %v1941_v45 = vpop.f32.mrf.mxu1 }
 0x453   :  { %v7842_v46 = vpop.f32.mrf.mxu1 }
 0x454   :  { %v1945_v43 = vadd.f32 %v7859_v59, %v7842_v46  ;;  %v1940_v46 = vadd.f32 %v7859_v59, %v7840_v44 }
 0x455   :  { %v1946_v47 = vpop.f32.mrf.mxu1 }
 0x457   :  { %v7844_v48 = vpop.f32.mrf.mxu1 }
 0x459   :  { %v1949_v49 = vpop.f32.mrf.mxu1 }
 0x45b   :  { %v7846_v50 = vpop.f32.mrf.mxu1 }
 0x45d   :  { %v1954_v51 = vpop.f32.mrf.mxu1 }
 0x45f   :  { %v7848_v52 = vpop.f32.mrf.mxu1 }
 0x461   :  { %v1957_v53 = vpop.f32.mrf.mxu1 }
 0x463   :  { %v7850_v54 = vpop.f32.mrf.mxu1 }
 0x465   :  { %v1962_v55 = vpop.f32.mrf.mxu1 }
 0x466   :  { %v1948_v55 = vadd.f32 %v7859_v59, %v7844_v48 }
 0x467   :  { %v7852_v56 = vpop.f32.mrf.mxu1 }
 0x469   :  { %v1965_v57 = vpop.f32.mrf.mxu1 }
 0x46b   :  { %v7854_v58 = vpop.f32.mrf.mxu1 }
 0x46c   :  { %v6019_v60 = vpop.f32.mrf.mxu0 }
 0x46d   :  { %v1970_v62 = vpop.f32.mrf.mxu1  ;;  %v2138_v1 = vadd.f32 %v6019_v60, %v1913_v61 }
 0x46e   :  { %v2129_v63 = vpop.f32.mrf.mxu0 }
 0x46f   :  { %v7863_v2 = vpop.f32.mrf.mxu1  ;;  %v2130_v7 = vadd.f32 %v2129_v63, %v1905_v3  ;;  %v2322_v9 = vmax.f32 %v2138_v1, 0.0  ;;  %v1937_v63 = vadd.f32 %v7859_v59, %v7838_v42 }
 0x470   :  { %v6020_v4 = vpop.f32.mrf.mxu0 }
 0x471   :  { %v2141_v6 = vadd.f32 %v6020_v4, %v1916_v0  ;;  %v1973_v33 = vpop.f32.mrf.mxu1  ;;  %v2320_v18 = vmax.f32 %v2130_v7, 0.0 }
 0x472   :  { %v2132_v8 = vpop.f32.mrf.mxu0 }
 0x473   :  { %v2323_v10 = vmax.f32 %v2141_v6, 0.0  ;;  %v2133_v11 = vadd.f32 %v2132_v8, %v1908_v5  ;;  %v7867_v12 = vpop.f32.mrf.mxu1 }
 0x474   :  { %v6023_v13 = vpop.f32.mrf.mxu0 }
 0x475   :  { %v2369_v15 = vpack.c.bf16 %v2323_v10, %v2322_v9  ;;  %v2321_v16 = vmax.f32 %v2133_v11, 0.0  ;;  %v1978_v17 = vpop.f32.mrf.mxu1  ;;  %v2154_v23 = vadd.f32 %v6023_v13, %v1929_v14  ;;  %v1961_v10 = vadd.f32 %v7859_v59, %v7850_v54 }
 0x476   :  { %v2145_v20 = vpop.f32.mrf.mxu0  ;;  %v1964_v17 = vadd.f32 %v7859_v59, %v7852_v56  ;;  %v1956_v54 = vadd.f32 %v7859_v59, %v7848_v52 }
 0x477   :  { %v3647_v21 = vunpack.c.l.bf16 %v2369_v15  ;;  %v3648_v22 = vunpack.c.h.bf16 %v2369_v15  ;;  %v7871_v24 = vpop.f32.mrf.mxu1  ;;  %v2368_v27 = vpack.c.bf16 %v2321_v16, %v2320_v18  ;;  %v2146_v31 = vadd.f32 %v2145_v20, %v1921_v25 }
 0x478   :  { %v6024_v26 = vpop.f32.mrf.mxu0  ;;  %v2326_v34 = vmax.f32 %v2154_v23, 0.0 }
 0x479   :  { %3695 = vst [vmem:[%s10275_s11 + $0x10] sm:$0xff] %v3647_v21  ;;  %3696 = vst [vmem:[%s10275_s11 + $0x18] sm:$0xff] %v3648_v22  ;;  %v2157_v29 = vadd.f32 %v6024_v26, %v1932_v19  ;;  %v1981_v30 = vpop.f32.mrf.mxu1  ;;  %6081 = vmatprep.mubr.bf16.mxu0 %v2368_v27  ;;  %v3645_v35 = vunpack.c.l.bf16 %v2368_v27  ;;  %v3646_v37 = vunpack.c.h.bf16 %v2368_v27  ;;  %v2324_v51 = vmax.f32 %v2146_v31, 0.0 }
 0x47a   :  { %v2148_v38 = vpop.f32.mrf.mxu0  ;;  %6082 = vmatmul.mubr.bf16.vlgmr.msra.gmra.mxu0 %v2369_v15  ;;  %v1953_v22 = vadd.f32 %v7859_v59, %v7846_v50 }
 0x47b   :  { %v2327_v39 = vmax.f32 %v2157_v29, 0.0  ;;  %v2149_v40 = vadd.f32 %v2148_v38, %v1924_v28  ;;  %v7881_v36 = vpop.f32.mrf.mxu1  ;;  %3693 = vst [vmem:[%s10275_s11] sm:$0xff] %v3645_v35  ;;  %3694 = vst [vmem:[%s10275_s11 + $0x8] sm:$0xff] %v3646_v37  ;;  %v1977_v38 = vadd.f32 %v7859_v59, %v7867_v12  ;;  %v1972_v12 = vadd.f32 %v7859_v59, %v7863_v2 }
 0x47c   :  { %v6027_v41 = vpop.f32.mrf.mxu0 }
 0x47d   :  { %v2371_v45 = vpack.c.bf16 %v2327_v39, %v2326_v34  ;;  %v2325_v47 = vmax.f32 %v2149_v40, 0.0  ;;  %v1986_v49 = vpop.f32.mrf.mxu1  ;;  %v2170_v61 = vadd.f32 %v6027_v41, %v1945_v43 }
 0x47e   :  { %v2161_v53 = vpop.f32.mrf.mxu0 }
 0x47f   :  { %v3651_v57 = vunpack.c.l.bf16 %v2371_v45  ;;  %v3652_v60 = vunpack.c.h.bf16 %v2371_v45  ;;  %v7893_v62 = vpop.f32.mrf.mxu1  ;;  %v2370_v1 = vpack.c.bf16 %v2325_v47, %v2324_v51  ;;  %v2162_v4 = vadd.f32 %v2161_v53, %v1937_v63 }
 0x480   :  { %v6028_v0 = vpop.f32.mrf.mxu0  ;;  %v2330_v33 = vmax.f32 %v2170_v61, 0.0 }
 0x481   :  { %3699 = vst [vmem:[%s10275_s11 + $0x30] sm:$0xff] %v3651_v57  ;;  %3700 = vst [vmem:[%s10275_s11 + $0x38] sm:$0xff] %v3652_v60  ;;  %v2173_v48 = vadd.f32 %v6028_v0, %v1948_v55  ;;  %v1989_v3 = vpop.f32.mrf.mxu1  ;;  %6085 = vmatprep.mubr.bf16.mxu0 %v2370_v1  ;;  %v3649_v5 = vunpack.c.l.bf16 %v2370_v1  ;;  %v3650_v6 = vunpack.c.h.bf16 %v2370_v1  ;;  %v2328_v15 = vmax.f32 %v2162_v4, 0.0 }
 0x482   :  { %v2164_v42 = vpop.f32.mrf.mxu0  ;;  %6086 = vmatmul.mubr.bf16.gmra.mxu0 %v2371_v45  ;;  %v1980_v45 = vadd.f32 %v7859_v59, %v7871_v24  ;;  %v1969_v55 = vadd.f32 %v7859_v59, %v7854_v58 }
 0x483   :  { %v2331_v7 = vmax.f32 %v2173_v48, 0.0  ;;  %v2165_v8 = vadd.f32 %v2164_v42, %v1940_v46  ;;  %v7905_v44 = vpop.f32.mrf.mxu1  ;;  %3697 = vst [vmem:[%s10275_s11 + $0x20] sm:$0xff] %v3649_v5  ;;  %3698 = vst [vmem:[%s10275_s11 + $0x28] sm:$0xff] %v3650_v6 }
 0x484   :  { %v6031_v9 = vpop.f32.mrf.mxu0  ;;  %v1993_v5 = vadd.f32 %v7859_v59, %v7905_v44 }
 0x485   :  { %v2373_v11 = vpack.c.bf16 %v2331_v7, %v2330_v33  ;;  %v2329_v13 = vmax.f32 %v2165_v8, 0.0  ;;  %v1994_v14 = vpop.f32.mrf.mxu1  ;;  %v2186_v19 = vadd.f32 %v6031_v9, %v1961_v10 }
 0x486   :  { %v2177_v16 = vpop.f32.mrf.mxu0 }
 0x487   :  { %v3655_v18 = vunpack.c.l.bf16 %v2373_v11  ;;  %v3656_v20 = vunpack.c.h.bf16 %v2373_v11  ;;  %v1995_v21 = vpop.f32.mrf.mxu1  ;;  %v2372_v25 = vpack.c.bf16 %v2329_v13, %v2328_v15  ;;  %v2178_v27 = vadd.f32 %v2177_v16, %v1953_v22 }
 0x488   :  { %v6032_v23 = vpop.f32.mrf.mxu0  ;;  %v2334_v30 = vmax.f32 %v2186_v19, 0.0  ;;  %v1996_v9 = vadd.f32 %v7859_v59, %v1995_v21  ;;  %v1985_v15 = vadd.f32 %v7859_v59, %v7881_v36 }
 0x489   :  { %3703 = vst [vmem:[%s10275_s11 + $0x50] sm:$0xff] %v3655_v18  ;;  %3704 = vst [vmem:[%s10275_s11 + $0x58] sm:$0xff] %v3656_v20  ;;  %v2189_v56 = vadd.f32 %v6032_v23, %v1964_v17  ;;  %v1997_v26 = vpop.f32.mrf.mxu1  ;;  %6089 = vmatprep.mubr.bf16.mxu0 %v2372_v25  ;;  %v3653_v28 = vunpack.c.l.bf16 %v2372_v25  ;;  %v3654_v29 = vunpack.c.h.bf16 %v2372_v25  ;;  %v2332_v41 = vmax.f32 %v2178_v27, 0.0 }
 0x48a   :  { %v2180_v50 = vpop.f32.mrf.mxu0  ;;  %6090 = vmatmul.mubr.bf16.gmra.mxu0 %v2373_v11  ;;  %v1988_v18 = vadd.f32 %v7859_v59, %v7893_v62 }
 0x48b   :  { %v2335_v31 = vmax.f32 %v2189_v56, 0.0  ;;  %v2181_v35 = vadd.f32 %v2180_v50, %v1956_v54  ;;  %v7927_v52 = vpop.f32.mrf.mxu1  ;;  %3701 = vst [vmem:[%s10275_s11 + $0x40] sm:$0xff] %v3653_v28  ;;  %3702 = vst [vmem:[%s10275_s11 + $0x48] sm:$0xff] %v3654_v29 }
 0x48c   :  { %v6035_v37 = vpop.f32.mrf.mxu0  ;;  %v2001_v50 = vadd.f32 %v7859_v59, %v7927_v52 }
 0x48d   :  { %v2375_v34 = vpack.c.bf16 %v2335_v31, %v2334_v30  ;;  %v2333_v39 = vmax.f32 %v2181_v35, 0.0  ;;  %v2002_v40 = vpop.f32.mrf.mxu1  ;;  %v2202_v51 = vadd.f32 %v6035_v37, %v1977_v38 }
 0x48e   :  { %v2193_v43 = vpop.f32.mrf.mxu0 }
 0x48f   :  { %v3659_v47 = vunpack.c.l.bf16 %v2375_v34  ;;  %v3660_v49 = vunpack.c.h.bf16 %v2375_v34  ;;  %v7939_v53 = vpop.f32.mrf.mxu1  ;;  %v2374_v60 = vpack.c.bf16 %v2333_v39, %v2332_v41  ;;  %v2194_v63 = vadd.f32 %v2193_v43, %v1969_v55 }
 0x490   :  { %v6036_v57 = vpop.f32.mrf.mxu0  ;;  %v2338_v46 = vmax.f32 %v2202_v51, 0.0  ;;  %v2004_v43 = vadd.f32 %v7859_v59, %v7939_v53 }
 0x491   :  { %3707 = vst [vmem:[%s10275_s11 + $0x70] sm:$0xff] %v3659_v47  ;;  %3708 = vst [vmem:[%s10275_s11 + $0x78] sm:$0xff] %v3660_v49  ;;  %v2205_v24 = vadd.f32 %v6036_v57, %v1980_v45  ;;  %v2005_v61 = vpop.f32.mrf.mxu1  ;;  %6093 = vmatprep.mubr.bf16.mxu0 %v2374_v60  ;;  %v3657_v0 = vunpack.c.l.bf16 %v2374_v60  ;;  %v3658_v1 = vunpack.c.h.bf16 %v2374_v60  ;;  %v2336_v7 = vmax.f32 %v2194_v63, 0.0 }
 0x492   :  { %v2196_v58 = vpop.f32.mrf.mxu0  ;;  %6094 = vmatmul.mubr.bf16.gmra.mxu0 %v2375_v34 }
 0x493   :  { %v2339_v48 = vmax.f32 %v2205_v24, 0.0  ;;  %v2197_v3 = vadd.f32 %v2196_v58, %v1972_v12  ;;  %v2008_v2 = vpop.f32.mrf.mxu1  ;;  %3705 = vst [vmem:[%s10275_s11 + $0x60] sm:$0xff] %v3657_v0  ;;  %3706 = vst [vmem:[%s10275_s11 + $0x68] sm:$0xff] %v3658_v1 }
 0x494   :  { %v6039_v4 = vpop.f32.mrf.mxu0  ;;  %v2009_v26 = vadd.f32 %v7859_v59, %v2008_v2 }
 0x495   :  { %v2377_v6 = vpack.c.bf16 %v2339_v48, %v2338_v46  ;;  %v2337_v42 = vmax.f32 %v2197_v3, 0.0  ;;  %v2010_v33 = vpop.f32.mrf.mxu1  ;;  %v2218_v13 = vadd.f32 %v6039_v4, %v1993_v5 }
 0x496   :  { %v2209_v8 = vpop.f32.mrf.mxu0 }
 0x497   :  { %v3663_v10 = vunpack.c.l.bf16 %v2377_v6  ;;  %v3664_v11 = vunpack.c.h.bf16 %v2377_v6  ;;  %v2011_v14 = vpop.f32.mrf.mxu1  ;;  %v2376_v17 = vpack.c.bf16 %v2337_v42, %v2336_v7  ;;  %v2210_v19 = vadd.f32 %v2209_v8, %v1985_v15 }
 0x498   :  { %v6040_v16 = vpop.f32.mrf.mxu0  ;;  %v2342_v23 = vmax.f32 %v2218_v13, 0.0  ;;  %v2012_v35 = vadd.f32 %v7859_v59, %v2011_v14 }
 0x499   :  { %3711 = vst [vmem:[%s10275_s11 + $0x90] sm:$0xff] %v3663_v10  ;;  %3712 = vst [vmem:[%s10275_s11 + $0x98] sm:$0xff] %v3664_v11  ;;  %v2221_v44 = vadd.f32 %v6040_v16, %v1996_v9  ;;  %v2013_v20 = vpop.f32.mrf.mxu1  ;;  %6097 = vmatprep.mubr.bf16.mxu0 %v2376_v17  ;;  %v3661_v21 = vunpack.c.l.bf16 %v2376_v17  ;;  %v3662_v22 = vunpack.c.h.bf16 %v2376_v17  ;;  %v2340_v30 = vmax.f32 %v2210_v19, 0.0 }
 0x49a   :  { %v2212_v36 = vpop.f32.mrf.mxu0  ;;  %6098 = vmatmul.mubr.bf16.gmra.mxu0 %v2377_v6 }
 0x49b   :  { %v2343_v25 = vmax.f32 %v2221_v44, 0.0  ;;  %v2213_v54 = vadd.f32 %v2212_v36, %v1988_v18  ;;  %v2016_v62 = vpop.f32.mrf.mxu1  ;;  %3709 = vst [vmem:[%s10275_s11 + $0x80] sm:$0xff] %v3661_v21  ;;  %3710 = vst [vmem:[%s10275_s11 + $0x88] sm:$0xff] %v3662_v22 }
 0x49c   :  { %v6043_v56 = vpop.f32.mrf.mxu0  ;;  %v2017_v48 = vadd.f32 %v7859_v59, %v2016_v62 }
 0x49d   :  { %v2379_v27 = vpack.c.bf16 %v2343_v25, %v2342_v23  ;;  %v2341_v28 = vmax.f32 %v2213_v54, 0.0  ;;  %v2018_v29 = vpop.f32.mrf.mxu1  ;;  %v2234_v34 = vadd.f32 %v6043_v56, %v2009_v26 }
 0x49e   :  { %v2225_v31 = vpop.f32.mrf.mxu0 }
 0x49f   :  { %v3667_v37 = vunpack.c.l.bf16 %v2379_v27  ;;  %v3668_v38 = vunpack.c.h.bf16 %v2379_v27  ;;  %v2019_v39 = vpop.f32.mrf.mxu1  ;;  %v2378_v41 = vpack.c.bf16 %v2341_v28, %v2340_v30  ;;  %v2226_v52 = vadd.f32 %v2225_v31, %v2001_v50 }
 0x4a0   :  { %v6044_v40 = vpop.f32.mrf.mxu0  ;;  %v2346_v57 = vmax.f32 %v2234_v34, 0.0  ;;  %v2020_v7 = vadd.f32 %v7859_v59, %v2019_v39 }
 0x4a1   :  { %3715 = vst [vmem:[%s10275_s11 + $0xb0] sm:$0xff] %v3667_v37  ;;  %3716 = vst [vmem:[%s10275_s11 + $0xb8] sm:$0xff] %v3668_v38  ;;  %v2237_v45 = vadd.f32 %v6044_v40, %v2012_v35  ;;  %v2021_v47 = vpop.f32.mrf.mxu1  ;;  %6101 = vmatprep.mubr.bf16.mxu0 %v2378_v41  ;;  %v3665_v49 = vunpack.c.l.bf16 %v2378_v41  ;;  %v3666_v51 = vunpack.c.h.bf16 %v2378_v41  ;;  %v2344_v63 = vmax.f32 %v2226_v52, 0.0 }
 0x4a2   :  { %v2228_v55 = vpop.f32.mrf.mxu0  ;;  %6102 = vmatmul.mubr.bf16.gmra.mxu0 %v2379_v27 }
 0x4a3   :  { %v2347_v60 = vmax.f32 %v2237_v45, 0.0  ;;  %v2229_v12 = vadd.f32 %v2228_v55, %v2004_v43  ;;  %v2024_v53 = vpop.f32.mrf.mxu1  ;;  %3713 = vst [vmem:[%s10275_s11 + $0xa0] sm:$0xff] %v3665_v49  ;;  %3714 = vst [vmem:[%s10275_s11 + $0xa8] sm:$0xff] %v3666_v51 }
 0x4a4   :  { %v2025_v24 = vadd.f32 %v7859_v59, %v2024_v53  ;;  %v6047_v61 = vpop.f32.mrf.mxu0 }
 0x4a5   :  { %v2381_v0 = vpack.c.bf16 %v2347_v60, %v2346_v57  ;;  %v2345_v1 = vmax.f32 %v2229_v12, 0.0  ;;  %v2026_v58 = vpop.f32.mrf.mxu1 }
 0x4a6   :  { %v2241_v46 = vpop.f32.mrf.mxu0  ;;  %v2250_v6 = vadd.f32 %v6047_v61, %v2025_v24 }
 0x4a7   :  { %v3671_v3 = vunpack.c.l.bf16 %v2381_v0  ;;  %v3672_v2 = vunpack.c.h.bf16 %v2381_v0  ;;  %v2027_v4 = vpop.f32.mrf.mxu1  ;;  %v2380_v5 = vpack.c.bf16 %v2345_v1, %v2344_v63  ;;  %v2242_v8 = vadd.f32 %v2241_v46, %v2017_v48 }
 0x4a8   :  { %v2028_v42 = vadd.f32 %v7859_v59, %v2027_v4  ;;  %v6048_v33 = vpop.f32.mrf.mxu0  ;;  %v2350_v17 = vmax.f32 %v2250_v6, 0.0 }
 0x4a9   :  { %3719 = vst [vmem:[%s10275_s11 + $0xd0] sm:$0xff] %v3671_v3  ;;  %3720 = vst [vmem:[%s10275_s11 + $0xd8] sm:$0xff] %v3672_v2  ;;  %v2029_v9 = vpop.f32.mrf.mxu1  ;;  %6105 = vmatprep.mubr.bf16.mxu0 %v2380_v5  ;;  %v3669_v10 = vunpack.c.l.bf16 %v2380_v5  ;;  %v3670_v11 = vunpack.c.h.bf16 %v2380_v5  ;;  %v2348_v19 = vmax.f32 %v2242_v8, 0.0 }
 0x4aa   :  { %v2253_v13 = vadd.f32 %v6048_v33, %v2028_v42  ;;  %v2244_v14 = vpop.f32.mrf.mxu0  ;;  %6106 = vmatmul.mubr.bf16.gmra.mxu0 %v2381_v0 }
 0x4ab   :  { %3717 = vst [vmem:[%s10275_s11 + $0xc0] sm:$0xff] %v3669_v10  ;;  %3718 = vst [vmem:[%s10275_s11 + $0xc8] sm:$0xff] %v3670_v11  ;;  %v2245_v15 = vadd.f32 %v2244_v14, %v2020_v7  ;;  %v2032_v16 = vpop.f32.mrf.mxu1 }
 0x4ac   :  { %v2351_v18 = vmax.f32 %v2253_v13, 0.0  ;;  %v2033_v44 = vadd.f32 %v7859_v59, %v2032_v16  ;;  %v6051_v20 = vpop.f32.mrf.mxu0 }
 0x4ad   :  { %v2349_v21 = vmax.f32 %v2245_v15, 0.0  ;;  %v2034_v22 = vpop.f32.mrf.mxu1 }
 0x4ae   :  { %v2383_v36 = vpack.c.bf16 %v2351_v18, %v2350_v17  ;;  %v2257_v23 = vpop.f32.mrf.mxu0 }
 0x4af   :  { %v2035_v25 = vpop.f32.mrf.mxu1  ;;  %v2382_v54 = vpack.c.bf16 %v2349_v21, %v2348_v19  ;;  %v2258_v62 = vadd.f32 %v2257_v23, %v2033_v44 }
 0x4b0   :  { %v3675_v56 = vunpack.c.l.bf16 %v2383_v36  ;;  %v3676_v26 = vunpack.c.h.bf16 %v2383_v36  ;;  %v2036_v27 = vadd.f32 %v7859_v59, %v2035_v25  ;;  %v6052_v28 = vpop.f32.mrf.mxu0 }
 0x4b1   :  { %v2037_v29 = vpop.f32.mrf.mxu1  ;;  %6109 = vmatprep.mubr.bf16.mxu0 %v2382_v54  ;;  %v3673_v50 = vunpack.c.l.bf16 %v2382_v54  ;;  %v3674_v30 = vunpack.c.h.bf16 %v2382_v54  ;;  %v2352_v37 = vmax.f32 %v2258_v62, 0.0 }
 0x4b2   :  { %3723 = vst [vmem:[%s10275_s11 + $0xf0] sm:$0xff] %v3675_v56  ;;  %3724 = vst [vmem:[%s10275_s11 + $0xf8] sm:$0xff] %v3676_v26  ;;  %v2260_v31 = vpop.f32.mrf.mxu0  ;;  %6110 = vmatmul.mubr.bf16.gmra.mxu0 %v2383_v36 }
 0x4b3   :  { %3721 = vst [vmem:[%s10275_s11 + $0xe0] sm:$0xff] %v3673_v50  ;;  %3722 = vst [vmem:[%s10275_s11 + $0xe8] sm:$0xff] %v3674_v30  ;;  %v2040_v35 = vpop.f32.mrf.mxu1  ;;  %v2261_v38 = vadd.f32 %v2260_v31, %v2036_v27 }
 0x4b4   :  { %v2041_v34 = vadd.f32 %v7859_v59, %v2040_v35  ;;  %v6055_v39 = vpop.f32.mrf.mxu0 }
 0x4b5   :  { %v2042_v40 = vpop.f32.mrf.mxu1  ;;  %v2353_v41 = vmax.f32 %v2261_v38, 0.0 }
 0x4b6   :  { %v2266_v43 = vadd.f32 %v6051_v20, %v2041_v34  ;;  %v2273_v47 = vpop.f32.mrf.mxu0 }
 0x4b7   :  { %v2043_v52 = vpop.f32.mrf.mxu1  ;;  %v2384_v45 = vpack.c.bf16 %v2353_v41, %v2352_v37 }
 0x4b8   :  { %v2044_v49 = vadd.f32 %v7859_v59, %v2043_v52  ;;  %v2354_v60 = vmax.f32 %v2266_v43, 0.0  ;;  %v6056_v24 = vpop.f32.mrf.mxu0 }
 0x4b9   :  { %v2045_v51 = vpop.f32.mrf.mxu1  ;;  %v3677_v55 = vunpack.c.l.bf16 %v2384_v45  ;;  %v3678_v57 = vunpack.c.h.bf16 %v2384_v45  ;;  %6113 = vmatprep.mubr.bf16.mxu0 %v2384_v45 }
 0x4ba   :  { %v2269_v12 = vadd.f32 %v6052_v28, %v2044_v49  ;;  %v2276_v48 = vpop.f32.mrf.mxu0 }
 0x4bb   :  { %v2048_v53 = vpop.f32.mrf.mxu1  ;;  %3725 = vst [vmem:[%s10275_s11 + $0x100] sm:$0xff] %v3677_v55  ;;  %3726 = vst [vmem:[%s10275_s11 + $0x108] sm:$0xff] %v3678_v57 }
 0x4bc   :  { %v2049_v61 = vadd.f32 %v7859_v59, %v2048_v53  ;;  %v2355_v63 = vmax.f32 %v2269_v12, 0.0  ;;  %v6059_v7 = vpop.f32.mrf.mxu0 }
 0x4bd   :  { %v2050_v0 = vpop.f32.mrf.mxu1 }
 0x4be   :  { %v2385_v1 = vpack.c.bf16 %v2355_v63, %v2354_v60  ;;  %v2274_v58 = vadd.f32 %v2273_v47, %v2049_v61  ;;  %v2289_v15 = vpop.f32.mrf.mxu0 }
 0x4bf   :  { %v2051_v46 = vpop.f32.mrf.mxu1 }
 0x4c0   :  { %v2052_v3 = vadd.f32 %v7859_v59, %v2051_v46  ;;  %v3679_v2 = vunpack.c.l.bf16 %v2385_v1  ;;  %v3680_v4 = vunpack.c.h.bf16 %v2385_v1  ;;  %6114 = vmatmul.mubr.bf16.gmra.mxu0 %v2385_v1  ;;  %v2356_v6 = vmax.f32 %v2274_v58, 0.0  ;;  %v6060_v22 = vpop.f32.mrf.mxu0 }
 0x4c1   :  { %v2053_v5 = vpop.f32.mrf.mxu1 }
 0x4c2   :  { %3727 = vst [vmem:[%s10275_s11 + $0x110] sm:$0xff] %v3679_v2  ;;  %3728 = vst [vmem:[%s10275_s11 + $0x118] sm:$0xff] %v3680_v4  ;;  %v2277_v42 = vadd.f32 %v2276_v48, %v2052_v3  ;;  %v2292_v26 = vpop.f32.mrf.mxu0 }
 0x4c3   :  { %v2056_v33 = vpop.f32.mrf.mxu1 }
 0x4c4   :  { %v2057_v8 = vadd.f32 %v7859_v59, %v2056_v33  ;;  %v2357_v9 = vmax.f32 %v2277_v42, 0.0  ;;  %v6063_v37 = vpop.f32.mrf.mxu0 }
 0x4c5   :  { %v2058_v10 = vpop.f32.mrf.mxu1 }
 0x4c6   :  { %v2282_v11 = vadd.f32 %v6055_v39, %v2057_v8  ;;  %v2386_v13 = vpack.c.bf16 %v2357_v9, %v2356_v6  ;;  %v2305_v52 = vpop.f32.mrf.mxu0 }
 0x4c7   :  { %v2059_v14 = vpop.f32.mrf.mxu1 }
 0x4c8   :  { %v2060_v16 = vadd.f32 %v7859_v59, %v2059_v14  ;;  %v3681_v17 = vunpack.c.l.bf16 %v2386_v13  ;;  %v3682_v18 = vunpack.c.h.bf16 %v2386_v13  ;;  %6117 = vmatprep.mubr.bf16.mxu0 %v2386_v13  ;;  %v2358_v20 = vmax.f32 %v2282_v11, 0.0  ;;  %v6064_v12 = vpop.f32.mrf.mxu0 }
 0x4c9   :  { %v2061_v44 = vpop.f32.mrf.mxu1 }
 0x4ca   :  { %v2285_v19 = vadd.f32 %v6056_v24, %v2060_v16  ;;  %3729 = vst [vmem:[%s10275_s11 + $0x120] sm:$0xff] %v3681_v17  ;;  %3730 = vst [vmem:[%s10275_s11 + $0x128] sm:$0xff] %v3682_v18  ;;  %v2308_v58 = vpop.f32.mrf.mxu0 }
 0x4cb   :  { %v2064_v21 = vpop.f32.mrf.mxu1 }
 0x4cc   :  { %v2065_v36 = vadd.f32 %v7859_v59, %v2064_v21  ;;  %v2359_v23 = vmax.f32 %v2285_v19, 0.0 }
 0x4cd   :  { %v2066_v25 = vpop.f32.mrf.mxu1 }
 0x4ce   :  { %v2387_v54 = vpack.c.bf16 %v2359_v23, %v2358_v20  ;;  %v2290_v62 = vadd.f32 %v2289_v15, %v2065_v36 }
 0x4cf   :  { %v2067_v56 = vpop.f32.mrf.mxu1 }
 0x4d0   :  { %v2068_v27 = vadd.f32 %v7859_v59, %v2067_v56  ;;  %v3683_v28 = vunpack.c.l.bf16 %v2387_v54  ;;  %v3684_v29 = vunpack.c.h.bf16 %v2387_v54  ;;  %6118 = vmatmul.mubr.bf16.gmra.mxu0 %v2387_v54  ;;  %v2360_v30 = vmax.f32 %v2290_v62, 0.0 }
 0x4d1   :  { %v2069_v50 = vpop.f32.mrf.mxu1 }
 0x4d2   :  { %3731 = vst [vmem:[%s10275_s11 + $0x130] sm:$0xff] %v3683_v28  ;;  %3732 = vst [vmem:[%s10275_s11 + $0x138] sm:$0xff] %v3684_v29  ;;  %v2293_v31 = vadd.f32 %v2292_v26, %v2068_v27 }
 0x4d3   :  { %v2072_v35 = vpop.f32.mrf.mxu1 }
 0x4d4   :  { %v2073_v38 = vadd.f32 %v7859_v59, %v2072_v35  ;;  %v2361_v34 = vmax.f32 %v2293_v31, 0.0 }
 0x4d5   :  { %v2074_v39 = vpop.f32.mrf.mxu1 }
 0x4d6   :  { %v2298_v40 = vadd.f32 %v6059_v7, %v2073_v38  ;;  %v2388_v41 = vpack.c.bf16 %v2361_v34, %v2360_v30 }
 0x4d7   :  { %v2075_v43 = vpop.f32.mrf.mxu1 }
 0x4d8   :  { %v2076_v45 = vadd.f32 %v7859_v59, %v2075_v43  ;;  %v3685_v47 = vunpack.c.l.bf16 %v2388_v41  ;;  %v3686_v49 = vunpack.c.h.bf16 %v2388_v41  ;;  %6121 = vmatprep.mubr.bf16.mxu0 %v2388_v41  ;;  %v2362_v55 = vmax.f32 %v2298_v40, 0.0 }
 0x4d9   :  { %v2077_v51 = vpop.f32.mrf.mxu1 }
 0x4da   :  { %v2301_v57 = vadd.f32 %v6060_v22, %v2076_v45  ;;  %3733 = vst [vmem:[%s10275_s11 + $0x140] sm:$0xff] %v3685_v47  ;;  %3734 = vst [vmem:[%s10275_s11 + $0x148] sm:$0xff] %v3686_v49 }
 0x4db   :  { %v2080_v60 = vpop.f32.mrf.mxu1 }
 0x4dc   :  { %v2081_v53 = vadd.f32 %v7859_v59, %v2080_v60  ;;  %v2363_v24 = vmax.f32 %v2301_v57, 0.0 }
 0x4dd   :  { %v2082_v61 = vpop.f32.mrf.mxu1 }
 0x4de   :  { %v2389_v63 = vpack.c.bf16 %v2363_v24, %v2362_v55  ;;  %v2306_v0 = vadd.f32 %v2305_v52, %v2081_v53 }
 0x4df   :  { %v2083_v1 = vpop.f32.mrf.mxu1 }
 0x4e0   :  { %v3687_v46 = vunpack.c.l.bf16 %v2389_v63  ;;  %v3688_v48 = vunpack.c.h.bf16 %v2389_v63  ;;  %v2084_v3 = vadd.f32 %v7859_v59, %v2083_v1  ;;  %6122 = vmatmul.mubr.bf16.gmra.mxu0 %v2389_v63  ;;  %v2364_v4 = vmax.f32 %v2306_v0, 0.0 }
 0x4e1   :  { %v2085_v2 = vpop.f32.mrf.mxu1 }
 0x4e2   :  { %3735 = vst [vmem:[%s10275_s11 + $0x150] sm:$0xff] %v3687_v46  ;;  %3736 = vst [vmem:[%s10275_s11 + $0x158] sm:$0xff] %v3688_v48  ;;  %v2309_v5 = vadd.f32 %v2308_v58, %v2084_v3 }
 0x4e3   :  { %v2088_v6 = vpop.f32.mrf.mxu1 }
 0x4e4   :  { %v2089_v42 = vadd.f32 %v7859_v59, %v2088_v6  ;;  %v2365_v33 = vmax.f32 %v2309_v5, 0.0 }
 0x4e5   :  { %v2090_v7 = vpop.f32.mrf.mxu1 }
 0x4e6   :  { %v2314_v8 = vadd.f32 %v6063_v37, %v2089_v42  ;;  %v2390_v9 = vpack.c.bf16 %v2365_v33, %v2364_v4 }
 0x4e7   :  { %v2091_v10 = vpop.f32.mrf.mxu1 }
 0x4e8   :  { %v2092_v11 = vadd.f32 %v7859_v59, %v2091_v10  ;;  %v3689_v13 = vunpack.c.l.bf16 %v2390_v9  ;;  %v3690_v14 = vunpack.c.h.bf16 %v2390_v9  ;;  %6125 = vmatprep.mubr.bf16.mxu0 %v2390_v9  ;;  %v2366_v16 = vmax.f32 %v2314_v8, 0.0  ;;  %v6707_v59 = vld [vmem:[%s10270_s0 + $0x8] ss:$12 sps:$4 sm:$0xff]  }
 0x4e9   :  { %v2093_v15 = vpop.f32.mrf.mxu1 }
 0x4ea   :  { %v2317_v17 = vadd.f32 %v6064_v12, %v2092_v11  ;;  %3737 = vst [vmem:[%s10275_s11 + $0x160] sm:$0xff] %v3689_v13  ;;  %3738 = vst [vmem:[%s10275_s11 + $0x168] sm:$0xff] %v3690_v14  ;;  %v6708_v15 = vld [vmem:[%s10270_s0] ss:$12 sps:$4 sm:$0xff]  }
 0x4ec   :  { %v2367_v18 = vmax.f32 %v2317_v17, 0.0 }
 0x4ee   :  { %v2391_v44 = vpack.c.bf16 %v2367_v18, %v2366_v16  ;;  %v6709_v16 = vld [vmem:[%s10270_s0 + $0x1c] ss:$12 sps:$4 sm:$0xff]  }
 0x4f0   :  { %v3691_v20 = vunpack.c.l.bf16 %v2391_v44  ;;  %v3692_v19 = vunpack.c.h.bf16 %v2391_v44  ;;  %6126 = vmatmul.mubr.bf16.gmra.mxu0 %v2391_v44  ;;  %v6711_v44 = vld [vmem:[%s10270_s0 + $0x34] ss:$12 sps:$4 sm:$0xff]  }
 0x4f1   :  { %6145 = vmatprep.mubr.bf16.mxu0 %v6707_v59  ;;  %v6712_v59 = vld [vmem:[%s10270_s0 + $0x30] ss:$12 sps:$4 sm:$0xff]  }
 0x4f2   :  { %3739 = vst [vmem:[%s10275_s11 + $0x170] sm:$0xff] %v3691_v20  ;;  %3740 = vst [vmem:[%s10275_s11 + $0x178] sm:$0xff] %v3692_v19 }
 0x53a   :  { %v6083_v21 = vpop.f32.mrf.mxu0 }
 0x53c   :  { %v2490_v22 = vpop.f32.mrf.mxu0 }
 0x53e   :  { %v6084_v36 = vpop.f32.mrf.mxu0 }
 0x53f   :  { %v2682_v24 = vpack.c.bf16 %v6084_v36, %v6083_v21  ;;  %v6713_v21 = vld [vmem:[%s10270_s0 + $0x4c] ss:$12 sps:$4 sm:$0xff]  }
 0x540   :  { %v2493_v23 = vpop.f32.mrf.mxu0 }
 0x541   :  { %v2681_v0 = vpack.c.bf16 %v2493_v23, %v2490_v22  ;;  %v6714_v23 = vld [vmem:[%s10270_s0 + $0x48] ss:$12 sps:$4 sm:$0xff]  }
 0x542   :  { %v6087_v25 = vpop.f32.mrf.mxu0 }
 0x544   :  { %v2506_v54 = vpop.f32.mrf.mxu0 }
 0x546   :  { %v6088_v62 = vpop.f32.mrf.mxu0 }
 0x547   :  { %v2684_v51 = vpack.c.bf16 %v6088_v62, %v6087_v25 }
 0x548   :  { %v2509_v56 = vpop.f32.mrf.mxu0 }
 0x549   :  { %v2683_v60 = vpack.c.bf16 %v2509_v56, %v2506_v54  ;;  %v6715_v54 = vld [vmem:[%s10270_s0 + $0x64] ss:$12 sps:$4 sm:$0xff]  }
 0x54a   :  { %v6091_v26 = vpop.f32.mrf.mxu0 }
 0x54c   :  { %v2522_v27 = vpop.f32.mrf.mxu0 }
 0x54e   :  { %v6092_v28 = vpop.f32.mrf.mxu0 }
 0x54f   :  { %v2686_v41 = vpack.c.bf16 %v6092_v28, %v6091_v26 }
 0x550   :  { %v2525_v29 = vpop.f32.mrf.mxu0 }
 0x551   :  { %v2685_v45 = vpack.c.bf16 %v2525_v29, %v2522_v27  ;;  %v6716_v29 = vld [vmem:[%s10270_s0 + $0x60] ss:$12 sps:$4 sm:$0xff]  }
 0x552   :  { %v6095_v50 = vpop.f32.mrf.mxu0 }
 0x554   :  { %v2538_v30 = vpop.f32.mrf.mxu0 }
 0x556   :  { %v6096_v31 = vpop.f32.mrf.mxu0 }
 0x557   :  { %v2688_v35 = vpack.c.bf16 %v6096_v31, %v6095_v50  ;;  %v6717_v50 = vld [vmem:[%s10270_s0 + $0x7c] ss:$12 sps:$4 sm:$0xff]   ;;  %v6718_v31 = vld [vmem:[%s10270_s0 + $0x78] ss:$12 sps:$4 sm:$0xff]  }
 0x558   :  { %v2541_v37 = vpop.f32.mrf.mxu0 }
 0x559   :  { %2713 = vmatpush1.bf16.msra.mxu1 %v2688_v35  ;;  %v2687_v34 = vpack.c.bf16 %v2541_v37, %v2538_v30  ;;  %v6719_v35 = vld [vmem:[%s10270_s0 + $0x94] ss:$12 sps:$4 sm:$0xff]  }
 0x55a   :  { %v6099_v38 = vpop.f32.mrf.mxu0  ;;  %2714 = vmatprep.subr.bf16.mxu1 %v7074_v32 }
 0x55c   :  { %v8090_v39 = vpop.f32.mrf.mxu0 }
 0x55d   :  { %2715 = vmatpush1.bf16.msra.mxu1 %v2687_v34  ;;  %v6720_v34 = vld [vmem:[%s10270_s0 + $0x90] ss:$12 sps:$4 sm:$0xff]  }
 0x55e   :  { %v6100_v40 = vpop.f32.mrf.mxu0  ;;  %2716 = vmatprep.subr.bf16.mxu1 %v7074_v32 }
 0x55f   :  { %v2690_v9 = vpack.c.bf16 %v6100_v40, %v6099_v38 }
 0x560   :  { %v2557_v43 = vpop.f32.mrf.mxu0 }
 0x561   :  { %2717 = vmatpush1.bf16.msra.mxu1 %v2686_v41  ;;  %v2689_v11 = vpack.c.bf16 %v2557_v43, %v8090_v39  ;;  %v6721_v39 = vld [vmem:[%s10270_s0 + $0xac] ss:$12 sps:$4 sm:$0xff]   ;;  %v6722_v43 = vld [vmem:[%s10270_s0 + $0xa8] ss:$12 sps:$4 sm:$0xff]  }
 0x562   :  { %v6103_v52 = vpop.f32.mrf.mxu0  ;;  %2718 = vmatprep.subr.bf16.mxu1 %v7074_v32 }
 0x564   :  { %v2570_v47 = vpop.f32.mrf.mxu0 }
 0x565   :  { %2719 = vmatpush1.bf16.msra.mxu1 %v2685_v45  ;;  %v6724_v45 = vld [vmem:[%s10270_s0 + $0x20] ss:$12 sps:$4 sm:$0xff]  }
 0x566   :  { %v6104_v49 = vpop.f32.mrf.mxu0  ;;  %2720 = vmatprep.subr.bf16.mxu1 %v7074_v32 }
 0x567   :  { %v2692_v42 = vpack.c.bf16 %v6104_v49, %v6103_v52  ;;  %v6723_v52 = vld [vmem:[%s10270_s0 + $0xc4] ss:$12 sps:$4 sm:$0xff]   ;;  %v6726_v49 = vld [vmem:[%s10270_s0 + $0xc0] ss:$12 sps:$4 sm:$0xff]  }
 0x568   :  { %v2573_v55 = vpop.f32.mrf.mxu0 }
 0x569   :  { %2721 = vmatpush1.bf16.msra.mxu1 %v2684_v51  ;;  %v2691_v7 = vpack.c.bf16 %v2573_v55, %v2570_v47  ;;  %v6725_v47 = vld [vmem:[%s10270_s0 + $0x38] ss:$12 sps:$4 sm:$0xff]   ;;  %v6727_v51 = vld [vmem:[%s10270_s0 + $0xdc] ss:$12 sps:$4 sm:$0xff]  }
 0x56a   :  { %v6107_v57 = vpop.f32.mrf.mxu0  ;;  %2722 = vmatprep.subr.bf16.mxu1 %v7074_v32  ;;  %v6728_v55 = vld [vmem:[%s10270_s0 + $0x50] ss:$12 sps:$4 sm:$0xff]  }
 0x56c   :  { %v2586_v12 = vpop.f32.mrf.mxu0 }
 0x56d   :  { %2723 = vmatpush1.bf16.msra.mxu1 %v2683_v60  ;;  %v6730_v60 = vld [vmem:[%s10270_s0 + $0xd8] ss:$12 sps:$4 sm:$0xff]  }
 0x56e   :  { %v6108_v53 = vpop.f32.mrf.mxu0  ;;  %2724 = vmatprep.subr.bf16.mxu1 %v7074_v32 }
 0x56f   :  { %v2694_v2 = vpack.c.bf16 %v6108_v53, %v6107_v57  ;;  %v6729_v57 = vld [vmem:[%s10270_s0 + $0x68] ss:$12 sps:$4 sm:$0xff]   ;;  %v6732_v53 = vld [vmem:[%s10270_s0 + $0x80] ss:$12 sps:$4 sm:$0xff]  }
 0x570   :  { %v2589_v61 = vpop.f32.mrf.mxu0 }
 0x571   :  { %2725 = vmatpush1.bf16.msra.mxu1 %v2682_v24  ;;  %v2693_v5 = vpack.c.bf16 %v2589_v61, %v2586_v12  ;;  %v6731_v12 = vld [vmem:[%s10270_s0 + $0xf4] ss:$12 sps:$4 sm:$0xff]   ;;  %v6733_v24 = vld [vmem:[%s10270_s0 + $0x98] ss:$12 sps:$4 sm:$0xff]   ;;  %v6734_v61 = vld [vmem:[%s10270_s0 + $0xf0] ss:$12 sps:$4 sm:$0xff]  }
 0x572   :  { %v6111_v63 = vpop.f32.mrf.mxu0  ;;  %2726 = vmatprep.subr.bf16.mxu1 %v7074_v32 }
 0x574   :  { %v2602_v1 = vpop.f32.mrf.mxu0 }
 0x575   :  { %2727 = vmatpush1.bf16.msra.mxu1 %v2681_v0  ;;  %v6736_v0 = vld [vmem:[%s10270_s0 + $0xb0] ss:$12 sps:$4 sm:$0xff]  }
 0x576   :  { %v6112_v58 = vpop.f32.mrf.mxu0  ;;  %2728 = vmatprep.subr.bf16.mxu1 %v7074_v32 }
 0x577   :  { %v2696_v46 = vpack.c.bf16 %v6112_v58, %v6111_v63  ;;  %v6735_v63 = vld [vmem:[%s10270_s0 + $0x10c] ss:$12 sps:$4 sm:$0xff]   ;;  %v6738_v58 = vld [vmem:[%s10270_s0 + $0x108] ss:$12 sps:$4 sm:$0xff]  }
 0x578   :  { %v2605_v48 = vpop.f32.mrf.mxu0 }
 0x579   :  { %2729 = vmatpush2.bf16.msra.mxu1 %v2696_v46  ;;  %v2695_v3 = vpack.c.bf16 %v2605_v48, %v2602_v1  ;;  %v6737_v1 = vld [vmem:[%s10270_s0 + $0xc8] ss:$12 sps:$4 sm:$0xff]   ;;  %v6739_v46 = vld [vmem:[%s10270_s0 + $0x124] ss:$12 sps:$4 sm:$0xff]   ;;  %v6740_v48 = vld [vmem:[%s10270_s0 + $0xe0] ss:$12 sps:$4 sm:$0xff]  }
 0x57a   :  { %2730 = vmatprep.subr.bf16.mxu1 %v7074_v32 }
 0x57d   :  { %2731 = vmatpush2.bf16.msra.mxu1 %v2695_v3  ;;  %v6741_v3 = vld [vmem:[%s10270_s0 + $0xf8] ss:$12 sps:$4 sm:$0xff]  }
 0x57e   :  { %2732 = vmatprep.subr.bf16.mxu1 %v7074_v32 }
 0x580   :  { %v8101_v4 = vpop.f32.mrf.mxu0 }
 0x581   :  { %2733 = vmatpush2.bf16.msra.mxu1 %v2694_v2  ;;  %v6742_v2 = vld [vmem:[%s10270_s0 + $0x120] ss:$12 sps:$4 sm:$0xff]  }
 0x582   :  { %2734 = vmatprep.subr.bf16.mxu1 %v7074_v32  ;;  %v8104_v6 = vpop.f32.mrf.mxu0 }
 0x584   :  { %v8107_v33 = vpop.f32.mrf.mxu0 }
 0x585   :  { %2735 = vmatpush2.bf16.msra.mxu1 %v2693_v5  ;;  %v2698_v40 = vpack.c.bf16 %v8107_v33, %v8101_v4  ;;  %v6743_v4 = vld [vmem:[%s10270_s0 + $0x13c] ss:$12 sps:$4 sm:$0xff]   ;;  %v6747_v33 = vld [vmem:[%s10270_s0 + $0x154] ss:$12 sps:$4 sm:$0xff]  }
 0x586   :  { %2736 = vmatprep.subr.bf16.mxu1 %v7074_v32  ;;  %v8110_v8 = vpop.f32.mrf.mxu0  ;;  %v6744_v5 = vld [vmem:[%s10270_s0 + $0x110] ss:$12 sps:$4 sm:$0xff]  }
 0x587   :  { %v2697_v41 = vpack.c.bf16 %v8110_v8, %v8104_v6  ;;  %v6745_v6 = vld [vmem:[%s10270_s0 + $0x128] ss:$12 sps:$4 sm:$0xff]   ;;  %v6749_v8 = vld [vmem:[%s10270_s0 + $0x158] ss:$12 sps:$4 sm:$0xff]  }
 0x589   :  { %2737 = vmatpush2.bf16.msra.mxu1 %v2692_v42  ;;  %v6746_v42 = vld [vmem:[%s10270_s0 + $0x138] ss:$12 sps:$4 sm:$0xff]  }
 0x58a   :  { %2738 = vmatprep.subr.bf16.mxu1 %v7074_v32 }
 0x58d   :  { %2739 = vmatpush2.bf16.msra.mxu1 %v2691_v7  ;;  %v6748_v7 = vld [vmem:[%s10270_s0 + $0x140] ss:$12 sps:$4 sm:$0xff]  }
 0x58e   :  { %2740 = vmatprep.subr.bf16.mxu1 %v7074_v32 }
 0x590   :  { %v6119_v10 = vpop.f32.mrf.mxu0 }
 0x591   :  { %2741 = vmatpush2.bf16.msra.mxu1 %v2690_v9  ;;  %v6750_v9 = vld [vmem:[%s10270_s0 + $0x150] ss:$12 sps:$4 sm:$0xff]  }
 0x592   :  { %2742 = vmatprep.subr.bf16.mxu1 %v7074_v32  ;;  %v2634_v13 = vpop.f32.mrf.mxu0  ;;  %v6710_v32 = vld [vmem:[%s10270_s0 + $0x18] ss:$12 sps:$4 sm:$0xff]  }
 0x594   :  { %v6120_v14 = vpop.f32.mrf.mxu0 }
 0x595   :  { %2743 = vmatpush2.bf16.msra.mxu1 %v2689_v11  ;;  %v2700_v37 = vpack.c.bf16 %v6120_v14, %v6119_v10  ;;  %v6751_v10 = vld [vmem:[%s10270_s0 + $0x16c] ss:$12 sps:$4 sm:$0xff]   ;;  %v6752_v11 = vld [vmem:[%s10270_s0 + $0x170] ss:$12 sps:$4 sm:$0xff]   ;;  %v6754_v14 = vld [vmem:[%s10270_s0 + $0x168] ss:$12 sps:$4 sm:$0xff]  }
 0x596   :  { %v2637_v17 = vpop.f32.mrf.mxu0 }
 0x597   :  { %v2699_v38 = vpack.c.bf16 %v2637_v17, %v2634_v13  ;;  %v6753_v13 = vld [vmem:[%s10270_s0 + $0x188] ss:$12 sps:$4 sm:$0xff]   ;;  %v6757_v17 = vld [vmem:[%s10270_s0 + $0x1b8] ss:$12 sps:$4 sm:$0xff]  }
 0x598   :  { %2745 = vmatmul.mubr.bf16.vlgmr.msra.gmra.mxu1 %v6708_v15  ;;  %v6755_v15 = vld [vmem:[%s10270_s0 + $0x184] ss:$12 sps:$4 sm:$0xff]  }
 0x599   :  { %2752 = vmatprep.mubr.bf16.mxu1 %v6709_v16  ;;  %v6756_v16 = vld [vmem:[%s10270_s0 + $0x1a0] ss:$12 sps:$4 sm:$0xff]  }
 0x5a0   :  { %v6123_v18 = vpop.f32.mrf.mxu0  ;;  %2753 = vmatmul.mubr.bf16.gmra.mxu1 %v6710_v32  ;;  %v6759_v32 = vld [vmem:[%s10270_s0 + $0x19c] ss:$12 sps:$4 sm:$0xff]  }
 0x5a1   :  { %2760 = vmatprep.mubr.bf16.mxu1 %v6711_v44  ;;  %v6760_v44 = vld [vmem:[%s10270_s0 + $0x1d0] ss:$12 sps:$4 sm:$0xff]  }
 0x5a2   :  { %v2650_v20 = vpop.f32.mrf.mxu0 }
 0x5a4   :  { %v6124_v19 = vpop.f32.mrf.mxu0 }
 0x5a5   :  { %v2702_v28 = vpack.c.bf16 %v6124_v19, %v6123_v18  ;;  %v6758_v18 = vld [vmem:[%s10270_s0 + $0x180] ss:$12 sps:$4 sm:$0xff]   ;;  %v6762_v19 = vld [vmem:[%s10270_s0 + $0x198] ss:$12 sps:$4 sm:$0xff]  }
 0x5a6   :  { %v2653_v22 = vpop.f32.mrf.mxu0 }
 0x5a7   :  { %v2701_v30 = vpack.c.bf16 %v2653_v22, %v2650_v20  ;;  %v6761_v20 = vld [vmem:[%s10270_s0 + $0x1e8] ss:$12 sps:$4 sm:$0xff]   ;;  %v6765_v22 = vld [vmem:[%s10270_s0 + $0x218] ss:$12 sps:$4 sm:$0xff]  }
 0x5a8   :  { %2761 = vmatmul.mubr.bf16.gmra.mxu1 %v6712_v59  ;;  %v6763_v59 = vld [vmem:[%s10270_s0 + $0x1b4] ss:$12 sps:$4 sm:$0xff]  }
 0x5a9   :  { %2768 = vmatprep.mubr.bf16.mxu1 %v6713_v21  ;;  %v6764_v21 = vld [vmem:[%s10270_s0 + $0x200] ss:$12 sps:$4 sm:$0xff]  }
 0x5b0   :  { %v6127_v36 = vpop.f32.mrf.mxu0  ;;  %2769 = vmatmul.mubr.bf16.gmra.mxu1 %v6714_v23  ;;  %v6767_v23 = vld [vmem:[%s10270_s0 + $0x1cc] ss:$12 sps:$4 sm:$0xff]  }
 0x5b1   :  { %2776 = vmatprep.mubr.bf16.mxu1 %v6715_v54  ;;  %v6769_v54 = vld [vmem:[%s10270_s0 + $0x1c8] ss:$12 sps:$4 sm:$0xff]  }
 0x5b2   :  { %v2666_v25 = vpop.f32.mrf.mxu0 }
 0x5b4   :  { %v6128_v62 = vpop.f32.mrf.mxu0 }
 0x5b5   :  { %v2704_v56 = vpack.c.bf16 %v6128_v62, %v6127_v36  ;;  %v6766_v36 = vld [vmem:[%s10270_s0 + $0x1b0] ss:$12 sps:$4 sm:$0xff]  }
 0x5b6   :  { %v2669_v26 = vpop.f32.mrf.mxu0  ;;  %v6770_v62 = vld [vmem:[%s10270_s0 + $0x1e4] ss:$12 sps:$4 sm:$0xff]  }
 0x5b7   :  { %6129 = vmatprep.subr.bf16.mxu0 %v2704_v56  ;;  %v2703_v27 = vpack.c.bf16 %v2669_v26, %v2666_v25  ;;  %v6768_v25 = vld [vmem:[%s10270_s0 + $0x230] ss:$12 sps:$4 sm:$0xff]  }
 0x5b8   :  { %6130 = vmatpush3.bf16.msra.mxu0 %v2704_v56  ;;  %2777 = vmatmul.mubr.bf16.gmra.mxu1 %v6716_v29  ;;  %v6771_v56 = vld [vmem:[%s10270_s0 + $0x1e0] ss:$12 sps:$4 sm:$0xff]   ;;  %v6772_v26 = vld [vmem:[%s10270_s0 + $0x1fc] ss:$12 sps:$4 sm:$0xff]  }
 0x5b9   :  { %6131 = vmatprep.subr.bf16.mxu0 %v2703_v27  ;;  %2784 = vmatprep.mubr.bf16.mxu1 %v6717_v50  ;;  %v6775_v29 = vld [vmem:[%s10270_s0 + $0x210] ss:$12 sps:$4 sm:$0xff]   ;;  %v6776_v50 = vld [vmem:[%s10270_s0 + $0x22c] ss:$12 sps:$4 sm:$0xff]  }
 0x5bc   :  { %6132 = vmatpush3.bf16.msra.mxu0 %v2703_v27  ;;  %v6773_v27 = vld [vmem:[%s10270_s0 + $0x1f8] ss:$12 sps:$4 sm:$0xff]  }
 0x5bd   :  { %6133 = vmatprep.subr.bf16.mxu0 %v2702_v28 }
 0x5c0   :  { %6134 = vmatpush3.bf16.msra.mxu0 %v2702_v28  ;;  %2785 = vmatmul.mubr.bf16.gmra.mxu1 %v6718_v31  ;;  %v6774_v28 = vld [vmem:[%s10270_s0 + $0x214] ss:$12 sps:$4 sm:$0xff]  }
 0x5c1   :  { %6135 = vmatprep.subr.bf16.mxu0 %v2701_v30  ;;  %2792 = vmatprep.mubr.bf16.mxu1 %v6719_v35 }
 0x5c4   :  { %6136 = vmatpush3.bf16.msra.mxu0 %v2701_v30  ;;  %v6777_v30 = vld [vmem:[%s10270_s0 + $0x228] ss:$12 sps:$4 sm:$0xff]  }
 0x5c5   :  { %6137 = vmatprep.subr.bf16.mxu0 %v2700_v37 }
 0x5c8   :  { %6138 = vmatpush3.bf16.msra.mxu0 %v2700_v37  ;;  %2793 = vmatmul.mubr.bf16.gmra.mxu1 %v6720_v34 }
 0x5c9   :  { %6139 = vmatprep.subr.bf16.mxu0 %v2699_v38  ;;  %2800 = vmatprep.mubr.bf16.mxu1 %v6721_v39 }
 0x5cc   :  { %6140 = vmatpush3.bf16.msra.mxu0 %v2699_v38 }
 0x5cd   :  { %6141 = vmatprep.subr.bf16.mxu0 %v2698_v40 }
 0x5d0   :  { %6142 = vmatpush3.bf16.msra.mxu0 %v2698_v40  ;;  %2801 = vmatmul.mubr.bf16.gmra.mxu1 %v6722_v43 }
 0x5d1   :  { %6143 = vmatprep.subr.bf16.mxu0 %v2697_v41  ;;  %2808 = vmatprep.mubr.bf16.mxu1 %v6723_v52 }
 0x5d4   :  { %6144 = vmatpush3.bf16.msra.mxu0 %v2697_v41 }
 0x5d7   :  { %6146 = vmatmul.mubr.bf16.vlgmr.msra.gmra.mxu0 %v6724_v45 }
 0x5d8   :  { %6149 = vmatprep.mubr.bf16.mxu0 %v6725_v47  ;;  %2809 = vmatmul.mubr.bf16.gmra.mxu1 %v6726_v49 }
 0x5d9   :  { %2816 = vmatprep.mubr.bf16.mxu1 %v6727_v51 }
 0x5df   :  { %6150 = vmatmul.mubr.bf16.gmra.mxu0 %v6728_v55 }
 0x5e0   :  { %6153 = vmatprep.mubr.bf16.mxu0 %v6729_v57  ;;  %2817 = vmatmul.mubr.bf16.gmra.mxu1 %v6730_v60 }
 0x5e1   :  { %2824 = vmatprep.mubr.bf16.mxu1 %v6731_v12 }
 0x5e7   :  { %6154 = vmatmul.mubr.bf16.gmra.mxu0 %v6732_v53 }
 0x5e8   :  { %6157 = vmatprep.mubr.bf16.mxu0 %v6733_v24  ;;  %2825 = vmatmul.mubr.bf16.gmra.mxu1 %v6734_v61 }
 0x5e9   :  { %2832 = vmatprep.mubr.bf16.mxu1 %v6735_v63 }
 0x5ef   :  { %6158 = vmatmul.mubr.bf16.gmra.mxu0 %v6736_v0 }
 0x5f0   :  { %6161 = vmatprep.mubr.bf16.mxu0 %v6737_v1  ;;  %2833 = vmatmul.mubr.bf16.gmra.mxu1 %v6738_v58 }
 0x5f1   :  { %2840 = vmatprep.mubr.bf16.mxu1 %v6739_v46 }
 0x5f7   :  { %6162 = vmatmul.mubr.bf16.gmra.mxu0 %v6740_v48 }
 0x5f8   :  { %6165 = vmatprep.mubr.bf16.mxu0 %v6741_v3  ;;  %2841 = vmatmul.mubr.bf16.gmra.mxu1 %v6742_v2  ;;  %v3162_v2 = vlaneseq }
 0x5f9   :  { %2848 = vmatprep.mubr.bf16.mxu1 %v6743_v4 }
 0x5ff   :  { %6166 = vmatmul.mubr.bf16.gmra.mxu0 %v6744_v5 }
 0x600   :  { %6169 = vmatprep.mubr.bf16.mxu0 %v6745_v6  ;;  %2849 = vmatmul.mubr.bf16.gmra.mxu1 %v6746_v42  ;;  %v8341_v6 = vand.u32 127, %v3162_v2  ;;  %v8346_v42 = vld [vmem:[%s10276_s8] ss:$0 sm:$0xff] }
 0x601   :  { %2856 = vmatprep.mubr.bf16.mxu1 %v6747_v33 }
 0x602   :  { %vm3164_vm0 = vcmp.lt.s32.totalorder %v8341_v6, 8 }
 0x607   :  { %6170 = vmatmul.mubr.bf16.gmra.mxu0 %v6748_v7 }
 0x608   :  { %6173 = vmatprep.mubr.bf16.mxu0 %v6749_v8  ;;  %2857 = vmatmul.mubr.bf16.gmra.mxu1 %v6750_v9 }
 0x609   :  { %2864 = vmatprep.mubr.bf16.mxu1 %v6751_v10 }
 0x60f   :  { %6174 = vmatmul.mubr.bf16.gmra.mxu0 %v6752_v11 }
 0x610   :  { %6177 = vmatprep.mubr.bf16.mxu0 %v6753_v13  ;;  %2865 = vmatmul.mubr.bf16.gmra.mxu1 %v6754_v14 }
 0x611   :  { %2872 = vmatprep.mubr.bf16.mxu1 %v6755_v15 }
 0x617   :  { %6178 = vmatmul.mubr.bf16.gmra.mxu0 %v6756_v16 }
 0x618   :  { %6181 = vmatprep.mubr.bf16.mxu0 %v6757_v17  ;;  %2873 = vmatmul.mubr.bf16.gmra.mxu1 %v6758_v18 }
 0x619   :  { %2880 = vmatprep.mubr.bf16.mxu1 %v6759_v32 }
 0x61f   :  { %6182 = vmatmul.mubr.bf16.gmra.mxu0 %v6760_v44 }
 0x620   :  { %6185 = vmatprep.mubr.bf16.mxu0 %v6761_v20  ;;  %2881 = vmatmul.mubr.bf16.gmra.mxu1 %v6762_v19 }
 0x621   :  { %2888 = vmatprep.mubr.bf16.mxu1 %v6763_v59 }
 0x627   :  { %6186 = vmatmul.mubr.bf16.gmra.mxu0 %v6764_v21 }
 0x628   :  { %6189 = vmatprep.mubr.bf16.mxu0 %v6765_v22  ;;  %2889 = vmatmul.mubr.bf16.gmra.mxu1 %v6766_v36 }
 0x629   :  { %2896 = vmatprep.mubr.bf16.mxu1 %v6767_v23 }
 0x62f   :  { %6190 = vmatmul.mubr.bf16.gmra.mxu0 %v6768_v25 }
 0x630   :  { %2897 = vmatmul.mubr.bf16.gmra.mxu1 %v6769_v54 }
 0x631   :  { %2904 = vmatprep.mubr.bf16.mxu1 %v6770_v62 }
 0x638   :  { %2905 = vmatmul.mubr.bf16.gmra.mxu1 %v6771_v56 }
 0x639   :  { %2912 = vmatprep.mubr.bf16.mxu1 %v6772_v26 }
 0x640   :  { %2913 = vmatmul.mubr.bf16.gmra.mxu1 %v6773_v27 }
 0x641   :  { %2920 = vmatprep.mubr.bf16.mxu1 %v6774_v28 }
 0x648   :  { %2921 = vmatmul.mubr.bf16.gmra.mxu1 %v6775_v29 }
 0x649   :  { %2928 = vmatprep.mubr.bf16.mxu1 %v6776_v50 }
 0x650   :  { %2929 = vmatmul.mubr.bf16.gmra.mxu1 %v6777_v30 }
 0x658   :  { %v2746_v31 = vpop.f32.mrf.mxu1 }
 0x659   :  { %v2747_v10 = vadd.f32 %v8346_v42, %v2746_v31 }
 0x65a   :  { %v2748_v35 = vpop.f32.mrf.mxu1 }
 0x65c   :  { %v2749_v37 = vpop.f32.mrf.mxu1 }
 0x65d   :  { %v2750_v44 = vadd.f32 %v8346_v42, %v2749_v37 }
 0x65e   :  { %v2751_v38 = vpop.f32.mrf.mxu1 }
 0x660   :  { %v2754_v34 = vpop.f32.mrf.mxu1 }
 0x661   :  { %v2755_v7 = vadd.f32 %v8346_v42, %v2754_v34 }
 0x662   :  { %v2756_v39 = vpop.f32.mrf.mxu1 }
 0x664   :  { %v2757_v40 = vpop.f32.mrf.mxu1 }
 0x665   :  { %v2758_v15 = vadd.f32 %v8346_v42, %v2757_v40 }
 0x666   :  { %v2759_v41 = vpop.f32.mrf.mxu1 }
 0x668   :  { %v2762_v43 = vpop.f32.mrf.mxu1 }
 0x669   :  { %v2763_v28 = vadd.f32 %v8346_v42, %v2762_v43 }
 0x66a   :  { %v2764_v52 = vpop.f32.mrf.mxu1 }
 0x66c   :  { %v2765_v45 = vpop.f32.mrf.mxu1 }
 0x66d   :  { %v2766_v31 = vadd.f32 %v8346_v42, %v2765_v45 }
 0x66e   :  { %v2767_v47 = vpop.f32.mrf.mxu1 }
 0x670   :  { %v2770_v49 = vpop.f32.mrf.mxu1 }
 0x671   :  { %v2771_v22 = vadd.f32 %v8346_v42, %v2770_v49 }
 0x672   :  { %v2772_v51 = vpop.f32.mrf.mxu1 }
 0x674   :  { %v2773_v55 = vpop.f32.mrf.mxu1 }
 0x675   :  { %v2774_v29 = vadd.f32 %v8346_v42, %v2773_v55 }
 0x676   :  { %v2775_v57 = vpop.f32.mrf.mxu1 }
 0x678   :  { %v8329_v60 = vpop.f32.mrf.mxu1 }
 0x679   :  { %v2779_v57 = vadd.f32 %v8346_v42, %v8329_v60 }
 0x67a   :  { %v2780_v12 = vpop.f32.mrf.mxu1 }
 0x67c   :  { %v8331_v53 = vpop.f32.mrf.mxu1 }
 0x67e   :  { %v2783_v24 = vpop.f32.mrf.mxu1 }
 0x680   :  { %v2786_v61 = vpop.f32.mrf.mxu1 }
 0x681   :  { %v2787_v40 = vadd.f32 %v8346_v42, %v2786_v61 }
 0x682   :  { %v2788_v63 = vpop.f32.mrf.mxu1 }
 0x684   :  { %v8333_v0 = vpop.f32.mrf.mxu1 }
 0x685   :  { %v2790_v12 = vadd.f32 %v8346_v42, %v8333_v0 }
 0x686   :  { %v2791_v1 = vpop.f32.mrf.mxu1 }
 0x687   :  { %v2782_v1 = vadd.f32 %v8346_v42, %v8331_v53 }
 0x688   :  { %v8335_v58 = vpop.f32.mrf.mxu1 }
 0x68a   :  { %v2796_v46 = vpop.f32.mrf.mxu1 }
 0x68c   :  { %v8337_v48 = vpop.f32.mrf.mxu1 }
 0x68e   :  { %v2799_v3 = vpop.f32.mrf.mxu1 }
 0x690   :  { %v8339_v4 = vpop.f32.mrf.mxu1 }
 0x692   :  { %v2804_v5 = vpop.f32.mrf.mxu1 }
 0x693   :  { %v2803_v5 = vadd.f32 %v8346_v42, %v8339_v4  ;;  %v2795_v4 = vadd.f32 %v8346_v42, %v8335_v58 }
 0x694   :  { %v8348_v33 = vpop.f32.mrf.mxu1 }
 0x696   :  { %v2807_v8 = vpop.f32.mrf.mxu1 }
 0x697   :  { %v6147_v9 = vpop.f32.mrf.mxu0 }
 0x698   :  { %v2980_v11 = vadd.f32 %v6147_v9, %v2755_v7  ;;  %v8353_v13 = vpop.f32.mrf.mxu1 }
 0x699   :  { %v2971_v14 = vpop.f32.mrf.mxu0 }
 0x69a   :  { %v2972_v16 = vadd.f32 %v2971_v14, %v2747_v10  ;;  %v8358_v17 = vsel %vm3164_vm0, %v2980_v11, -1e+30  ;;  %v2812_v18 = vpop.f32.mrf.mxu1 }
 0x69b   :  { %3217 = vmax.xlane.f32.xlu1 %v8358_v17  ;;  %v6148_v32 = vpop.f32.mrf.mxu0 }
 0x69c   :  { %v2983_v20 = vadd.f32 %v6148_v32, %v2758_v15  ;;  %v8364_v19 = vsel %vm3164_vm0, %v2972_v16, -1e+30  ;;  %v8366_v59 = vpop.f32.mrf.mxu1  ;;  %v2806_v16 = vadd.f32 %v8346_v42, %v8348_v33 }
 0x69d   :  { %v2974_v21 = vpop.f32.mrf.mxu0  ;;  %3213 = vmax.xlane.f32.xlu0 %v8364_v19 }
 0x69e   :  { %v2975_v36 = vadd.f32 %v2974_v21, %v2750_v44  ;;  %v8372_v23 = vsel %vm3164_vm0, %v2983_v20, -1e+30  ;;  %v2815_v25 = vpop.f32.mrf.mxu1  ;;  %v2798_v20 = vadd.f32 %v8346_v42, %v8337_v48 }
 0x69f   :  { %3219 = vmax.xlane.f32.xlu1 %v8372_v23  ;;  %v6151_v54 = vpop.f32.mrf.mxu0 }
 0x6a0   :  { %v2996_v62 = vadd.f32 %v6151_v54, %v2771_v22  ;;  %v8377_v56 = vsel %vm3164_vm0, %v2975_v36, -1e+30  ;;  %v2818_v26 = vpop.f32.mrf.mxu1 }
 0x6a1   :  { %v2987_v27 = vpop.f32.mrf.mxu0  ;;  %3215 = vmax.xlane.f32.xlu0 %v8377_v56  ;;  %v2819_v33 = vadd.f32 %v8346_v42, %v2818_v26  ;;  %v2811_v26 = vadd.f32 %v8346_v42, %v8353_v13 }
 0x6a2   :  { %v2820_v50 = vpop.f32.mrf.mxu1  ;;  %v2988_v35 = vadd.f32 %v2987_v27, %v2763_v28  ;;  %v8385_v38 = vsel %vm3164_vm0, %v2996_v62, -1e+30 }
 0x6a3   :  { %v6152_v30 = vpop.f32.mrf.mxu0 }
 0x6a4   :  { %v2999_v37 = vadd.f32 %v6152_v30, %v2774_v29  ;;  %v8387_v34 = vpop.f32.mrf.mxu1  ;;  %v8398_v49 = vsel %vm3164_vm0, %v2988_v35, -1e+30 }
 0x6a5   :  { %v2990_v39 = vpop.f32.mrf.mxu0  ;;  %3225 = vmax.xlane.f32.xlu0 %v8385_v38 }
 0x6a6   :  { %v2991_v41 = vadd.f32 %v2990_v39, %v2766_v31  ;;  %v8393_v43 = vsel %vm3164_vm0, %v2999_v37, -1e+30  ;;  %v2823_v52 = vpop.f32.mrf.mxu1  ;;  %v2822_v31 = vadd.f32 %v8346_v42, %v8387_v34 }
 0x6a7   :  { %3227 = vmax.xlane.f32.xlu1 %v8393_v43  ;;  %v6155_v45 = vpop.f32.mrf.mxu0 }
 0x6a8   :  { %v3012_v47 = vadd.f32 %v6155_v45, %v2787_v40  ;;  %v8400_v51 = vpop.f32.mrf.mxu1  ;;  %v8409_v24 = vsel %vm3164_vm0, %v2991_v41, -1e+30  ;;  %v2814_v40 = vadd.f32 %v8346_v42, %v8366_v59 }
 0x6a9   :  { %v3003_v55 = vpop.f32.mrf.mxu0  ;;  %3221 = vmax.xlane.f32.xlu0 %v8398_v49 }
 0x6aa   :  { %v2828_v61 = vpop.f32.mrf.mxu1  ;;  %v3004_v46 = vadd.f32 %v3003_v55, %v2779_v57  ;;  %v8416_v2 = vsel %vm3164_vm0, %v3012_v47, -1e+30 }
 0x6ab   :  { %v6156_v63 = vpop.f32.mrf.mxu0  ;;  %3223 = vmax.xlane.f32.xlu1 %v8409_v24 }
 0x6ac   :  { %v3015_v3 = vadd.f32 %v6156_v63, %v2790_v12  ;;  %v8418_v60 = vpop.f32.mrf.mxu1  ;;  %v8430_v11 = vsel %vm3164_vm0, %v3004_v46, -1e+30 }
 0x6ad   :  { %v3006_v0 = vpop.f32.mrf.mxu0  ;;  %3233 = vmax.xlane.f32.xlu0 %v8416_v2 }
 0x6ae   :  { %v3007_v7 = vadd.f32 %v3006_v0, %v2782_v1  ;;  %v8425_v8 = vsel %vm3164_vm0, %v3015_v3, -1e+30  ;;  %v2831_v53 = vpop.f32.mrf.mxu1  ;;  %v2827_v3 = vadd.f32 %v8346_v42, %v8400_v51 }
 0x6af   :  { %v6159_v9 = vpop.f32.mrf.mxu0  ;;  %3235 = vmax.xlane.f32.xlu1 %v8425_v8 }
 0x6b0   :  { %v3028_v10 = vadd.f32 %v6159_v9, %v2803_v5  ;;  %v2834_v14 = vpop.f32.mrf.mxu1  ;;  %v8439_v18 = vsel %vm3164_vm0, %v3007_v7, -1e+30  ;;  %v2830_v9 = vadd.f32 %v8346_v42, %v8418_v60 }
 0x6b1   :  { %v3019_v15 = vpop.f32.mrf.mxu0  ;;  %3229 = vmax.xlane.f32.xlu0 %v8430_v11  ;;  %v2835_v34 = vadd.f32 %v8346_v42, %v2834_v14 }
 0x6b2   :  { %v2836_v32 = vpop.f32.mrf.mxu1  ;;  %v3020_v21 = vadd.f32 %v3019_v15, %v2795_v4  ;;  %v8446_v36 = vsel %vm3164_vm0, %v3028_v10, -1e+30 }
 0x6b3   :  { %v6160_v44 = vpop.f32.mrf.mxu0  ;;  %3231 = vmax.xlane.f32.xlu1 %v8439_v18 }
 0x6b4   :  { %v3031_v22 = vadd.f32 %v6160_v44, %v2806_v16  ;;  %v2837_v58 = vpop.f32.mrf.mxu1  ;;  %v8457_v29 = vsel %vm3164_vm0, %v3020_v21, -1e+30 }
 0x6b5   :  { %v3022_v25 = vpop.f32.mrf.mxu0  ;;  %3241 = vmax.xlane.f32.xlu0 %v8446_v36  ;;  %v2838_v0 = vadd.f32 %v8346_v42, %v2837_v58 }
 0x6b6   :  { %v3023_v54 = vadd.f32 %v3022_v25, %v2798_v20  ;;  %v8452_v62 = vsel %vm3164_vm0, %v3031_v22, -1e+30  ;;  %v2839_v27 = vpop.f32.mrf.mxu1 }
 0x6b7   :  { %v6163_v28 = vpop.f32.mrf.mxu0  ;;  %3243 = vmax.xlane.f32.xlu1 %v8452_v62 }
 0x6b8   :  { %v3044_v48 = vadd.f32 %v6163_v28, %v2819_v33  ;;  %v2842_v50 = vpop.f32.mrf.mxu1  ;;  %v8466_v35 = vsel %vm3164_vm0, %v3023_v54, -1e+30 }
 0x6b9   :  { %v3035_v30 = vpop.f32.mrf.mxu0  ;;  %3237 = vmax.xlane.f32.xlu0 %v8457_v29  ;;  %v2843_v33 = vadd.f32 %v8346_v42, %v2842_v50 }
 0x6ba   :  { %v2844_v37 = vpop.f32.mrf.mxu1  ;;  %v3036_v41 = vadd.f32 %v3035_v30, %v2811_v26  ;;  %v8473_v45 = vsel %vm3164_vm0, %v3044_v48, -1e+30 }
 0x6bb   :  { %v6164_v39 = vpop.f32.mrf.mxu0  ;;  %3239 = vmax.xlane.f32.xlu1 %v8466_v35 }
 0x6bc   :  { %v3047_v52 = vadd.f32 %v6164_v39, %v2822_v31  ;;  %v2845_v13 = vpop.f32.mrf.mxu1  ;;  %v8484_v63 = vsel %vm3164_vm0, %v3036_v41, -1e+30 }
 0x6bd   :  { %v3038_v47 = vpop.f32.mrf.mxu0  ;;  %3249 = vmax.xlane.f32.xlu0 %v8473_v45  ;;  %v2846_v30 = vadd.f32 %v8346_v42, %v2845_v13 }
 0x6be   :  { %v3039_v55 = vadd.f32 %v3038_v47, %v2814_v40  ;;  %v8479_v57 = vsel %vm3164_vm0, %v3047_v52, -1e+30  ;;  %v2847_v12 = vpop.f32.mrf.mxu1 }
 0x6bf   :  { %v6167_v61 = vpop.f32.mrf.mxu0  ;;  %3251 = vmax.xlane.f32.xlu1 %v8479_v57 }
 0x6c0   :  { %v3060_v59 = vadd.f32 %v6167_v61, %v2835_v34  ;;  %v2850_v1 = vpop.f32.mrf.mxu1  ;;  %v8492_v5 = vsel %vm3164_vm0, %v3039_v55, -1e+30 }
 0x6c1   :  { %v3051_v46 = vpop.f32.mrf.mxu0  ;;  %3245 = vmax.xlane.f32.xlu0 %v8484_v63  ;;  %v2851_v16 = vadd.f32 %v8346_v42, %v2850_v1 }
 0x6c2   :  { %v2852_v7 = vpop.f32.mrf.mxu1  ;;  %v3052_v10 = vadd.f32 %v3051_v46, %v2827_v3  ;;  %v8499_v15 = vsel %vm3164_vm0, %v3060_v59, -1e+30 }
 0x6c3   :  { %v6168_v53 = vpop.f32.mrf.mxu0  ;;  %3247 = vmax.xlane.f32.xlu1 %v8492_v5 }
 0x6c4   :  { %v3063_v14 = vadd.f32 %v6168_v53, %v2838_v0  ;;  %v2853_v51 = vpop.f32.mrf.mxu1  ;;  %v8510_v22 = vsel %vm3164_vm0, %v3052_v10, -1e+30 }
 0x6c5   :  { %v3054_v4 = vpop.f32.mrf.mxu0  ;;  %3257 = vmax.xlane.f32.xlu0 %v8499_v15  ;;  %v2854_v54 = vadd.f32 %v8346_v42, %v2853_v51 }
 0x6c6   :  { %v3055_v32 = vadd.f32 %v3054_v4, %v2830_v9  ;;  %v8505_v44 = vsel %vm3164_vm0, %v3063_v14, -1e+30  ;;  %v2855_v20 = vpop.f32.mrf.mxu1 }
 0x6c7   :  { %v6171_v21 = vpop.f32.mrf.mxu0  ;;  %3259 = vmax.xlane.f32.xlu1 %v8505_v44 }
 0x6c8   :  { %v3076_v60 = vadd.f32 %v6171_v21, %v2851_v16  ;;  %v2858_v58 = vpop.f32.mrf.mxu1  ;;  %v8517_v27 = vsel %vm3164_vm0, %v3055_v32, -1e+30 }
 0x6c9   :  { %v3067_v25 = vpop.f32.mrf.mxu0  ;;  %3253 = vmax.xlane.f32.xlu0 %v8510_v22  ;;  %v2859_v13 = vadd.f32 %v8346_v42, %v2858_v58 }
 0x6ca   :  { %v2860_v28 = vpop.f32.mrf.mxu1  ;;  %v3068_v26 = vadd.f32 %v3067_v25, %v2843_v33  ;;  %v8523_v37 = vsel %vm3164_vm0, %v3076_v60, -1e+30 }
 0x6cb   :  { %v6172_v48 = vpop.f32.mrf.mxu0  ;;  %3255 = vmax.xlane.f32.xlu1 %v8517_v27 }
 0x6cc   :  { %v3079_v31 = vadd.f32 %v6172_v48, %v2854_v54  ;;  %v2861_v39 = vpop.f32.mrf.mxu1  ;;  %v8534_v34 = vsel %vm3164_vm0, %v3068_v26, -1e+30 }
 0x6cd   :  { %v3070_v50 = vpop.f32.mrf.mxu0  ;;  %3265 = vmax.xlane.f32.xlu0 %v8523_v37  ;;  %v2862_v0 = vadd.f32 %v8346_v42, %v2861_v39 }
 0x6ce   :  { %v3071_v40 = vadd.f32 %v3070_v50, %v2846_v30  ;;  %v8528_v41 = vsel %vm3164_vm0, %v3079_v31, -1e+30  ;;  %v2863_v52 = vpop.f32.mrf.mxu1 }
 0x6cf   :  { %v6175_v47 = vpop.f32.mrf.mxu0  ;;  %3267 = vmax.xlane.f32.xlu1 %v8528_v41 }
 0x6d0   :  { %v2866_v55 = vpop.f32.mrf.mxu1  ;;  %v8540_v1 = vsel %vm3164_vm0, %v3071_v40, -1e+30 }
 0x6d1   :  { %v3083_v12 = vpop.f32.mrf.mxu0  ;;  %3261 = vmax.xlane.f32.xlu0 %v8534_v34  ;;  %v2867_v61 = vadd.f32 %v8346_v42, %v2866_v55 }
 0x6d2   :  { %v3084_v59 = vadd.f32 %v3083_v12, %v2859_v13  ;;  %v2868_v46 = vpop.f32.mrf.mxu1 }
 0x6d3   :  { %v6176_v3 = vpop.f32.mrf.mxu0  ;;  %3263 = vmax.xlane.f32.xlu1 %v8540_v1  ;;  %v3092_v53 = vadd.f32 %v6175_v47, %v2867_v61 }
 0x6d4   :  { %v8546_v7 = vsel %vm3164_vm0, %v3084_v59, -1e+30  ;;  %v2869_v9 = vpop.f32.mrf.mxu1 }
 0x6d5   :  { %v3086_v10 = vpop.f32.mrf.mxu0  ;;  %3269 = vmax.xlane.f32.xlu0 %v8546_v7  ;;  %v2870_v14 = vadd.f32 %v8346_v42, %v2869_v9  ;;  %v8556_v20 = vsel %vm3164_vm0, %v3092_v53, -1e+30 }
 0x6d6   :  { %v3087_v51 = vadd.f32 %v3086_v10, %v2862_v0  ;;  %v2871_v4 = vpop.f32.mrf.mxu1 }
 0x6d7   :  { %v6179_v16 = vpop.f32.mrf.mxu0  ;;  %v3095_v21 = vadd.f32 %v6176_v3, %v2870_v14 }
 0x6d8   :  { %v8552_v32 = vsel %vm3164_vm0, %v3087_v51, -1e+30  ;;  %v2874_v60 = vpop.f32.mrf.mxu1 }
 0x6d9   :  { %3271 = vmax.xlane.f32.xlu1 %v8552_v32  ;;  %3273 = vmax.xlane.f32.xlu0 %v8556_v20  ;;  %v3099_v58 = vpop.f32.mrf.mxu0  ;;  %v2875_v25 = vadd.f32 %v8346_v42, %v2874_v60  ;;  %v8563_v48 = vsel %vm3164_vm0, %v3095_v21, -1e+30 }
 0x6da   :  { %v2876_v33 = vpop.f32.mrf.mxu1 }
 0x6db   :  { %v6180_v54 = vpop.f32.mrf.mxu0  ;;  %v3100_v28 = vadd.f32 %v3099_v58, %v2875_v25 }
 0x6dc   :  { %v2877_v30 = vpop.f32.mrf.mxu1 }
 0x6dd   :  { %3275 = vmax.xlane.f32.xlu1 %v8563_v48  ;;  %v3102_v26 = vpop.f32.mrf.mxu0  ;;  %v2878_v31 = vadd.f32 %v8346_v42, %v2877_v30  ;;  %v8569_v39 = vsel %vm3164_vm0, %v3100_v28, -1e+30 }
 0x6de   :  { %v2879_v50 = vpop.f32.mrf.mxu1  ;;  %3277 = vmax.xlane.f32.xlu0 %v8569_v39 }
 0x6df   :  { %v3103_v40 = vadd.f32 %v3102_v26, %v2878_v31  ;;  %v6183_v47 = vpop.f32.mrf.mxu0 }
 0x6e0   :  { %v2882_v52 = vpop.f32.mrf.mxu1 }
 0x6e1   :  { %v2883_v13 = vadd.f32 %v8346_v42, %v2882_v52  ;;  %v8575_v55 = vsel %vm3164_vm0, %v3103_v40, -1e+30  ;;  %v3115_v46 = vpop.f32.mrf.mxu0 }
 0x6e2   :  { %v2884_v12 = vpop.f32.mrf.mxu1  ;;  %3279 = vmax.xlane.f32.xlu1 %v8575_v55 }
 0x6e3   :  { %v3108_v61 = vadd.f32 %v6179_v16, %v2883_v13  ;;  %v6184_v14 = vpop.f32.mrf.mxu0 }
 0x6e4   :  { %v2885_v59 = vpop.f32.mrf.mxu1 }
 0x6e5   :  { %v2886_v3 = vadd.f32 %v8346_v42, %v2885_v59  ;;  %v8581_v0 = vsel %vm3164_vm0, %v3108_v61, -1e+30  ;;  %v3118_v58 = vpop.f32.mrf.mxu0 }
 0x6e6   :  { %v2887_v53 = vpop.f32.mrf.mxu1  ;;  %3281 = vmax.xlane.f32.xlu0 %v8581_v0 }
 0x6e7   :  { %v3111_v9 = vadd.f32 %v6180_v54, %v2886_v3  ;;  %v6187_v26 = vpop.f32.mrf.mxu0 }
 0x6e8   :  { %v2890_v10 = vpop.f32.mrf.mxu1 }
 0x6e9   :  { %v2891_v51 = vadd.f32 %v8346_v42, %v2890_v10  ;;  %v8587_v4 = vsel %vm3164_vm0, %v3111_v9, -1e+30  ;;  %v3131_v12 = vpop.f32.mrf.mxu0 }
 0x6ea   :  { %v2892_v16 = vpop.f32.mrf.mxu1  ;;  %3283 = vmax.xlane.f32.xlu1 %v8587_v4 }
 0x6eb   :  { %v3116_v21 = vadd.f32 %v3115_v46, %v2891_v51  ;;  %v6188_v9 = vpop.f32.mrf.mxu0 }
 0x6ec   :  { %v2893_v60 = vpop.f32.mrf.mxu1 }
 0x6ed   :  { %v2894_v25 = vadd.f32 %v8346_v42, %v2893_v60  ;;  %v8593_v33 = vsel %vm3164_vm0, %v3116_v21, -1e+30  ;;  %v3134_v60 = vpop.f32.mrf.mxu0 }
 0x6ee   :  { %v2895_v54 = vpop.f32.mrf.mxu1  ;;  %3285 = vmax.xlane.f32.xlu0 %v8593_v33 }
 0x6ef   :  { %v3119_v28 = vadd.f32 %v3118_v58, %v2894_v25 }
 0x6f0   :  { %v2898_v30 = vpop.f32.mrf.mxu1 }
 0x6f1   :  { %v2899_v31 = vadd.f32 %v8346_v42, %v2898_v30  ;;  %v8599_v50 = vsel %vm3164_vm0, %v3119_v28, -1e+30 }
 0x6f2   :  { %v2900_v40 = vpop.f32.mrf.mxu1  ;;  %3287 = vmax.xlane.f32.xlu1 %v8599_v50 }
 0x6f3   :  { %v3124_v52 = vadd.f32 %v6183_v47, %v2899_v31 }
 0x6f4   :  { %v2901_v13 = vpop.f32.mrf.mxu1 }
 0x6f5   :  { %v2902_v61 = vadd.f32 %v8346_v42, %v2901_v13  ;;  %v8605_v59 = vsel %vm3164_vm0, %v3124_v52, -1e+30  ;;  %v6191_v52 = vpop.f32.mrf.mxu0 }
 0x6f6   :  { %v2903_v46 = vpop.f32.mrf.mxu1  ;;  %3289 = vmax.xlane.f32.xlu0 %v8605_v59 }
 0x6f7   :  { %v3127_v3 = vadd.f32 %v6184_v14, %v2902_v61 }
 0x6f8   :  { %v2906_v53 = vpop.f32.mrf.mxu1 }
 0x6f9   :  { %v2907_v10 = vadd.f32 %v8346_v42, %v2906_v53  ;;  %v8611_v51 = vsel %vm3164_vm0, %v3127_v3, -1e+30  ;;  %v3147_v53 = vpop.f32.mrf.mxu0 }
 0x6fa   :  { %v2908_v47 = vpop.f32.mrf.mxu1  ;;  %3291 = vmax.xlane.f32.xlu1 %v8611_v51 }
 0x6fb   :  { %v3132_v16 = vadd.f32 %v3131_v12, %v2907_v10 }
 0x6fc   :  { %v2909_v21 = vpop.f32.mrf.mxu1 }
 0x6fd   :  { %v2910_v58 = vadd.f32 %v8346_v42, %v2909_v21  ;;  %v8617_v25 = vsel %vm3164_vm0, %v3132_v16, -1e+30 }
 0x6fe   :  { %v2911_v14 = vpop.f32.mrf.mxu1  ;;  %3293 = vmax.xlane.f32.xlu0 %v8617_v25 }
 0x6ff   :  { %v3135_v54 = vadd.f32 %v3134_v60, %v2910_v58  ;;  %v6192_v60 = vpop.f32.mrf.mxu0 }
 0x700   :  { %v2914_v28 = vpop.f32.mrf.mxu1 }
 0x701   :  { %v2915_v30 = vadd.f32 %v8346_v42, %v2914_v28  ;;  %v8623_v31 = vsel %vm3164_vm0, %v3135_v54, -1e+30 }
 0x702   :  { %v2916_v40 = vpop.f32.mrf.mxu1  ;;  %3295 = vmax.xlane.f32.xlu1 %v8623_v31 }
 0x703   :  { %v3140_v13 = vadd.f32 %v6187_v26, %v2915_v30  ;;  %v3150_v30 = vpop.f32.mrf.mxu0 }
 0x704   :  { %v2917_v12 = vpop.f32.mrf.mxu1 }
 0x705   :  { %v2918_v61 = vadd.f32 %v8346_v42, %v2917_v12  ;;  %v8629_v46 = vsel %vm3164_vm0, %v3140_v13, -1e+30 }
 0x706   :  { %v2919_v3 = vpop.f32.mrf.mxu1  ;;  %3297 = vmax.xlane.f32.xlu0 %v8629_v46 }
 0x707   :  { %v3143_v10 = vadd.f32 %v6188_v9, %v2918_v61 }
 0x708   :  { %v2922_v47 = vpop.f32.mrf.mxu1 }
 0x709   :  { %v2923_v16 = vadd.f32 %v8346_v42, %v2922_v47  ;;  %v8635_v21 = vsel %vm3164_vm0, %v3143_v10, -1e+30 }
 0x70a   :  { %v2924_v26 = vpop.f32.mrf.mxu1  ;;  %3299 = vmax.xlane.f32.xlu1 %v8635_v21 }
 0x70b   :  { %v3148_v58 = vadd.f32 %v3147_v53, %v2923_v16 }
 0x70c   :  { %v2925_v14 = vpop.f32.mrf.mxu1 }
 0x70d   :  { %v2926_v54 = vadd.f32 %v8346_v42, %v2925_v14  ;;  %v8641_v28 = vsel %vm3164_vm0, %v3148_v58, -1e+30 }
 0x70e   :  { %v2927_v9 = vpop.f32.mrf.mxu1  ;;  %3301 = vmax.xlane.f32.xlu0 %v8641_v28 }
 0x70f   :  { %v3151_v40 = vadd.f32 %v3150_v30, %v2926_v54 }
 0x710   :  { %v2930_v13 = vpop.f32.mrf.mxu1 }
 0x711   :  { %v2931_v12 = vadd.f32 %v8346_v42, %v2930_v13  ;;  %v8647_v61 = vsel %vm3164_vm0, %v3151_v40, -1e+30 }
 0x712   :  { %v2932_v3 = vpop.f32.mrf.mxu1  ;;  %3303 = vmax.xlane.f32.xlu1 %v8647_v61 }
 0x713   :  { %v3156_v53 = vadd.f32 %v6191_v52, %v2931_v12 }
 0x714   :  { %v2933_v10 = vpop.f32.mrf.mxu1 }
 0x715   :  { %v2934_v47 = vadd.f32 %v8346_v42, %v2933_v10  ;;  %v8653_v16 = vsel %vm3164_vm0, %v3156_v53, -1e+30 }
 0x716   :  { %3305 = vmax.xlane.f32.xlu0 %v8653_v16  ;;  %v2935_v26 = vpop.f32.mrf.mxu1 }
 0x717   :  { %v3159_v58 = vadd.f32 %v6192_v60, %v2934_v47 }
 0x719   :  { %v8658_v14 = vsel %vm3164_vm0, %v3159_v58, -1e+30 }
 0x71a   :  { %3307 = vmax.xlane.f32.xlu1 %v8658_v14 }
 0x724   :  { %v3218_v54 = vpop.xlane.xlu1 %3217 }
 0x725   :  { %v3311_v52 = vsub.f32 %v8358_v17, %v3218_v54 }
 0x726   :  { %v3214_v9 = vpop.xlane.xlu0 %3213 }
 0x727   :  { %v3361_v30 = vmul.f32 1.442695, %v3311_v52  ;;  %v3309_v42 = vsub.f32 %v8364_v19, %v3214_v9 }
 0x728   :  { %v3220_v40 = vpop.xlane.xlu1 %3219 }
 0x729   :  { %6443 = vpow2.f32 %v3361_v30  ;;  %v3357_v13 = vmul.f32 1.442695, %v3309_v42  ;;  %v3312_v12 = vsub.f32 %v8372_v23, %v3220_v40 }
 0x72a   :  { %v3216_v3 = vpop.xlane.xlu0 %3215 }
 0x72b   :  { %v3363_v60 = vmul.f32 1.442695, %v3312_v12  ;;  %v3310_v53 = vsub.f32 %v8377_v56, %v3216_v3  ;;  %6445 = vpow2.f32 %v3357_v13 }
 0x72d   :  { %6447 = vpow2.f32 %v3363_v60  ;;  %v3359_v10 = vmul.f32 1.442695, %v3310_v53 }
 0x72e   :  { %v3226_v47 = vpop.xlane.xlu0 %3225 }
 0x72f   :  { %v3315_v26 = vsub.f32 %v8385_v38, %v3226_v47  ;;  %6449 = vpow2.f32 %v3359_v10 }
 0x730   :  { %v3228_v17 = vpop.xlane.xlu1 %3227 }
 0x731   :  { %v3369_v58 = vmul.f32 1.442695, %v3315_v26  ;;  %v3316_v19 = vsub.f32 %v8393_v43, %v3228_v17 }
 0x732   :  { %v3222_v54 = vpop.xlane.xlu0 %3221 }
 0x733   :  { %6451 = vpow2.f32 %v3369_v58  ;;  %v3371_v52 = vmul.f32 1.442695, %v3316_v19  ;;  %v3313_v23 = vsub.f32 %v8398_v49, %v3222_v54 }
 0x734   :  { %v3224_v9 = vpop.xlane.xlu1 %3223 }
 0x735   :  { %6453 = vpow2.f32 %v3371_v52  ;;  %v3365_v30 = vmul.f32 1.442695, %v3313_v23  ;;  %v3314_v56 = vsub.f32 %v8409_v24, %v3224_v9 }
 0x736   :  { %v8669_v42 = vpop.eup %6443  ;;  %v3234_v40 = vpop.xlane.xlu0 %3233 }
 0x737   :  { %6455 = vpow2.f32 %v3365_v30  ;;  %v3367_v38 = vmul.f32 1.442695, %v3314_v56  ;;  %v3319_v13 = vsub.f32 %v8416_v2, %v3234_v40  ;;  %3457 = vadd.xlane.f32.xlu0 %v8669_v42 }
 0x738   :  { %v3236_v43 = vpop.xlane.xlu1 %3235  ;;  %v8673_v12 = vpop.eup %6445 }
 0x739   :  { %6457 = vpow2.f32 %v3367_v38  ;;  %v3377_v3 = vmul.f32 1.442695, %v3319_v13  ;;  %v3320_v49 = vsub.f32 %v8425_v8, %v3236_v43 }
 0x73a   :  { %v8676_v60 = vpop.eup %6447  ;;  %v3230_v53 = vpop.xlane.xlu0 %3229 }
 0x73b   :  { %6459 = vpow2.f32 %v3377_v3  ;;  %v3379_v24 = vmul.f32 1.442695, %v3320_v49  ;;  %v3317_v10 = vsub.f32 %v8430_v11, %v3230_v53  ;;  %3459 = vadd.xlane.f32.xlu1 %v8676_v60  ;;  %3453 = vadd.xlane.f32.xlu0 %v8673_v12 }
 0x73c   :  { %v3232_v2 = vpop.xlane.xlu1 %3231  ;;  %v8682_v17 = vpop.eup %6449 }
 0x73d   :  { %6461 = vpow2.f32 %v3379_v24  ;;  %v3373_v47 = vmul.f32 1.442695, %v3317_v10  ;;  %v3318_v26 = vsub.f32 %v8439_v18, %v3232_v2 }
 0x73e   :  { %v3242_v58 = vpop.xlane.xlu0 %3241 }
 0x73f   :  { %6463 = vpow2.f32 %v3373_v47  ;;  %v3375_v8 = vmul.f32 1.442695, %v3318_v26  ;;  %v3323_v19 = vsub.f32 %v8446_v36, %v3242_v58  ;;  %3455 = vadd.xlane.f32.xlu1 %v8682_v17 }
 0x740   :  { %v8686_v54 = vpop.eup %6451  ;;  %v3244_v11 = vpop.xlane.xlu1 %3243 }
 0x741   :  { %6465 = vpow2.f32 %v3375_v8  ;;  %v3385_v52 = vmul.f32 1.442695, %v3323_v19  ;;  %v3324_v23 = vsub.f32 %v8452_v62, %v3244_v11  ;;  %3465 = vadd.xlane.f32.xlu0 %v8686_v54 }
 0x742   :  { %v8690_v9 = vpop.eup %6453  ;;  %v3238_v18 = vpop.xlane.xlu0 %3237 }
 0x743   :  { %6467 = vpow2.f32 %v3385_v52  ;;  %v3387_v30 = vmul.f32 1.442695, %v3324_v23  ;;  %v3321_v56 = vsub.f32 %v8457_v29, %v3238_v18  ;;  %3467 = vadd.xlane.f32.xlu1 %v8690_v9 }
 0x744   :  { %v8694_v36 = vpop.eup %6455  ;;  %v3240_v40 = vpop.xlane.xlu1 %3239 }
 0x745   :  { %6469 = vpow2.f32 %v3387_v30  ;;  %v3381_v38 = vmul.f32 1.442695, %v3321_v56  ;;  %v3322_v13 = vsub.f32 %v8466_v35, %v3240_v40  ;;  %3461 = vadd.xlane.f32.xlu0 %v8694_v36 }
 0x746   :  { %v8698_v62 = vpop.eup %6457  ;;  %v3250_v43 = vpop.xlane.xlu0 %3249 }
 0x747   :  { %6471 = vpow2.f32 %v3381_v38  ;;  %v3383_v3 = vmul.f32 1.442695, %v3322_v13  ;;  %v3327_v49 = vsub.f32 %v8473_v45, %v3250_v43  ;;  %3463 = vadd.xlane.f32.xlu1 %v8698_v62 }
 0x748   :  { %v8702_v29 = vpop.eup %6459  ;;  %v3252_v53 = vpop.xlane.xlu1 %3251 }
 0x749   :  { %6473 = vpow2.f32 %v3383_v3  ;;  %v3393_v24 = vmul.f32 1.442695, %v3327_v49  ;;  %v3328_v10 = vsub.f32 %v8479_v57, %v3252_v53  ;;  %3473 = vadd.xlane.f32.xlu0 %v8702_v29 }
 0x74a   :  { %v8706_v35 = vpop.eup %6461  ;;  %v3246_v2 = vpop.xlane.xlu0 %3245 }
 0x74b   :  { %6475 = vpow2.f32 %v3393_v24  ;;  %v3395_v47 = vmul.f32 1.442695, %v3328_v10  ;;  %v3325_v26 = vsub.f32 %v8484_v63, %v3246_v2  ;;  %3475 = vadd.xlane.f32.xlu1 %v8706_v35 }
 0x74c   :  { %v8710_v45 = vpop.eup %6463  ;;  %v3248_v58 = vpop.xlane.xlu1 %3247 }
 0x74d   :  { %6477 = vpow2.f32 %v3395_v47  ;;  %v3389_v8 = vmul.f32 1.442695, %v3325_v26  ;;  %v3326_v19 = vsub.f32 %v8492_v5, %v3248_v58  ;;  %3469 = vadd.xlane.f32.xlu0 %v8710_v45 }
 0x74e   :  { %v8714_v57 = vpop.eup %6465  ;;  %v3258_v11 = vpop.xlane.xlu0 %3257 }
 0x74f   :  { %6479 = vpow2.f32 %v3389_v8  ;;  %v3391_v52 = vmul.f32 1.442695, %v3326_v19  ;;  %v3331_v23 = vsub.f32 %v8499_v15, %v3258_v11  ;;  %3471 = vadd.xlane.f32.xlu1 %v8714_v57 }
 0x750   :  { %v8718_v63 = vpop.eup %6467  ;;  %v3260_v18 = vpop.xlane.xlu1 %3259 }
 0x751   :  { %6481 = vpow2.f32 %v3391_v52  ;;  %v3401_v30 = vmul.f32 1.442695, %v3331_v23  ;;  %v3332_v56 = vsub.f32 %v8505_v44, %v3260_v18  ;;  %3481 = vadd.xlane.f32.xlu0 %v8718_v63 }
 0x752   :  { %v8722_v5 = vpop.eup %6469  ;;  %v3254_v40 = vpop.xlane.xlu0 %3253 }
 0x753   :  { %6483 = vpow2.f32 %v3401_v30  ;;  %v3403_v38 = vmul.f32 1.442695, %v3332_v56  ;;  %v3329_v13 = vsub.f32 %v8510_v22, %v3254_v40  ;;  %3483 = vadd.xlane.f32.xlu1 %v8722_v5 }
 0x754   :  { %v8726_v15 = vpop.eup %6471  ;;  %v3256_v43 = vpop.xlane.xlu1 %3255 }
 0x755   :  { %6485 = vpow2.f32 %v3403_v38  ;;  %v3397_v3 = vmul.f32 1.442695, %v3329_v13  ;;  %v3330_v49 = vsub.f32 %v8517_v27, %v3256_v43  ;;  %3477 = vadd.xlane.f32.xlu0 %v8726_v15 }
 0x756   :  { %v8730_v44 = vpop.eup %6473  ;;  %v3266_v53 = vpop.xlane.xlu0 %3265 }
 0x757   :  { %6487 = vpow2.f32 %v3397_v3  ;;  %v3399_v24 = vmul.f32 1.442695, %v3330_v49  ;;  %v3335_v10 = vsub.f32 %v8523_v37, %v3266_v53  ;;  %3479 = vadd.xlane.f32.xlu1 %v8730_v44 }
 0x758   :  { %v8734_v22 = vpop.eup %6475  ;;  %v3268_v2 = vpop.xlane.xlu1 %3267 }
 0x759   :  { %6489 = vpow2.f32 %v3399_v24  ;;  %v3409_v47 = vmul.f32 1.442695, %v3335_v10  ;;  %v3336_v26 = vsub.f32 %v8528_v41, %v3268_v2  ;;  %3489 = vadd.xlane.f32.xlu0 %v8734_v22 }
 0x75a   :  { %v8738_v27 = vpop.eup %6477  ;;  %v3262_v58 = vpop.xlane.xlu0 %3261 }
 0x75b   :  { %6491 = vpow2.f32 %v3409_v47  ;;  %v3411_v8 = vmul.f32 1.442695, %v3336_v26  ;;  %v3333_v19 = vsub.f32 %v8534_v34, %v3262_v58  ;;  %3491 = vadd.xlane.f32.xlu1 %v8738_v27 }
 0x75c   :  { %v8742_v37 = vpop.eup %6479  ;;  %v3264_v11 = vpop.xlane.xlu1 %3263 }
 0x75d   :  { %6493 = vpow2.f32 %v3411_v8  ;;  %v3405_v52 = vmul.f32 1.442695, %v3333_v19  ;;  %v3334_v23 = vsub.f32 %v8540_v1, %v3264_v11  ;;  %3485 = vadd.xlane.f32.xlu0 %v8742_v37 }
 0x75e   :  { %v8746_v41 = vpop.eup %6481  ;;  %v3270_v18 = vpop.xlane.xlu0 %3269 }
 0x75f   :  { %6495 = vpow2.f32 %v3405_v52  ;;  %v3407_v30 = vmul.f32 1.442695, %v3334_v23  ;;  %v3337_v56 = vsub.f32 %v8546_v7, %v3270_v18  ;;  %3487 = vadd.xlane.f32.xlu1 %v8746_v41 }
 0x760   :  { %v8750_v34 = vpop.eup %6483 }
 0x761   :  { %6497 = vpow2.f32 %v3407_v30  ;;  %v3413_v40 = vmul.f32 1.442695, %v3337_v56  ;;  %3497 = vadd.xlane.f32.xlu0 %v8750_v34 }
 0x762   :  { %v8753_v38 = vpop.eup %6485  ;;  %v3272_v1 = vpop.xlane.xlu1 %3271 }
 0x763   :  { %v3274_v13 = vpop.xlane.xlu0 %3273  ;;  %6499 = vpow2.f32 %v3413_v40  ;;  %v3338_v43 = vsub.f32 %v8552_v32, %v3272_v1  ;;  %3499 = vadd.xlane.f32.xlu1 %v8753_v38 }
 0x764   :  { %v3339_v3 = vsub.f32 %v8556_v20, %v3274_v13  ;;  %v8758_v7 = vpop.eup %6487 }
 0x765   :  { %v3415_v49 = vmul.f32 1.442695, %v3338_v43  ;;  %3493 = vadd.xlane.f32.xlu0 %v8758_v7 }
 0x766   :  { %v3417_v53 = vmul.f32 1.442695, %v3339_v3  ;;  %v8761_v24 = vpop.eup %6489  ;;  %v3276_v10 = vpop.xlane.xlu1 %3275 }
 0x767   :  { %6501 = vpow2.f32 %v3415_v49  ;;  %v3340_v2 = vsub.f32 %v8563_v48, %v3276_v10  ;;  %3495 = vadd.xlane.f32.xlu1 %v8761_v24  ;;  %v3278_v32 = vpop.xlane.xlu0 %3277 }
 0x768   :  { %v8765_v47 = vpop.eup %6491  ;;  %6503 = vpow2.f32 %v3417_v53  ;;  %v3341_v26 = vsub.f32 %v8569_v39, %v3278_v32 }
 0x769   :  { %v3419_v20 = vmul.f32 1.442695, %v3340_v2  ;;  %3505 = vadd.xlane.f32.xlu0 %v8765_v47 }
 0x76a   :  { %v8769_v58 = vpop.eup %6493  ;;  %v3421_v8 = vmul.f32 1.442695, %v3341_v26 }
 0x76b   :  { %6505 = vpow2.f32 %v3419_v20  ;;  %3507 = vadd.xlane.f32.xlu1 %v8769_v58  ;;  %v3280_v48 = vpop.xlane.xlu1 %3279 }
 0x76c   :  { %v8772_v19 = vpop.eup %6495  ;;  %6507 = vpow2.f32 %v3421_v8  ;;  %v3342_v11 = vsub.f32 %v8575_v55, %v3280_v48 }
 0x76d   :  { %3501 = vadd.xlane.f32.xlu0 %v8772_v19 }
 0x76e   :  { %v8776_v52 = vpop.eup %6497  ;;  %v3423_v23 = vmul.f32 1.442695, %v3342_v11 }
 0x76f   :  { %3503 = vadd.xlane.f32.xlu1 %v8776_v52  ;;  %v3282_v18 = vpop.xlane.xlu0 %3281 }
 0x770   :  { %v8779_v39 = vpop.eup %6499  ;;  %6509 = vpow2.f32 %v3423_v23  ;;  %v3343_v30 = vsub.f32 %v8581_v0, %v3282_v18 }
 0x771   :  { %3509 = vadd.xlane.f32.xlu0 %v8779_v39 }
 0x772   :  { %v3425_v56 = vmul.f32 1.442695, %v3343_v30 }
 0x773   :  { %v3284_v1 = vpop.xlane.xlu1 %3283 }
 0x774   :  { %v8783_v40 = vpop.eup %6501  ;;  %6511 = vpow2.f32 %v3425_v56  ;;  %v3344_v13 = vsub.f32 %v8587_v4, %v3284_v1 }
 0x775   :  { %v8785_v55 = vpop.eup %6503  ;;  %3511 = vadd.xlane.f32.xlu1 %v8783_v40 }
 0x776   :  { %3513 = vadd.xlane.f32.xlu0 %v8785_v55  ;;  %v3427_v43 = vmul.f32 1.442695, %v3344_v13 }
 0x777   :  { %v3286_v49 = vpop.xlane.xlu0 %3285 }
 0x778   :  { %v8790_v3 = vpop.eup %6505  ;;  %6513 = vpow2.f32 %v3427_v43  ;;  %v3345_v0 = vsub.f32 %v8593_v33, %v3286_v49 }
 0x779   :  { %3515 = vadd.xlane.f32.xlu1 %v8790_v3  ;;  %v8794_v53 = vpop.eup %6507 }
 0x77a   :  { %v3429_v10 = vmul.f32 1.442695, %v3345_v0  ;;  %3517 = vadd.xlane.f32.xlu0 %v8794_v53 }
 0x77b   :  { %v3288_v2 = vpop.xlane.xlu1 %3287 }
 0x77c   :  { %6515 = vpow2.f32 %v3429_v10  ;;  %v3346_v4 = vsub.f32 %v8599_v50, %v3288_v2 }
 0x77d   :  { %v8798_v32 = vpop.eup %6509 }
 0x77e   :  { %v3431_v20 = vmul.f32 1.442695, %v3346_v4  ;;  %3519 = vadd.xlane.f32.xlu1 %v8798_v32 }
 0x77f   :  { %v3290_v26 = vpop.xlane.xlu0 %3289 }
 0x780   :  { %6517 = vpow2.f32 %v3431_v20  ;;  %v3347_v33 = vsub.f32 %v8605_v59, %v3290_v26 }
 0x781   :  { %v8802_v8 = vpop.eup %6511 }
 0x782   :  { %v3433_v48 = vmul.f32 1.442695, %v3347_v33  ;;  %3521 = vadd.xlane.f32.xlu0 %v8802_v8 }
 0x783   :  { %v3292_v11 = vpop.xlane.xlu1 %3291 }
 0x784   :  { %6519 = vpow2.f32 %v3433_v48  ;;  %v3348_v23 = vsub.f32 %v8611_v51, %v3292_v11 }
 0x785   :  { %v8806_v18 = vpop.eup %6513 }
 0x786   :  { %v3435_v50 = vmul.f32 1.442695, %v3348_v23  ;;  %3523 = vadd.xlane.f32.xlu1 %v8806_v18 }
 0x787   :  { %v3294_v30 = vpop.xlane.xlu0 %3293 }
 0x788   :  { %6521 = vpow2.f32 %v3435_v50  ;;  %v3349_v56 = vsub.f32 %v8617_v25, %v3294_v30 }
 0x789   :  { %v8810_v1 = vpop.eup %6515 }
 0x78a   :  { %v3437_v59 = vmul.f32 1.442695, %v3349_v56  ;;  %3525 = vadd.xlane.f32.xlu0 %v8810_v1 }
 0x78b   :  { %v3296_v13 = vpop.xlane.xlu1 %3295 }
 0x78c   :  { %6523 = vpow2.f32 %v3437_v59  ;;  %v3350_v43 = vsub.f32 %v8623_v31, %v3296_v13 }
 0x78d   :  { %v8814_v49 = vpop.eup %6517 }
 0x78e   :  { %v3439_v51 = vmul.f32 1.442695, %v3350_v43  ;;  %3527 = vadd.xlane.f32.xlu1 %v8814_v49 }
 0x78f   :  { %v3298_v0 = vpop.xlane.xlu0 %3297 }
 0x790   :  { %6525 = vpow2.f32 %v3439_v51  ;;  %v3351_v10 = vsub.f32 %v8629_v46, %v3298_v0 }
 0x791   :  { %v8818_v2 = vpop.eup %6519 }
 0x792   :  { %v3441_v25 = vmul.f32 1.442695, %v3351_v10  ;;  %3529 = vadd.xlane.f32.xlu0 %v8818_v2 }
 0x793   :  { %v3300_v4 = vpop.xlane.xlu1 %3299 }
 0x794   :  { %6527 = vpow2.f32 %v3441_v25  ;;  %v3352_v20 = vsub.f32 %v8635_v21, %v3300_v4 }
 0x795   :  { %v8822_v26 = vpop.eup %6521 }
 0x796   :  { %v3443_v31 = vmul.f32 1.442695, %v3352_v20  ;;  %3531 = vadd.xlane.f32.xlu1 %v8822_v26 }
 0x797   :  { %v3302_v33 = vpop.xlane.xlu0 %3301 }
 0x798   :  { %6529 = vpow2.f32 %v3443_v31  ;;  %v3353_v48 = vsub.f32 %v8641_v28, %v3302_v33 }
 0x799   :  { %v8826_v11 = vpop.eup %6523 }
 0x79a   :  { %v3445_v46 = vmul.f32 1.442695, %v3353_v48  ;;  %3533 = vadd.xlane.f32.xlu0 %v8826_v11 }
 0x79b   :  { %v3304_v23 = vpop.xlane.xlu1 %3303 }
 0x79c   :  { %6531 = vpow2.f32 %v3445_v46  ;;  %v3354_v50 = vsub.f32 %v8647_v61, %v3304_v23 }
 0x79d   :  { %v8830_v30 = vpop.eup %6525 }
 0x79e   :  { %v3447_v21 = vmul.f32 1.442695, %v3354_v50  ;;  %3535 = vadd.xlane.f32.xlu1 %v8830_v30 }
 0x79f   :  { %v3306_v56 = vpop.xlane.xlu0 %3305 }
 0x7a0   :  { %6533 = vpow2.f32 %v3447_v21  ;;  %v3355_v59 = vsub.f32 %v8653_v16, %v3306_v56 }
 0x7a1   :  { %v8834_v13 = vpop.eup %6527 }
 0x7a2   :  { %v3449_v28 = vmul.f32 1.442695, %v3355_v59  ;;  %3537 = vadd.xlane.f32.xlu0 %v8834_v13 }
 0x7a3   :  { %v3308_v43 = vpop.xlane.xlu1 %3307 }
 0x7a4   :  { %6535 = vpow2.f32 %v3449_v28  ;;  %v3356_v51 = vsub.f32 %v8658_v14, %v3308_v43 }
 0x7a5   :  { %v8838_v0 = vpop.eup %6529 }
 0x7a6   :  { %v3451_v61 = vmul.f32 1.442695, %v3356_v51  ;;  %3539 = vadd.xlane.f32.xlu1 %v8838_v0 }
 0x7a8   :  { %6537 = vpow2.f32 %v3451_v61 }
 0x7a9   :  { %v8841_v10 = vpop.eup %6531 }
 0x7aa   :  { %3541 = vadd.xlane.f32.xlu0 %v8841_v10 }
 0x7ad   :  { %v8844_v16 = vpop.eup %6533 }
 0x7ae   :  { %3543 = vadd.xlane.f32.xlu1 %v8844_v16 }
 0x7b1   :  { %v8847_v25 = vpop.eup %6535 }
 0x7b2   :  { %3545 = vadd.xlane.f32.xlu0 %v8847_v25 }
 0x7b5   :  { %v8850_v4 = vpop.eup %6537 }
 0x7b6   :  { %3547 = vadd.xlane.f32.xlu1 %v8850_v4 }
 0x7c0   :  { %v3458_v14 = vpop.xlane.xlu0 %3457 }
 0x7c1   :  { %6539 = vrcp.f32 %v3458_v14 }
 0x7c4   :  { %v3460_v20 = vpop.xlane.xlu1 %3459  ;;  %v3454_v31 = vpop.xlane.xlu0 %3453 }
 0x7c5   :  { %6541 = vrcp.f32 %v3460_v20 }
 0x7c6   :  { %6543 = vrcp.f32 %v3454_v31 }
 0x7c8   :  { %v3456_v33 = vpop.xlane.xlu1 %3455 }
 0x7c9   :  { %6545 = vrcp.f32 %v3456_v33 }
 0x7ca   :  { %v3466_v48 = vpop.xlane.xlu0 %3465 }
 0x7cb   :  { %6547 = vrcp.f32 %v3466_v48 }
 0x7cc   :  { %v3468_v46 = vpop.xlane.xlu1 %3467 }
 0x7cd   :  { %6549 = vrcp.f32 %v3468_v46 }
 0x7ce   :  { %v6540_v23 = vpop.eup %6539  ;;  %v3462_v50 = vpop.xlane.xlu0 %3461 }
 0x7cf   :  { %v3599_v21 = vmul.f32 %v6540_v23, %v8669_v42  ;;  %6551 = vrcp.f32 %v3462_v50 }
 0x7d0   :  { %v3464_v56 = vpop.xlane.xlu1 %3463 }
 0x7d1   :  { %3743 = vst [vmem:[%s10277_s9 + $0x10] sm:$0xff] %v3599_v21  ;;  %3791 = vst [vmem:[%s10278_s10 + $0x10] sm:$0xff] %v3599_v21  ;;  %6553 = vrcp.f32 %v3464_v56 }
 0x7d2   :  { %v6542_v59 = vpop.eup %6541  ;;  %v3474_v28 = vpop.xlane.xlu0 %3473 }
 0x7d3   :  { %v6544_v43 = vpop.eup %6543  ;;  %v3600_v51 = vmul.f32 %v6542_v59, %v8676_v60  ;;  %6555 = vrcp.f32 %v3474_v28 }
 0x7d4   :  { %v3597_v61 = vmul.f32 %v6544_v43, %v8673_v12  ;;  %v3476_v42 = vpop.xlane.xlu1 %3475 }
 0x7d5   :  { %3744 = vst [vmem:[%s10277_s9 + $0x18] sm:$0xff] %v3600_v51  ;;  %3792 = vst [vmem:[%s10278_s10 + $0x18] sm:$0xff] %v3600_v51  ;;  %6557 = vrcp.f32 %v3476_v42 }
 0x7d6   :  { %v6546_v14 = vpop.eup %6545  ;;  %3741 = vst [vmem:[%s10277_s9] sm:$0xff] %v3597_v61  ;;  %3789 = vst [vmem:[%s10278_s10] sm:$0xff] %v3597_v61  ;;  %v3470_v12 = vpop.xlane.xlu0 %3469 }
 0x7d7   :  { %v3598_v60 = vmul.f32 %v6546_v14, %v8682_v17  ;;  %6559 = vrcp.f32 %v3470_v12 }
 0x7d8   :  { %v6548_v20 = vpop.eup %6547  ;;  %v3472_v31 = vpop.xlane.xlu1 %3471 }
 0x7d9   :  { %3742 = vst [vmem:[%s10277_s9 + $0x8] sm:$0xff] %v3598_v60  ;;  %3790 = vst [vmem:[%s10278_s10 + $0x8] sm:$0xff] %v3598_v60  ;;  %v3603_v33 = vmul.f32 %v6548_v20, %v8686_v54  ;;  %6561 = vrcp.f32 %v3472_v31 }
 0x7da   :  { %v6550_v48 = vpop.eup %6549  ;;  %v3482_v46 = vpop.xlane.xlu0 %3481 }
 0x7db   :  { %3747 = vst [vmem:[%s10277_s9 + $0x30] sm:$0xff] %v3603_v33  ;;  %3795 = vst [vmem:[%s10278_s10 + $0x30] sm:$0xff] %v3603_v33  ;;  %v3604_v17 = vmul.f32 %v6550_v48, %v8690_v9  ;;  %6563 = vrcp.f32 %v3482_v46 }
 0x7dc   :  { %v6552_v23 = vpop.eup %6551  ;;  %v3484_v50 = vpop.xlane.xlu1 %3483 }
 0x7dd   :  { %3748 = vst [vmem:[%s10277_s9 + $0x38] sm:$0xff] %v3604_v17  ;;  %3796 = vst [vmem:[%s10278_s10 + $0x38] sm:$0xff] %v3604_v17  ;;  %v3601_v54 = vmul.f32 %v6552_v23, %v8694_v36  ;;  %6565 = vrcp.f32 %v3484_v50 }
 0x7de   :  { %v6554_v21 = vpop.eup %6553  ;;  %v3478_v56 = vpop.xlane.xlu0 %3477 }
 0x7df   :  { %3745 = vst [vmem:[%s10277_s9 + $0x20] sm:$0xff] %v3601_v54  ;;  %3793 = vst [vmem:[%s10278_s10 + $0x20] sm:$0xff] %v3601_v54  ;;  %v3602_v9 = vmul.f32 %v6554_v21, %v8698_v62  ;;  %6567 = vrcp.f32 %v3478_v56 }
 0x7e0   :  { %v6556_v59 = vpop.eup %6555  ;;  %v3480_v28 = vpop.xlane.xlu1 %3479 }
 0x7e1   :  { %3746 = vst [vmem:[%s10277_s9 + $0x28] sm:$0xff] %v3602_v9  ;;  %3794 = vst [vmem:[%s10278_s10 + $0x28] sm:$0xff] %v3602_v9  ;;  %v3607_v36 = vmul.f32 %v6556_v59, %v8702_v29  ;;  %6569 = vrcp.f32 %v3480_v28 }
 0x7e2   :  { %v6558_v43 = vpop.eup %6557  ;;  %v3490_v51 = vpop.xlane.xlu0 %3489 }
 0x7e3   :  { %3751 = vst [vmem:[%s10277_s9 + $0x50] sm:$0xff] %v3607_v36  ;;  %3799 = vst [vmem:[%s10278_s10 + $0x50] sm:$0xff] %v3607_v36  ;;  %v3608_v62 = vmul.f32 %v6558_v43, %v8706_v35  ;;  %6571 = vrcp.f32 %v3490_v51 }
 0x7e4   :  { %v6560_v61 = vpop.eup %6559  ;;  %v3492_v42 = vpop.xlane.xlu1 %3491 }
 0x7e5   :  { %3752 = vst [vmem:[%s10277_s9 + $0x58] sm:$0xff] %v3608_v62  ;;  %3800 = vst [vmem:[%s10278_s10 + $0x58] sm:$0xff] %v3608_v62  ;;  %v3605_v29 = vmul.f32 %v6560_v61, %v8710_v45  ;;  %6573 = vrcp.f32 %v3492_v42 }
 0x7e6   :  { %v6562_v14 = vpop.eup %6561  ;;  %v3486_v12 = vpop.xlane.xlu0 %3485 }
 0x7e7   :  { %3749 = vst [vmem:[%s10277_s9 + $0x40] sm:$0xff] %v3605_v29  ;;  %3797 = vst [vmem:[%s10278_s10 + $0x40] sm:$0xff] %v3605_v29  ;;  %v3606_v35 = vmul.f32 %v6562_v14, %v8714_v57  ;;  %6575 = vrcp.f32 %v3486_v12 }
 0x7e8   :  { %v6564_v60 = vpop.eup %6563  ;;  %v3488_v20 = vpop.xlane.xlu1 %3487 }
 0x7e9   :  { %3750 = vst [vmem:[%s10277_s9 + $0x48] sm:$0xff] %v3606_v35  ;;  %3798 = vst [vmem:[%s10278_s10 + $0x48] sm:$0xff] %v3606_v35  ;;  %v3611_v45 = vmul.f32 %v6564_v60, %v8718_v63  ;;  %6577 = vrcp.f32 %v3488_v20 }
 0x7ea   :  { %v6566_v31 = vpop.eup %6565  ;;  %v3498_v33 = vpop.xlane.xlu0 %3497 }
 0x7eb   :  { %3755 = vst [vmem:[%s10277_s9 + $0x70] sm:$0xff] %v3611_v45  ;;  %3803 = vst [vmem:[%s10278_s10 + $0x70] sm:$0xff] %v3611_v45  ;;  %v3612_v57 = vmul.f32 %v6566_v31, %v8722_v5  ;;  %6579 = vrcp.f32 %v3498_v33 }
 0x7ec   :  { %v6568_v48 = vpop.eup %6567  ;;  %v3500_v46 = vpop.xlane.xlu1 %3499 }
 0x7ed   :  { %3756 = vst [vmem:[%s10277_s9 + $0x78] sm:$0xff] %v3612_v57  ;;  %3804 = vst [vmem:[%s10278_s10 + $0x78] sm:$0xff] %v3612_v57  ;;  %v3609_v63 = vmul.f32 %v6568_v48, %v8726_v15  ;;  %6581 = vrcp.f32 %v3500_v46 }
 0x7ee   :  { %v6570_v17 = vpop.eup %6569  ;;  %v3494_v23 = vpop.xlane.xlu0 %3493 }
 0x7ef   :  { %3753 = vst [vmem:[%s10277_s9 + $0x60] sm:$0xff] %v3609_v63  ;;  %3801 = vst [vmem:[%s10278_s10 + $0x60] sm:$0xff] %v3609_v63  ;;  %v3610_v5 = vmul.f32 %v6570_v17, %v8730_v44  ;;  %6583 = vrcp.f32 %v3494_v23 }
 0x7f0   :  { %v6572_v50 = vpop.eup %6571  ;;  %v3496_v54 = vpop.xlane.xlu1 %3495 }
 0x7f1   :  { %3754 = vst [vmem:[%s10277_s9 + $0x68] sm:$0xff] %v3610_v5  ;;  %3802 = vst [vmem:[%s10278_s10 + $0x68] sm:$0xff] %v3610_v5  ;;  %v3615_v15 = vmul.f32 %v6572_v50, %v8734_v22  ;;  %6585 = vrcp.f32 %v3496_v54 }
 0x7f2   :  { %v6574_v21 = vpop.eup %6573  ;;  %v3506_v56 = vpop.xlane.xlu0 %3505 }
 0x7f3   :  { %3759 = vst [vmem:[%s10277_s9 + $0x90] sm:$0xff] %v3615_v15  ;;  %3807 = vst [vmem:[%s10278_s10 + $0x90] sm:$0xff] %v3615_v15  ;;  %v3616_v44 = vmul.f32 %v6574_v21, %v8738_v27  ;;  %6587 = vrcp.f32 %v3506_v56 }
 0x7f4   :  { %v6576_v9 = vpop.eup %6575  ;;  %v3508_v59 = vpop.xlane.xlu1 %3507 }
 0x7f5   :  { %3760 = vst [vmem:[%s10277_s9 + $0x98] sm:$0xff] %v3616_v44  ;;  %3808 = vst [vmem:[%s10278_s10 + $0x98] sm:$0xff] %v3616_v44  ;;  %v3613_v22 = vmul.f32 %v6576_v9, %v8742_v37  ;;  %6589 = vrcp.f32 %v3508_v59 }
 0x7f6   :  { %v6578_v28 = vpop.eup %6577  ;;  %v3502_v36 = vpop.xlane.xlu0 %3501 }
 0x7f7   :  { %3757 = vst [vmem:[%s10277_s9 + $0x80] sm:$0xff] %v3613_v22  ;;  %3805 = vst [vmem:[%s10278_s10 + $0x80] sm:$0xff] %v3613_v22  ;;  %v3614_v27 = vmul.f32 %v6578_v28, %v8746_v41  ;;  %6591 = vrcp.f32 %v3502_v36 }
 0x7f8   :  { %v6580_v43 = vpop.eup %6579  ;;  %v3504_v51 = vpop.xlane.xlu1 %3503 }
 0x7f9   :  { %3758 = vst [vmem:[%s10277_s9 + $0x88] sm:$0xff] %v3614_v27  ;;  %3806 = vst [vmem:[%s10278_s10 + $0x88] sm:$0xff] %v3614_v27  ;;  %v3619_v37 = vmul.f32 %v6580_v43, %v8750_v34  ;;  %6593 = vrcp.f32 %v3504_v51 }
 0x7fa   :  { %v6582_v62 = vpop.eup %6581  ;;  %v3510_v61 = vpop.xlane.xlu0 %3509 }
 0x7fb   :  { %3763 = vst [vmem:[%s10277_s9 + $0xb0] sm:$0xff] %v3619_v37  ;;  %3811 = vst [vmem:[%s10278_s10 + $0xb0] sm:$0xff] %v3619_v37  ;;  %v3620_v41 = vmul.f32 %v6582_v62, %v8753_v38  ;;  %6595 = vrcp.f32 %v3510_v61 }
 0x7fc   :  { %v6584_v42 = vpop.eup %6583 }
 0x7fd   :  { %3764 = vst [vmem:[%s10277_s9 + $0xb8] sm:$0xff] %v3620_v41  ;;  %3812 = vst [vmem:[%s10278_s10 + $0xb8] sm:$0xff] %v3620_v41  ;;  %v3617_v34 = vmul.f32 %v6584_v42, %v8758_v7 }
 0x7fe   :  { %v6586_v29 = vpop.eup %6585  ;;  %v3512_v14 = vpop.xlane.xlu1 %3511 }
 0x7ff   :  { %3761 = vst [vmem:[%s10277_s9 + $0xa0] sm:$0xff] %v3617_v34  ;;  %3809 = vst [vmem:[%s10278_s10 + $0xa0] sm:$0xff] %v3617_v34  ;;  %v3618_v38 = vmul.f32 %v6586_v29, %v8761_v24  ;;  %6597 = vrcp.f32 %v3512_v14  ;;  %v3514_v12 = vpop.xlane.xlu0 %3513 }
 0x800   :  { %v6588_v35 = vpop.eup %6587  ;;  %6599 = vrcp.f32 %v3514_v12 }
 0x801   :  { %3762 = vst [vmem:[%s10277_s9 + $0xa8] sm:$0xff] %v3618_v38  ;;  %3810 = vst [vmem:[%s10278_s10 + $0xa8] sm:$0xff] %v3618_v38  ;;  %v3623_v7 = vmul.f32 %v6588_v35, %v8765_v47 }
 0x802   :  { %v6590_v60 = vpop.eup %6589  ;;  %v3516_v20 = vpop.xlane.xlu1 %3515 }
 0x803   :  { %3767 = vst [vmem:[%s10277_s9 + $0xd0] sm:$0xff] %v3623_v7  ;;  %3815 = vst [vmem:[%s10278_s10 + $0xd0] sm:$0xff] %v3623_v7  ;;  %v3624_v24 = vmul.f32 %v6590_v60, %v8769_v58  ;;  %6601 = vrcp.f32 %v3516_v20  ;;  %v3518_v31 = vpop.xlane.xlu0 %3517 }
 0x804   :  { %v6592_v45 = vpop.eup %6591  ;;  %6603 = vrcp.f32 %v3518_v31 }
 0x805   :  { %3768 = vst [vmem:[%s10277_s9 + $0xd8] sm:$0xff] %v3624_v24  ;;  %3816 = vst [vmem:[%s10278_s10 + $0xd8] sm:$0xff] %v3624_v24  ;;  %v3621_v47 = vmul.f32 %v6592_v45, %v8772_v19 }
 0x806   :  { %v6594_v33 = vpop.eup %6593 }
 0x807   :  { %3765 = vst [vmem:[%s10277_s9 + $0xc0] sm:$0xff] %v3621_v47  ;;  %3813 = vst [vmem:[%s10278_s10 + $0xc0] sm:$0xff] %v3621_v47  ;;  %v3622_v58 = vmul.f32 %v6594_v33, %v8776_v52  ;;  %v3520_v48 = vpop.xlane.xlu1 %3519 }
 0x808   :  { %v6596_v57 = vpop.eup %6595  ;;  %6605 = vrcp.f32 %v3520_v48 }
 0x809   :  { %3766 = vst [vmem:[%s10277_s9 + $0xc8] sm:$0xff] %v3622_v58  ;;  %3814 = vst [vmem:[%s10278_s10 + $0xc8] sm:$0xff] %v3622_v58  ;;  %v3625_v19 = vmul.f32 %v6596_v57, %v8779_v39 }
 0x80b   :  { %3769 = vst [vmem:[%s10277_s9 + $0xe0] sm:$0xff] %v3625_v19  ;;  %3817 = vst [vmem:[%s10278_s10 + $0xe0] sm:$0xff] %v3625_v19  ;;  %v3522_v46 = vpop.xlane.xlu0 %3521 }
 0x80c   :  { %v6598_v52 = vpop.eup %6597  ;;  %6607 = vrcp.f32 %v3522_v46 }
 0x80d   :  { %v6600_v63 = vpop.eup %6599  ;;  %v3626_v17 = vmul.f32 %v6598_v52, %v8783_v40 }
 0x80e   :  { %v3627_v23 = vmul.f32 %v6600_v63, %v8785_v55 }
 0x80f   :  { %3770 = vst [vmem:[%s10277_s9 + $0xe8] sm:$0xff] %v3626_v17  ;;  %3818 = vst [vmem:[%s10278_s10 + $0xe8] sm:$0xff] %v3626_v17  ;;  %v3524_v40 = vpop.xlane.xlu1 %3523 }
 0x810   :  { %v6602_v39 = vpop.eup %6601  ;;  %3771 = vst [vmem:[%s10277_s9 + $0xf0] sm:$0xff] %v3627_v23  ;;  %3819 = vst [vmem:[%s10278_s10 + $0xf0] sm:$0xff] %v3627_v23  ;;  %6609 = vrcp.f32 %v3524_v40 }
 0x811   :  { %v3628_v55 = vmul.f32 %v6602_v39, %v8790_v3  ;;  %v6604_v5 = vpop.eup %6603 }
 0x812   :  { %v3629_v50 = vmul.f32 %v6604_v5, %v8794_v53 }
 0x813   :  { %3772 = vst [vmem:[%s10277_s9 + $0xf8] sm:$0xff] %v3628_v55  ;;  %3820 = vst [vmem:[%s10278_s10 + $0xf8] sm:$0xff] %v3628_v55  ;;  %v3526_v54 = vpop.xlane.xlu0 %3525 }
 0x814   :  { %3773 = vst [vmem:[%s10277_s9 + $0x100] sm:$0xff] %v3629_v50  ;;  %3821 = vst [vmem:[%s10278_s10 + $0x100] sm:$0xff] %v3629_v50  ;;  %6611 = vrcp.f32 %v3526_v54 }
 0x815   :  { %v6606_v3 = vpop.eup %6605 }
 0x816   :  { %v3630_v15 = vmul.f32 %v6606_v3, %v8798_v32 }
 0x817   :  { %v3528_v21 = vpop.xlane.xlu1 %3527 }
 0x818   :  { %3774 = vst [vmem:[%s10277_s9 + $0x108] sm:$0xff] %v3630_v15  ;;  %3822 = vst [vmem:[%s10278_s10 + $0x108] sm:$0xff] %v3630_v15  ;;  %6613 = vrcp.f32 %v3528_v21 }
 0x819   :  { %v6608_v53 = vpop.eup %6607 }
 0x81a   :  { %v3631_v56 = vmul.f32 %v6608_v53, %v8802_v8 }
 0x81b   :  { %v3530_v44 = vpop.xlane.xlu0 %3529 }
 0x81c   :  { %3775 = vst [vmem:[%s10277_s9 + $0x110] sm:$0xff] %v3631_v56  ;;  %3823 = vst [vmem:[%s10278_s10 + $0x110] sm:$0xff] %v3631_v56  ;;  %6615 = vrcp.f32 %v3530_v44 }
 0x81d   :  { %v6610_v32 = vpop.eup %6609 }
 0x81e   :  { %v3632_v9 = vmul.f32 %v6610_v32, %v8806_v18 }
 0x81f   :  { %v3532_v59 = vpop.xlane.xlu1 %3531 }
 0x820   :  { %3776 = vst [vmem:[%s10277_s9 + $0x118] sm:$0xff] %v3632_v9  ;;  %3824 = vst [vmem:[%s10278_s10 + $0x118] sm:$0xff] %v3632_v9  ;;  %6617 = vrcp.f32 %v3532_v59 }
 0x821   :  { %v6612_v8 = vpop.eup %6611 }
 0x822   :  { %v3633_v22 = vmul.f32 %v6612_v8, %v8810_v1 }
 0x823   :  { %v3534_v28 = vpop.xlane.xlu0 %3533 }
 0x824   :  { %3777 = vst [vmem:[%s10277_s9 + $0x120] sm:$0xff] %v3633_v22  ;;  %3825 = vst [vmem:[%s10278_s10 + $0x120] sm:$0xff] %v3633_v22  ;;  %6619 = vrcp.f32 %v3534_v28 }
 0x825   :  { %v6614_v18 = vpop.eup %6613 }
 0x826   :  { %v3634_v36 = vmul.f32 %v6614_v18, %v8814_v49 }
 0x827   :  { %v3536_v27 = vpop.xlane.xlu1 %3535 }
 0x828   :  { %3778 = vst [vmem:[%s10277_s9 + $0x128] sm:$0xff] %v3634_v36  ;;  %3826 = vst [vmem:[%s10278_s10 + $0x128] sm:$0xff] %v3634_v36  ;;  %6621 = vrcp.f32 %v3536_v27 }
 0x829   :  { %v6616_v1 = vpop.eup %6615 }
 0x82a   :  { %v3635_v43 = vmul.f32 %v6616_v1, %v8818_v2 }
 0x82b   :  { %v3538_v51 = vpop.xlane.xlu0 %3537 }
 0x82c   :  { %3779 = vst [vmem:[%s10277_s9 + $0x130] sm:$0xff] %v3635_v43  ;;  %3827 = vst [vmem:[%s10278_s10 + $0x130] sm:$0xff] %v3635_v43  ;;  %6623 = vrcp.f32 %v3538_v51 }
 0x82d   :  { %v6618_v49 = vpop.eup %6617 }
 0x82e   :  { %v3636_v37 = vmul.f32 %v6618_v49, %v8822_v26 }
 0x82f   :  { %v3540_v62 = vpop.xlane.xlu1 %3539 }
 0x830   :  { %3780 = vst [vmem:[%s10277_s9 + $0x138] sm:$0xff] %v3636_v37  ;;  %3828 = vst [vmem:[%s10278_s10 + $0x138] sm:$0xff] %v3636_v37  ;;  %6625 = vrcp.f32 %v3540_v62 }
 0x831   :  { %v6620_v2 = vpop.eup %6619 }
 0x832   :  { %v3637_v61 = vmul.f32 %v6620_v2, %v8826_v11 }
 0x833   :  { %v3542_v41 = vpop.xlane.xlu0 %3541 }
 0x834   :  { %3781 = vst [vmem:[%s10277_s9 + $0x140] sm:$0xff] %v3637_v61  ;;  %3829 = vst [vmem:[%s10278_s10 + $0x140] sm:$0xff] %v3637_v61  ;;  %6627 = vrcp.f32 %v3542_v41 }
 0x835   :  { %v6622_v26 = vpop.eup %6621 }
 0x836   :  { %v3638_v42 = vmul.f32 %v6622_v26, %v8830_v30 }
 0x837   :  { %v3544_v34 = vpop.xlane.xlu1 %3543 }
 0x838   :  { %3782 = vst [vmem:[%s10277_s9 + $0x148] sm:$0xff] %v3638_v42  ;;  %3830 = vst [vmem:[%s10278_s10 + $0x148] sm:$0xff] %v3638_v42  ;;  %6629 = vrcp.f32 %v3544_v34 }
 0x839   :  { %v6624_v11 = vpop.eup %6623 }
 0x83a   :  { %v3639_v29 = vmul.f32 %v6624_v11, %v8834_v13 }
 0x83b   :  { %v3546_v14 = vpop.xlane.xlu0 %3545 }
 0x83c   :  { %3783 = vst [vmem:[%s10277_s9 + $0x150] sm:$0xff] %v3639_v29  ;;  %3831 = vst [vmem:[%s10278_s10 + $0x150] sm:$0xff] %v3639_v29  ;;  %6631 = vrcp.f32 %v3546_v14 }
 0x83d   :  { %v6626_v30 = vpop.eup %6625 }
 0x83e   :  { %v3640_v38 = vmul.f32 %v6626_v30, %v8838_v0 }
 0x83f   :  { %v3548_v12 = vpop.xlane.xlu1 %3547 }
 0x840   :  { %3784 = vst [vmem:[%s10277_s9 + $0x158] sm:$0xff] %v3640_v38  ;;  %3832 = vst [vmem:[%s10278_s10 + $0x158] sm:$0xff] %v3640_v38  ;;  %6633 = vrcp.f32 %v3548_v12 }
 0x841   :  { %v6628_v13 = vpop.eup %6627 }
 0x842   :  { %v3641_v35 = vmul.f32 %v6628_v13, %v8841_v10 }
 0x844   :  { %3785 = vst [vmem:[%s10277_s9 + $0x160] sm:$0xff] %v3641_v35  ;;  %3833 = vst [vmem:[%s10278_s10 + $0x160] sm:$0xff] %v3641_v35 }
 0x845   :  { %v6630_v0 = vpop.eup %6629 }
 0x846   :  { %v3642_v7 = vmul.f32 %v6630_v0, %v8844_v16 }
 0x848   :  { %3786 = vst [vmem:[%s10277_s9 + $0x168] sm:$0xff] %v3642_v7  ;;  %3834 = vst [vmem:[%s10278_s10 + $0x168] sm:$0xff] %v3642_v7 }
 0x849   :  { %v6632_v10 = vpop.eup %6631 }
 0x84a   :  { %v3643_v60 = vmul.f32 %v6632_v10, %v8847_v25 }
 0x84c   :  { %3787 = vst [vmem:[%s10277_s9 + $0x170] sm:$0xff] %v3643_v60  ;;  %3835 = vst [vmem:[%s10278_s10 + $0x170] sm:$0xff] %v3643_v60 }
 0x84d   :  { %v6634_v16 = vpop.eup %6633 }
 0x84e   :  { %v3644_v20 = vmul.f32 %v6634_v16, %v8850_v4 }
 0x850   :  { %3788 = vst [vmem:[%s10277_s9 + $0x178] sm:$0xff] %v3644_v20  ;;  %3836 = vst [vmem:[%s10278_s10 + $0x178] sm:$0xff] %v3644_v20 }
 0x851 LB: > { %v3953_v25 = vld [vmem:[%s10278_s10 + $0x70] sm:$0xff]  ;;  %v3954_v4 = vld [vmem:[%s10278_s10 + $0x78] sm:$0xff]  ;;  %v3951_v24 = vld [vmem:[%s10278_s10 + $0x60] sm:$0xff]  ;;  %v7075_v45 = vmov 0   ;;  %s3842_s16 = sadd.s32 1, %s7072_s16   ;;  %s7072_s16 = sphi %s9189_s16, %s3842_s16  }
 0x852   : > { %4395 = vmatprep.subr.bf16.mxu0 %v7075_v45  ;;  %6257 = vmatprep.subr.bf16.mxu1 %v7075_v45  ;;  %v3994_v31 = vpack.c.bf16 %v3954_v4, %v3953_v25  ;;  %v3952_v47 = vld [vmem:[%s10278_s10 + $0x68] sm:$0xff]  ;;  %v3949_v58 = vld [vmem:[%s10278_s10 + $0x50] sm:$0xff]  ;;  %v3950_v57 = vld [vmem:[%s10278_s10 + $0x58] sm:$0xff]  ;;  %p3839_p0 = scmp.ge.s32.totalorder %s3842_s16, 3  }
 0x853   : > { %v3993_v33 = vpack.c.bf16 %v3952_v47, %v3951_v24  ;;  %v3992_v48 = vpack.c.bf16 %v3950_v57, %v3949_v58  ;;  %v3947_v19 = vld [vmem:[%s10278_s10 + $0x40] sm:$0xff]  ;;  %v3948_v52 = vld [vmem:[%s10278_s10 + $0x48] sm:$0xff]  ;;  %v3945_v63 = vld [vmem:[%s10278_s10 + $0x30] sm:$0xff] }
 0x854   : > { %4396 = vmatpush1.bf16.msra.mxu0 %v3994_v31  ;;  %6273 = vmatpush1.bf16.msra.mxu1 %v3994_v31  ;;  %v3991_v46 = vpack.c.bf16 %v3948_v52, %v3947_v19  ;;  %v6780_v17 = vld [vmem:[%s10267_s1 + $0x4] ss:$12 sps:$4 sm:$0xff]   ;;  %v3946_v23 = vld [vmem:[%s10278_s10 + $0x38] sm:$0xff]  ;;  %v6783_v39 = vld [vmem:[%s10267_s1 + $0x1b4] ss:$12 sps:$4 sm:$0xff]  }
 0x855   : > { %4397 = vmatprep.subr.bf16.mxu0 %v7075_v45  ;;  %6258 = vmatprep.subr.bf16.mxu1 %v7075_v45  ;;  %v3990_v40 = vpack.c.bf16 %v3946_v23, %v3945_v63  ;;  %v3943_v55 = vld [vmem:[%s10278_s10 + $0x20] sm:$0xff]  ;;  %v3944_v5 = vld [vmem:[%s10278_s10 + $0x28] sm:$0xff]  ;;  %v3941_v54 = vld [vmem:[%s10278_s10 + $0x10] sm:$0xff] }
 0x856   : > { %4427 = vmatprep.mubr.bf16.mxu0 %v6780_v17  ;;  %4571 = vmatprep.mubr.bf16.mxu1 %v6783_v39  ;;  %v3989_v50 = vpack.c.bf16 %v3944_v5, %v3943_v55  ;;  %v3942_v3 = vld [vmem:[%s10278_s10 + $0x18] sm:$0xff]  ;;  %v3939_v21 = vld [vmem:[%s10278_s10] sm:$0xff]  ;;  %v3940_v53 = vld [vmem:[%s10278_s10 + $0x8] sm:$0xff] }
 0x857   : > { %v3988_v15 = vpack.c.bf16 %v3942_v3, %v3941_v54  ;;  %v3987_v56 = vpack.c.bf16 %v3940_v53, %v3939_v21  ;;  %v3969_v44 = vld [vmem:[%s10278_s10 + $0xf0] sm:$0xff]  ;;  %v3970_v32 = vld [vmem:[%s10278_s10 + $0xf8] sm:$0xff]  ;;  %v3967_v59 = vld [vmem:[%s10278_s10 + $0xe0] sm:$0xff] }
 0x858   : > { %4398 = vmatpush1.bf16.msra.mxu0 %v3993_v33  ;;  %6274 = vmatpush1.bf16.msra.mxu1 %v3993_v33  ;;  %v4002_v9 = vpack.c.bf16 %v3970_v32, %v3969_v44  ;;  %v3968_v8 = vld [vmem:[%s10278_s10 + $0xe8] sm:$0xff]  ;;  %v3965_v28 = vld [vmem:[%s10278_s10 + $0xd0] sm:$0xff]  ;;  %v3966_v18 = vld [vmem:[%s10278_s10 + $0xd8] sm:$0xff] }
 0x859   : > { %4399 = vmatprep.subr.bf16.mxu0 %v7075_v45  ;;  %6259 = vmatprep.subr.bf16.mxu1 %v7075_v45  ;;  %v4001_v22 = vpack.c.bf16 %v3968_v8, %v3967_v59  ;;  %v4000_v36 = vpack.c.bf16 %v3966_v18, %v3965_v28  ;;  %v3963_v27 = vld [vmem:[%s10278_s10 + $0xc0] sm:$0xff]  ;;  %v3964_v1 = vld [vmem:[%s10278_s10 + $0xc8] sm:$0xff]  ;;  %v3961_v51 = vld [vmem:[%s10278_s10 + $0xb0] sm:$0xff] }
 0x85a   : > { %v3999_v43 = vpack.c.bf16 %v3964_v1, %v3963_v27  ;;  %v3962_v49 = vld [vmem:[%s10278_s10 + $0xb8] sm:$0xff]  ;;  %v3959_v62 = vld [vmem:[%s10278_s10 + $0xa0] sm:$0xff]  ;;  %v3960_v2 = vld [vmem:[%s10278_s10 + $0xa8] sm:$0xff] }
 0x85b   : > { %v3998_v37 = vpack.c.bf16 %v3962_v49, %v3961_v51  ;;  %v3997_v61 = vpack.c.bf16 %v3960_v2, %v3959_v62  ;;  %v3957_v41 = vld [vmem:[%s10278_s10 + $0x90] sm:$0xff]  ;;  %v3958_v26 = vld [vmem:[%s10278_s10 + $0x98] sm:$0xff]  ;;  %v3955_v34 = vld [vmem:[%s10278_s10 + $0x80] sm:$0xff] }
 0x85c   : > { %4400 = vmatpush1.bf16.msra.mxu0 %v3992_v48  ;;  %6275 = vmatpush1.bf16.msra.mxu1 %v3992_v48  ;;  %v3996_v42 = vpack.c.bf16 %v3958_v26, %v3957_v41  ;;  %v3956_v11 = vld [vmem:[%s10278_s10 + $0x88] sm:$0xff]  ;;  %v3985_v29 = vld [vmem:[%s10278_s10 + $0x170] sm:$0xff]  ;;  %v3986_v14 = vld [vmem:[%s10278_s10 + $0x178] sm:$0xff] }
 0x85d   : > { %4401 = vmatprep.subr.bf16.mxu0 %v7075_v45  ;;  %6260 = vmatprep.subr.bf16.mxu1 %v7075_v45  ;;  %v3995_v30 = vpack.c.bf16 %v3956_v11, %v3955_v34  ;;  %v6778_v38 = vld [vmem:[%s10267_s1] ss:$12 sps:$4 sm:$0xff]   ;;  %v6781_v12 = vld [vmem:[%s10267_s1 + $0x1b0] ss:$12 sps:$4 sm:$0xff]   ;;  %v4010_v13 = vpack.c.bf16 %v3986_v14, %v3985_v29  ;;  %v6788_v25 = vld [vmem:[%s10267_s1 + $0x18] ss:$12 sps:$4 sm:$0xff]  }
 0x85e   : > { %v3983_v35 = vld [vmem:[%s10278_s10 + $0x160] sm:$0xff]  ;;  %v3984_v0 = vld [vmem:[%s10278_s10 + $0x168] sm:$0xff]  ;;  %v3981_v16 = vld [vmem:[%s10278_s10 + $0x150] sm:$0xff] }
 0x85f   : > { %v6784_v7 = vld [vmem:[%s10267_s1 + $0x1c] ss:$12 sps:$4 sm:$0xff]   ;;  %v6786_v10 = vld [vmem:[%s10267_s1 + $0x1cc] ss:$12 sps:$4 sm:$0xff]   ;;  %v4009_v60 = vpack.c.bf16 %v3984_v0, %v3983_v35  ;;  %v3979_v31 = vld [vmem:[%s10278_s10 + $0x140] sm:$0xff] }
 0x860   : > { %4402 = vmatpush1.bf16.msra.mxu0 %v3991_v46  ;;  %6276 = vmatpush1.bf16.msra.mxu1 %v3991_v46  ;;  %v3982_v20 = vld [vmem:[%s10278_s10 + $0x158] sm:$0xff]  ;;  %v6789_v4 = vld [vmem:[%s10267_s1 + $0x1c8] ss:$12 sps:$4 sm:$0xff]   ;;  %v6792_v33 = vld [vmem:[%s10267_s1 + $0x1e4] ss:$12 sps:$4 sm:$0xff]  }
 0x861   : > { %4403 = vmatprep.subr.bf16.mxu0 %v7075_v45  ;;  %6261 = vmatprep.subr.bf16.mxu1 %v7075_v45  ;;  %v4008_v24 = vpack.c.bf16 %v3982_v20, %v3981_v16  ;;  %v3980_v47 = vld [vmem:[%s10278_s10 + $0x148] sm:$0xff]  ;;  %v3977_v57 = vld [vmem:[%s10278_s10 + $0x130] sm:$0xff]  ;;  %v3978_v48 = vld [vmem:[%s10278_s10 + $0x138] sm:$0xff] }
 0x862   : > { %v4007_v58 = vpack.c.bf16 %v3980_v47, %v3979_v31  ;;  %v6794_v19 = vld [vmem:[%s10267_s1 + $0x30] ss:$12 sps:$4 sm:$0xff]   ;;  %v4006_v52 = vpack.c.bf16 %v3978_v48, %v3977_v57  ;;  %v6795_v46 = vld [vmem:[%s10267_s1 + $0x1e0] ss:$12 sps:$4 sm:$0xff]   ;;  %v6801_v3 = vld [vmem:[%s10267_s1 + $0x1f8] ss:$12 sps:$4 sm:$0xff]  }
 0x863   : > { %v3975_v63 = vld [vmem:[%s10278_s10 + $0x120] sm:$0xff]  ;;  %v3976_v17 = vld [vmem:[%s10278_s10 + $0x128] sm:$0xff]  ;;  %v3973_v55 = vld [vmem:[%s10278_s10 + $0x110] sm:$0xff] }
 0x864   : > { %4404 = vmatpush1.bf16.msra.mxu0 %v3990_v40  ;;  %6277 = vmatpush1.bf16.msra.mxu1 %v3990_v40  ;;  %v6796_v23 = vld [vmem:[%s10267_s1 + $0x4c] ss:$12 sps:$4 sm:$0xff]   ;;  %v6798_v39 = vld [vmem:[%s10267_s1 + $0x1fc] ss:$12 sps:$4 sm:$0xff]   ;;  %v4005_v40 = vpack.c.bf16 %v3976_v17, %v3975_v63  ;;  %v6802_v53 = vld [vmem:[%s10267_s1 + $0x64] ss:$12 sps:$4 sm:$0xff]  }
 0x865   : > { %4405 = vmatprep.subr.bf16.mxu0 %v7075_v45  ;;  %6262 = vmatprep.subr.bf16.mxu1 %v7075_v45  ;;  %v3974_v5 = vld [vmem:[%s10278_s10 + $0x118] sm:$0xff]  ;;  %v3972_v21 = vld [vmem:[%s10278_s10 + $0x108] sm:$0xff]  ;;  %v6814_v18 = vld [vmem:[%s10267_s1 + $0x94] ss:$12 sps:$4 sm:$0xff]  }
 0x866   : > { %v4004_v54 = vpack.c.bf16 %v3974_v5, %v3973_v55  ;;  %v6806_v32 = vld [vmem:[%s10267_s1 + $0x60] ss:$12 sps:$4 sm:$0xff]   ;;  %v6808_v59 = vld [vmem:[%s10267_s1 + $0x7c] ss:$12 sps:$4 sm:$0xff]   ;;  %v6821_v51 = vld [vmem:[%s10267_s1 + $0x38] ss:$12 sps:$4 sm:$0xff]  }
 0x867   : > { %v6810_v8 = vld [vmem:[%s10267_s1 + $0x22c] ss:$12 sps:$4 sm:$0xff]   ;;  %v6813_v28 = vld [vmem:[%s10267_s1 + $0x228] ss:$12 sps:$4 sm:$0xff]   ;;  %v6817_v27 = vld [vmem:[%s10267_s1 + $0x90] ss:$12 sps:$4 sm:$0xff]  }
 0x868   : > { %4406 = vmatpush1.bf16.msra.mxu0 %v3989_v50  ;;  %6278 = vmatpush1.bf16.msra.mxu1 %v3989_v50  ;;  %v6800_v50 = vld [vmem:[%s10267_s1 + $0x48] ss:$12 sps:$4 sm:$0xff]   ;;  %v6818_v1 = vld [vmem:[%s10267_s1 + $0x20] ss:$12 sps:$4 sm:$0xff]   ;;  %v6824_v62 = vld [vmem:[%s10267_s1 + $0xc4] ss:$12 sps:$4 sm:$0xff]  }
 0x869   : > { %4407 = vmatprep.subr.bf16.mxu0 %v7075_v45  ;;  %6263 = vmatprep.subr.bf16.mxu1 %v7075_v45  ;;  %v6822_v49 = vld [vmem:[%s10267_s1 + $0xa8] ss:$12 sps:$4 sm:$0xff]   ;;  %v6828_v41 = vld [vmem:[%s10267_s1 + $0x80] ss:$12 sps:$4 sm:$0xff]   ;;  %v6832_v34 = vld [vmem:[%s10267_s1 + $0xd8] ss:$12 sps:$4 sm:$0xff]  }
 0x86a   : > { %v6826_v2 = vld [vmem:[%s10267_s1 + $0x68] ss:$12 sps:$4 sm:$0xff]   ;;  %v6833_v11 = vld [vmem:[%s10267_s1 + $0xb0] ss:$12 sps:$4 sm:$0xff]   ;;  %v6848_v16 = vld [vmem:[%s10267_s1 + $0x140] ss:$12 sps:$4 sm:$0xff]  }
 0x86b   : > { %v6829_v26 = vld [vmem:[%s10267_s1 + $0xdc] ss:$12 sps:$4 sm:$0xff]   ;;  %v6834_v29 = vld [vmem:[%s10267_s1 + $0xf4] ss:$12 sps:$4 sm:$0xff]   ;;  %v6861_v57 = vld [vmem:[%s10267_s1 + $0x1b8] ss:$12 sps:$4 sm:$0xff]  }
 0x86c   : > { %4408 = vmatpush1.bf16.msra.mxu0 %v3988_v15  ;;  %6279 = vmatpush1.bf16.msra.mxu1 %v3988_v15  ;;  %v3971_v15 = vld [vmem:[%s10278_s10 + $0x100] sm:$0xff]  ;;  %v6836_v14 = vld [vmem:[%s10267_s1 + $0xc8] ss:$12 sps:$4 sm:$0xff]   ;;  %v6843_v0 = vld [vmem:[%s10267_s1 + $0x110] ss:$12 sps:$4 sm:$0xff]  }
 0x86d   : > { %4409 = vmatprep.subr.bf16.mxu0 %v7075_v45  ;;  %6264 = vmatprep.subr.bf16.mxu1 %v7075_v45  ;;  %v4003_v44 = vpack.c.bf16 %v3972_v21, %v3971_v15  ;;  %v6842_v35 = vld [vmem:[%s10267_s1 + $0x108] ss:$12 sps:$4 sm:$0xff]   ;;  %v6857_v47 = vld [vmem:[%s10267_s1 + $0x150] ss:$12 sps:$4 sm:$0xff]   ;;  %v6867_v63 = vld [vmem:[%s10267_s1 + $0x180] ss:$12 sps:$4 sm:$0xff]  }
 0x86e   : > { %v6849_v20 = vld [vmem:[%s10267_s1 + $0x13c] ss:$12 sps:$4 sm:$0xff]   ;;  %v6868_v17 = vld [vmem:[%s10267_s1 + $0x200] ss:$12 sps:$4 sm:$0xff]  }
 0x86f   : > { %v6856_v31 = vld [vmem:[%s10267_s1 + $0x188] ss:$12 sps:$4 sm:$0xff]   ;;  %v6873_v55 = vld [vmem:[%s10267_s1 + $0x230] ss:$12 sps:$4 sm:$0xff]  }
 0x870   : > { %4410 = vmatpush1.bf16.msra.mxu0 %v3987_v56  ;;  %6280 = vmatpush1.bf16.msra.mxu1 %v3987_v56  ;;  %v6804_v56 = vld [vmem:[%s10267_s1 + $0x214] ss:$12 sps:$4 sm:$0xff]  }
 0x871   : > { %4411 = vmatprep.subr.bf16.mxu0 %v7075_v45  ;;  %6265 = vmatprep.subr.bf16.mxu1 %v7075_v45  ;;  %v6862_v48 = vld [vmem:[%s10267_s1 + $0x168] ss:$12 sps:$4 sm:$0xff]  }
 0x874   : > { %4412 = vmatpush2.bf16.msra.mxu0 %v4002_v9  ;;  %6281 = vmatpush2.bf16.msra.mxu1 %v4002_v9  ;;  %v6807_v9 = vld [vmem:[%s10267_s1 + $0x210] ss:$12 sps:$4 sm:$0xff]  }
 0x875   : > { %4413 = vmatprep.subr.bf16.mxu0 %v7075_v45  ;;  %6266 = vmatprep.subr.bf16.mxu1 %v7075_v45 }
 0x878   : > { %4414 = vmatpush2.bf16.msra.mxu0 %v4001_v22  ;;  %6282 = vmatpush2.bf16.msra.mxu1 %v4001_v22  ;;  %v6812_v22 = vld [vmem:[%s10267_s1 + $0x78] ss:$12 sps:$4 sm:$0xff]  }
 0x879   : > { %4415 = vmatprep.subr.bf16.mxu0 %v7075_v45  ;;  %6267 = vmatprep.subr.bf16.mxu1 %v7075_v45 }
 0x87c   : > { %4416 = vmatpush2.bf16.msra.mxu0 %v4000_v36  ;;  %6283 = vmatpush2.bf16.msra.mxu1 %v4000_v36  ;;  %v6816_v36 = vld [vmem:[%s10267_s1 + $0x8] ss:$12 sps:$4 sm:$0xff]  }
 0x87d   : > { %4417 = vmatprep.subr.bf16.mxu0 %v7075_v45  ;;  %6268 = vmatprep.subr.bf16.mxu1 %v7075_v45 }
 0x880   : > { %4418 = vmatpush2.bf16.msra.mxu0 %v3999_v43  ;;  %6284 = vmatpush2.bf16.msra.mxu1 %v3999_v43  ;;  %v6819_v43 = vld [vmem:[%s10267_s1 + $0xac] ss:$12 sps:$4 sm:$0xff]  }
 0x881   : > { %4419 = vmatprep.subr.bf16.mxu0 %v7075_v45  ;;  %6269 = vmatprep.subr.bf16.mxu1 %v7075_v45 }
 0x884   : > { %4420 = vmatpush2.bf16.msra.mxu0 %v3998_v37  ;;  %6285 = vmatpush2.bf16.msra.mxu1 %v3998_v37  ;;  %v6823_v37 = vld [vmem:[%s10267_s1 + $0x50] ss:$12 sps:$4 sm:$0xff]  }
 0x885   : > { %4421 = vmatprep.subr.bf16.mxu0 %v7075_v45  ;;  %6270 = vmatprep.subr.bf16.mxu1 %v7075_v45 }
 0x888   : > { %4422 = vmatpush2.bf16.msra.mxu0 %v3997_v61  ;;  %6286 = vmatpush2.bf16.msra.mxu1 %v3997_v61  ;;  %v6827_v61 = vld [vmem:[%s10267_s1 + $0xc0] ss:$12 sps:$4 sm:$0xff]  }
 0x889   : > { %4423 = vmatprep.subr.bf16.mxu0 %v7075_v45  ;;  %6271 = vmatprep.subr.bf16.mxu1 %v7075_v45 }
 0x88c   : > { %4424 = vmatpush2.bf16.msra.mxu0 %v3996_v42  ;;  %6287 = vmatpush2.bf16.msra.mxu1 %v3996_v42  ;;  %v6831_v42 = vld [vmem:[%s10267_s1 + $0x98] ss:$12 sps:$4 sm:$0xff]  }
 0x88d   : > { %4425 = vmatprep.subr.bf16.mxu0 %v7075_v45  ;;  %6272 = vmatprep.subr.bf16.mxu1 %v7075_v45  ;;  %v6790_v45 = vld [vmem:[%s10267_s1 + $0x34] ss:$12 sps:$4 sm:$0xff]  }
 0x890   : > { %4426 = vmatpush2.bf16.msra.mxu0 %v3995_v30  ;;  %6288 = vmatpush2.bf16.msra.mxu1 %v3995_v30  ;;  %v6837_v30 = vld [vmem:[%s10267_s1 + $0xf0] ss:$12 sps:$4 sm:$0xff]  }
 0x891   : > { %6193 = vmatprep.subr.bf16.mxu1 %v4010_v13 }
 0x893   : > { %4428 = vmatmul.mubr.bf16.vlgmr.msra.gmra.mxu0 %v6778_v38  ;;  %4572 = vmatmul.mubr.bf16.vlgmr.msra.gmra.mxu1 %v6781_v12  ;;  %v6838_v38 = vld [vmem:[%s10267_s1 + $0xe0] ss:$12 sps:$4 sm:$0xff]  }
 0x894   : > { %6194 = vmatpush3.bf16.msra.mxu1 %v4010_v13  ;;  %4435 = vmatprep.mubr.bf16.mxu0 %v6784_v7  ;;  %v6839_v12 = vld [vmem:[%s10267_s1 + $0x10c] ss:$12 sps:$4 sm:$0xff]   ;;  %v6844_v7 = vld [vmem:[%s10267_s1 + $0x124] ss:$12 sps:$4 sm:$0xff]  }
 0x895   : > { %4579 = vmatprep.mubr.bf16.mxu1 %v6786_v10  ;;  %6195 = vmatprep.subr.bf16.mxu1 %v4009_v60  ;;  %v6841_v13 = vld [vmem:[%s10267_s1 + $0xf8] ss:$12 sps:$4 sm:$0xff]   ;;  %v6846_v10 = vld [vmem:[%s10267_s1 + $0x128] ss:$12 sps:$4 sm:$0xff]  }
 0x898   : > { %6196 = vmatpush3.bf16.msra.mxu1 %v4009_v60  ;;  %v6847_v60 = vld [vmem:[%s10267_s1 + $0x120] ss:$12 sps:$4 sm:$0xff]  }
 0x899   : > { %6197 = vmatprep.subr.bf16.mxu1 %v4008_v24 }
 0x89b   : > { %4436 = vmatmul.mubr.bf16.gmra.mxu0 %v6788_v25  ;;  %4580 = vmatmul.mubr.bf16.gmra.mxu1 %v6789_v4  ;;  %v6851_v25 = vld [vmem:[%s10267_s1 + $0x158] ss:$12 sps:$4 sm:$0xff]  }
 0x89c   : > { %4443 = vmatprep.mubr.bf16.mxu0 %v6790_v45  ;;  %4587 = vmatprep.mubr.bf16.mxu1 %v6792_v33  ;;  %v6852_v4 = vld [vmem:[%s10267_s1 + $0x138] ss:$12 sps:$4 sm:$0xff]   ;;  %v6854_v45 = vld [vmem:[%s10267_s1 + $0x154] ss:$12 sps:$4 sm:$0xff]  }
 0x89d   : > { %6198 = vmatpush3.bf16.msra.mxu1 %v4008_v24  ;;  %v6853_v24 = vld [vmem:[%s10267_s1 + $0x170] ss:$12 sps:$4 sm:$0xff]   ;;  %v6858_v33 = vld [vmem:[%s10267_s1 + $0x1a0] ss:$12 sps:$4 sm:$0xff]  }
 0x89e   : > { %6199 = vmatprep.subr.bf16.mxu1 %v4007_v58 }
 0x8a1   : > { %6200 = vmatpush3.bf16.msra.mxu1 %v4007_v58  ;;  %v6859_v58 = vld [vmem:[%s10267_s1 + $0x16c] ss:$12 sps:$4 sm:$0xff]  }
 0x8a2   : > { %6201 = vmatprep.subr.bf16.mxu1 %v4006_v52 }
 0x8a3   : > { %4444 = vmatmul.mubr.bf16.gmra.mxu0 %v6794_v19  ;;  %4588 = vmatmul.mubr.bf16.gmra.mxu1 %v6795_v46  ;;  %v6863_v19 = vld [vmem:[%s10267_s1 + $0x1d0] ss:$12 sps:$4 sm:$0xff]   ;;  %v6866_v46 = vld [vmem:[%s10267_s1 + $0x1e8] ss:$12 sps:$4 sm:$0xff]  }
 0x8a4   : > { %4451 = vmatprep.mubr.bf16.mxu0 %v6796_v23  ;;  %4595 = vmatprep.mubr.bf16.mxu1 %v6798_v39  ;;  %v6869_v23 = vld [vmem:[%s10267_s1 + $0x19c] ss:$12 sps:$4 sm:$0xff]   ;;  %v6871_v39 = vld [vmem:[%s10267_s1 + $0x218] ss:$12 sps:$4 sm:$0xff]  }
 0x8a5   : > { %6202 = vmatpush3.bf16.msra.mxu1 %v4006_v52  ;;  %v6864_v52 = vld [vmem:[%s10267_s1 + $0x184] ss:$12 sps:$4 sm:$0xff]  }
 0x8a6   : > { %6203 = vmatprep.subr.bf16.mxu1 %v4005_v40 }
 0x8a9   : > { %6204 = vmatpush3.bf16.msra.mxu1 %v4005_v40  ;;  %v6872_v40 = vld [vmem:[%s10267_s1 + $0x198] ss:$12 sps:$4 sm:$0xff]  }
 0x8aa   : > { %6205 = vmatprep.subr.bf16.mxu1 %v4004_v54 }
 0x8ab   : > { %4452 = vmatmul.mubr.bf16.gmra.mxu0 %v6800_v50  ;;  %4596 = vmatmul.mubr.bf16.gmra.mxu1 %v6801_v3 }
 0x8ac   : > { %4459 = vmatprep.mubr.bf16.mxu0 %v6802_v53  ;;  %4603 = vmatprep.mubr.bf16.mxu1 %v6804_v56 }
 0x8ad   : > { %6206 = vmatpush3.bf16.msra.mxu1 %v4004_v54 }
 0x8ae   : > { %6207 = vmatprep.subr.bf16.mxu1 %v4003_v44 }
 0x8b1   : > { %6208 = vmatpush3.bf16.msra.mxu1 %v4003_v44 }
 0x8b3   : > { %4460 = vmatmul.mubr.bf16.gmra.mxu0 %v6806_v32  ;;  %4604 = vmatmul.mubr.bf16.gmra.mxu1 %v6807_v9 }
 0x8b4   : > { %4467 = vmatprep.mubr.bf16.mxu0 %v6808_v59  ;;  %4611 = vmatprep.mubr.bf16.mxu1 %v6810_v8 }
 0x8bb   : > { %4468 = vmatmul.mubr.bf16.gmra.mxu0 %v6812_v22  ;;  %4612 = vmatmul.mubr.bf16.gmra.mxu1 %v6813_v28 }
 0x8bc   : > { %4475 = vmatprep.mubr.bf16.mxu0 %v6814_v18  ;;  %6209 = vmatprep.mubr.bf16.mxu1 %v6816_v36 }
 0x8c3   : > { %4476 = vmatmul.mubr.bf16.gmra.mxu0 %v6817_v27  ;;  %6210 = vmatmul.mubr.bf16.vlgmr.msra.gmra.mxu1 %v6818_v1 }
 0x8c4   : > { %4483 = vmatprep.mubr.bf16.mxu0 %v6819_v43  ;;  %6213 = vmatprep.mubr.bf16.mxu1 %v6821_v51 }
 0x8cb   : > { %4484 = vmatmul.mubr.bf16.gmra.mxu0 %v6822_v49  ;;  %6214 = vmatmul.mubr.bf16.gmra.mxu1 %v6823_v37 }
 0x8cc   : > { %4491 = vmatprep.mubr.bf16.mxu0 %v6824_v62  ;;  %6217 = vmatprep.mubr.bf16.mxu1 %v6826_v2 }
 0x8d3   : > { %4492 = vmatmul.mubr.bf16.gmra.mxu0 %v6827_v61  ;;  %6218 = vmatmul.mubr.bf16.gmra.mxu1 %v6828_v41 }
 0x8d4   : > { %4499 = vmatprep.mubr.bf16.mxu0 %v6829_v26  ;;  %6221 = vmatprep.mubr.bf16.mxu1 %v6831_v42 }
 0x8db   : > { %4500 = vmatmul.mubr.bf16.gmra.mxu0 %v6832_v34  ;;  %6222 = vmatmul.mubr.bf16.gmra.mxu1 %v6833_v11 }
 0x8dc   : > { %4507 = vmatprep.mubr.bf16.mxu0 %v6834_v29  ;;  %6225 = vmatprep.mubr.bf16.mxu1 %v6836_v14 }
 0x8e3   : > { %4508 = vmatmul.mubr.bf16.gmra.mxu0 %v6837_v30  ;;  %6226 = vmatmul.mubr.bf16.gmra.mxu1 %v6838_v38 }
 0x8e4   : > { %4515 = vmatprep.mubr.bf16.mxu0 %v6839_v12  ;;  %6229 = vmatprep.mubr.bf16.mxu1 %v6841_v13 }
 0x8eb   : > { %4516 = vmatmul.mubr.bf16.gmra.mxu0 %v6842_v35  ;;  %6230 = vmatmul.mubr.bf16.gmra.mxu1 %v6843_v0 }
 0x8ec   : > { %4523 = vmatprep.mubr.bf16.mxu0 %v6844_v7  ;;  %6233 = vmatprep.mubr.bf16.mxu1 %v6846_v10 }
 0x8f3   : > { %4524 = vmatmul.mubr.bf16.gmra.mxu0 %v6847_v60  ;;  %6234 = vmatmul.mubr.bf16.gmra.mxu1 %v6848_v16 }
 0x8f4   : > { %4531 = vmatprep.mubr.bf16.mxu0 %v6849_v20  ;;  %6237 = vmatprep.mubr.bf16.mxu1 %v6851_v25 }
 0x8fb   : > { %4532 = vmatmul.mubr.bf16.gmra.mxu0 %v6852_v4  ;;  %6238 = vmatmul.mubr.bf16.gmra.mxu1 %v6853_v24 }
 0x8fc   : > { %4539 = vmatprep.mubr.bf16.mxu0 %v6854_v45  ;;  %6241 = vmatprep.mubr.bf16.mxu1 %v6856_v31 }
 0x903   : > { %4540 = vmatmul.mubr.bf16.gmra.mxu0 %v6857_v47  ;;  %6242 = vmatmul.mubr.bf16.gmra.mxu1 %v6858_v33 }
 0x904   : > { %4547 = vmatprep.mubr.bf16.mxu0 %v6859_v58  ;;  %6245 = vmatprep.mubr.bf16.mxu1 %v6861_v57 }
 0x90b   : > { %4548 = vmatmul.mubr.bf16.gmra.mxu0 %v6862_v48  ;;  %6246 = vmatmul.mubr.bf16.gmra.mxu1 %v6863_v19 }
 0x90c   : > { %4555 = vmatprep.mubr.bf16.mxu0 %v6864_v52  ;;  %6249 = vmatprep.mubr.bf16.mxu1 %v6866_v46 }
 0x913   : > { %4556 = vmatmul.mubr.bf16.gmra.mxu0 %v6867_v63  ;;  %6250 = vmatmul.mubr.bf16.gmra.mxu1 %v6868_v17 }
 0x914   : > { %4563 = vmatprep.mubr.bf16.mxu0 %v6869_v23  ;;  %6253 = vmatprep.mubr.bf16.mxu1 %v6871_v39 }
 0x91b   : > { %4564 = vmatmul.mubr.bf16.gmra.mxu0 %v6872_v40  ;;  %6254 = vmatmul.mubr.bf16.gmra.mxu1 %v6873_v55 }
 0x953   : > { %v4429_v5 = vpop.f32.mrf.mxu0  ;;  %v9586_v50 = vpop.f32.mrf.mxu1 }
 0x955   : > { %v4431_v54 = vpop.f32.mrf.mxu0  ;;  %v4575_v3 = vpop.f32.mrf.mxu1 }
 0x957   : > { %v4432_v15 = vpop.f32.mrf.mxu0  ;;  %v9588_v21 = vpop.f32.mrf.mxu1 }
 0x959   : > { %v4434_v53 = vpop.f32.mrf.mxu0  ;;  %v4578_v56 = vpop.f32.mrf.mxu1 }
 0x95b   : > { %v4437_v44 = vpop.f32.mrf.mxu0  ;;  %v9590_v32 = vpop.f32.mrf.mxu1 }
 0x95d   : > { %v4439_v9 = vpop.f32.mrf.mxu0  ;;  %v4583_v59 = vpop.f32.mrf.mxu1 }
 0x95f   : > { %v4440_v8 = vpop.f32.mrf.mxu0  ;;  %v9592_v22 = vpop.f32.mrf.mxu1 }
 0x961   : > { %v4442_v28 = vpop.f32.mrf.mxu0  ;;  %v4586_v18 = vpop.f32.mrf.mxu1 }
 0x963   : > { %v4445_v36 = vpop.f32.mrf.mxu0  ;;  %v9594_v27 = vpop.f32.mrf.mxu1 }
 0x965   : > { %v4447_v1 = vpop.f32.mrf.mxu0  ;;  %v4591_v43 = vpop.f32.mrf.mxu1 }
 0x967   : > { %v4448_v51 = vpop.f32.mrf.mxu0  ;;  %v9596_v49 = vpop.f32.mrf.mxu1 }
 0x969   : > { %v4450_v37 = vpop.f32.mrf.mxu0  ;;  %v4594_v62 = vpop.f32.mrf.mxu1 }
 0x96b   : > { %v4453_v2 = vpop.f32.mrf.mxu0  ;;  %v9598_v61 = vpop.f32.mrf.mxu1 }
 0x96d   : > { %v4455_v41 = vpop.f32.mrf.mxu0  ;;  %v4599_v26 = vpop.f32.mrf.mxu1 }
 0x96f   : > { %v4456_v42 = vpop.f32.mrf.mxu0  ;;  %v9600_v34 = vpop.f32.mrf.mxu1 }
 0x971   : > { %v4458_v11 = vpop.f32.mrf.mxu0  ;;  %v4602_v29 = vpop.f32.mrf.mxu1 }
 0x973   : > { %v9602_v14 = vpop.f32.mrf.mxu0  ;;  %v9604_v30 = vpop.f32.mrf.mxu1 }
 0x975   : > { %v4463_v38 = vpop.f32.mrf.mxu0  ;;  %v4607_v12 = vpop.f32.mrf.mxu1 }
 0x977   : > { %v9606_v13 = vpop.f32.mrf.mxu0  ;;  %v9608_v35 = vpop.f32.mrf.mxu1 }
 0x979   : > { %v4466_v0 = vpop.f32.mrf.mxu0  ;;  %v4610_v7 = vpop.f32.mrf.mxu1 }
 0x97b   : > { %v4469_v10 = vpop.f32.mrf.mxu0  ;;  %v9610_v60 = vpop.f32.mrf.mxu1 }
 0x97d   : > { %v4471_v16 = vpop.f32.mrf.mxu0  ;;  %v4615_v20 = vpop.f32.mrf.mxu1 }
 0x97f   : > { %v4472_v25 = vpop.f32.mrf.mxu0  ;;  %v9612_v4 = vpop.f32.mrf.mxu1 }
 0x981   : > { %v4474_v24 = vpop.f32.mrf.mxu0  ;;  %v4618_v45 = vpop.f32.mrf.mxu1 }
 0x983   : > { %v9614_v31 = vpop.f32.mrf.mxu0  ;;  %v6211_v47 = vpop.f32.mrf.mxu1 }
 0x984   : > { %v4663_v33 = vadd.f32 %v6211_v47, %v4437_v44 }
 0x985   : > { %v4479_v58 = vpop.f32.mrf.mxu0  ;;  %v4654_v57 = vpop.f32.mrf.mxu1 }
 0x986   : > { %v4655_v48 = vadd.f32 %v4654_v57, %v4429_v5  ;;  %v9618_v19 = vsel %vm3164_vm0, %v4663_v33, -1e+30 }
 0x987   : > { %v6212_v52 = vpop.f32.mrf.mxu1  ;;  %4897 = vmax.xlane.f32.xlu1 %v9618_v19  ;;  %v9621_v46 = vpop.f32.mrf.mxu0 }
 0x988   : > { %v4666_v63 = vadd.f32 %v6212_v52, %v4440_v8  ;;  %v9625_v17 = vsel %vm3164_vm0, %v4655_v48, -1e+30 }
 0x989   : > { %v4657_v23 = vpop.f32.mrf.mxu1  ;;  %4893 = vmax.xlane.f32.xlu0 %v9625_v17  ;;  %v4482_v39 = vpop.f32.mrf.mxu0 }
 0x98a   : > { %v4658_v40 = vadd.f32 %v4657_v23, %v4432_v15  ;;  %v9630_v55 = vsel %vm3164_vm0, %v4666_v63, -1e+30 }
 0x98b   : > { %v6215_v5 = vpop.f32.mrf.mxu1  ;;  %4899 = vmax.xlane.f32.xlu1 %v9630_v55  ;;  %v4485_v54 = vpop.f32.mrf.mxu0 }
 0x98c   : > { %v4679_v3 = vadd.f32 %v6215_v5, %v4453_v2  ;;  %v9635_v53 = vsel %vm3164_vm0, %v4658_v40, -1e+30 }
 0x98d   : > { %v4670_v56 = vpop.f32.mrf.mxu1  ;;  %4895 = vmax.xlane.f32.xlu0 %v9635_v53  ;;  %v4487_v44 = vpop.f32.mrf.mxu0 }
 0x98e   : > { %v4671_v15 = vadd.f32 %v4670_v56, %v4445_v36  ;;  %v9640_v28 = vsel %vm3164_vm0, %v4679_v3, -1e+30 }
 0x98f   : > { %v4488_v9 = vpop.f32.mrf.mxu0  ;;  %v6216_v59 = vpop.f32.mrf.mxu1 }
 0x990   : > { %v4682_v8 = vadd.f32 %v6216_v59, %v4456_v42  ;;  %v9650_v36 = vsel %vm3164_vm0, %v4671_v15, -1e+30 }
 0x991   : > { %v4673_v18 = vpop.f32.mrf.mxu1  ;;  %4905 = vmax.xlane.f32.xlu0 %v9640_v28  ;;  %v4490_v1 = vpop.f32.mrf.mxu0 }
 0x992   : > { %v4674_v43 = vadd.f32 %v4673_v18, %v4448_v51  ;;  %v9645_v37 = vsel %vm3164_vm0, %v4682_v8, -1e+30 }
 0x993   : > { %v6219_v62 = vpop.f32.mrf.mxu1  ;;  %4907 = vmax.xlane.f32.xlu1 %v9645_v37  ;;  %v4493_v2 = vpop.f32.mrf.mxu0 }
 0x994   : > { %v4695_v41 = vadd.f32 %v6219_v62, %v4469_v10  ;;  %v9655_v51 = vsel %vm3164_vm0, %v4674_v43, -1e+30 }
 0x995   : > { %v4686_v26 = vpop.f32.mrf.mxu1  ;;  %4901 = vmax.xlane.f32.xlu0 %v9650_v36  ;;  %v4495_v42 = vpop.f32.mrf.mxu0 }
 0x996   : > { %v4687_v38 = vadd.f32 %v4686_v26, %v9602_v14  ;;  %v9661_v0 = vsel %vm3164_vm0, %v4695_v41, -1e+30 }
 0x997   : > { %v6220_v11 = vpop.f32.mrf.mxu1  ;;  %4903 = vmax.xlane.f32.xlu1 %v9655_v51  ;;  %v4496_v29 = vpop.f32.mrf.mxu0 }
 0x998   : > { %v4698_v12 = vadd.f32 %v6220_v11, %v4472_v25  ;;  %v9672_v25 = vsel %vm3164_vm0, %v4687_v38, -1e+30 }
 0x999   : > { %v4689_v7 = vpop.f32.mrf.mxu1  ;;  %4913 = vmax.xlane.f32.xlu0 %v9661_v0  ;;  %v4498_v10 = vpop.f32.mrf.mxu0 }
 0x99a   : > { %v4690_v16 = vadd.f32 %v4689_v7, %v9606_v13  ;;  %v9667_v20 = vsel %vm3164_vm0, %v4698_v12, -1e+30 }
 0x99b   : > { %v6223_v24 = vpop.f32.mrf.mxu1  ;;  %4915 = vmax.xlane.f32.xlu1 %v9667_v20  ;;  %v4501_v45 = vpop.f32.mrf.mxu0 }
 0x99c   : > { %v4711_v14 = vadd.f32 %v6223_v24, %v4485_v54  ;;  %v9677_v13 = vsel %vm3164_vm0, %v4690_v16, -1e+30 }
 0x99d   : > { %v4702_v47 = vpop.f32.mrf.mxu1  ;;  %4909 = vmax.xlane.f32.xlu0 %v9672_v25  ;;  %v4503_v33 = vpop.f32.mrf.mxu0 }
 0x99e   : > { %v4703_v48 = vadd.f32 %v4702_v47, %v9614_v31  ;;  %v9683_v63 = vsel %vm3164_vm0, %v4711_v14, -1e+30 }
 0x99f   : > { %v6224_v58 = vpop.f32.mrf.mxu1  ;;  %4911 = vmax.xlane.f32.xlu1 %v9677_v13  ;;  %v4504_v57 = vpop.f32.mrf.mxu0 }
 0x9a0   : > { %v4714_v52 = vadd.f32 %v6224_v58, %v4488_v9  ;;  %v9694_v56 = vsel %vm3164_vm0, %v4703_v48, -1e+30 }
 0x9a1   : > { %v4705_v23 = vpop.f32.mrf.mxu1  ;;  %4921 = vmax.xlane.f32.xlu0 %v9683_v63  ;;  %v4506_v39 = vpop.f32.mrf.mxu0 }
 0x9a2   : > { %v4706_v40 = vadd.f32 %v4705_v23, %v9621_v46  ;;  %v9689_v5 = vsel %vm3164_vm0, %v4714_v52, -1e+30 }
 0x9a3   : > { %v6227_v54 = vpop.f32.mrf.mxu1  ;;  %4923 = vmax.xlane.f32.xlu1 %v9689_v5  ;;  %v4509_v3 = vpop.f32.mrf.mxu0 }
 0x9a4   : > { %v4727_v31 = vadd.f32 %v6227_v54, %v4501_v45  ;;  %v9699_v46 = vsel %vm3164_vm0, %v4706_v40, -1e+30 }
 0x9a5   : > { %v4718_v44 = vpop.f32.mrf.mxu1  ;;  %4917 = vmax.xlane.f32.xlu0 %v9694_v56  ;;  %v4511_v9 = vpop.f32.mrf.mxu0 }
 0x9a6   : > { %v4719_v8 = vadd.f32 %v4718_v44, %v4493_v2  ;;  %v9704_v1 = vsel %vm3164_vm0, %v4727_v31, -1e+30 }
 0x9a7   : > { %v6228_v59 = vpop.f32.mrf.mxu1  ;;  %4919 = vmax.xlane.f32.xlu1 %v9699_v46  ;;  %v4512_v15 = vpop.f32.mrf.mxu0 }
 0x9a8   : > { %v4730_v18 = vadd.f32 %v6228_v59, %v4504_v57  ;;  %v9714_v2 = vsel %vm3164_vm0, %v4719_v8, -1e+30 }
 0x9a9   : > { %v4721_v43 = vpop.f32.mrf.mxu1  ;;  %4929 = vmax.xlane.f32.xlu0 %v9704_v1  ;;  %v4514_v62 = vpop.f32.mrf.mxu0 }
 0x9aa   : > { %v4722_v41 = vadd.f32 %v4721_v43, %v4496_v29  ;;  %v9709_v26 = vsel %vm3164_vm0, %v4730_v18, -1e+30 }
 0x9ab   : > { %v6231_v42 = vpop.f32.mrf.mxu1  ;;  %4931 = vmax.xlane.f32.xlu1 %v9709_v26  ;;  %v4517_v11 = vpop.f32.mrf.mxu0 }
 0x9ac   : > { %v4743_v38 = vadd.f32 %v6231_v42, %v4517_v11  ;;  %v9719_v29 = vsel %vm3164_vm0, %v4722_v41, -1e+30 }
 0x9ad   : > { %v4734_v12 = vpop.f32.mrf.mxu1  ;;  %4925 = vmax.xlane.f32.xlu0 %v9714_v2  ;;  %v4519_v7 = vpop.f32.mrf.mxu0 }
 0x9ae   : > { %v4735_v24 = vadd.f32 %v4734_v12, %v4509_v3  ;;  %v9724_v14 = vsel %vm3164_vm0, %v4743_v38, -1e+30 }
 0x9af   : > { %v6232_v10 = vpop.f32.mrf.mxu1  ;;  %4927 = vmax.xlane.f32.xlu1 %v9719_v29  ;;  %v4520_v16 = vpop.f32.mrf.mxu0 }
 0x9b0   : > { %v4746_v45 = vadd.f32 %v6232_v10, %v4520_v16  ;;  %v9734_v23 = vsel %vm3164_vm0, %v4735_v24, -1e+30 }
 0x9b1   : > { %v4737_v47 = vpop.f32.mrf.mxu1  ;;  %4937 = vmax.xlane.f32.xlu0 %v9724_v14  ;;  %v4522_v33 = vpop.f32.mrf.mxu0 }
 0x9b2   : > { %v4738_v58 = vadd.f32 %v4737_v47, %v4512_v15  ;;  %v9729_v57 = vsel %vm3164_vm0, %v4746_v45, -1e+30 }
 0x9b3   : > { %v6235_v48 = vpop.f32.mrf.mxu1  ;;  %4939 = vmax.xlane.f32.xlu1 %v9729_v57  ;;  %v4525_v52 = vpop.f32.mrf.mxu0 }
 0x9b4   : > { %v9739_v3 = vsel %vm3164_vm0, %v4738_v58, -1e+30 }
 0x9b5   : > { %v4750_v39 = vpop.f32.mrf.mxu1  ;;  %4933 = vmax.xlane.f32.xlu0 %v9734_v23  ;;  %v4527_v40 = vpop.f32.mrf.mxu0 }
 0x9b6   : > { %v4751_v54 = vadd.f32 %v4750_v39, %v4525_v52 }
 0x9b7   : > { %v6236_v31 = vpop.f32.mrf.mxu1  ;;  %4935 = vmax.xlane.f32.xlu1 %v9739_v3  ;;  %v4528_v44 = vpop.f32.mrf.mxu0 }
 0x9b8   : > { %v9744_v9 = vsel %vm3164_vm0, %v4751_v54, -1e+30 }
 0x9b9   : > { %v4753_v59 = vpop.f32.mrf.mxu1  ;;  %4941 = vmax.xlane.f32.xlu0 %v9744_v9  ;;  %v4530_v15 = vpop.f32.mrf.mxu0 }
 0x9ba   : > { %v4754_v8 = vadd.f32 %v4753_v59, %v4528_v44 }
 0x9bb   : > { %v4533_v18 = vpop.f32.mrf.mxu0  ;;  %v6239_v43 = vpop.f32.mrf.mxu1 }
 0x9bc   : > { %v4759_v62 = vadd.f32 %v6235_v48, %v4533_v18  ;;  %v9749_v41 = vsel %vm3164_vm0, %v4754_v8, -1e+30 }
 0x9bd   : > { %v4766_v42 = vpop.f32.mrf.mxu1  ;;  %4943 = vmax.xlane.f32.xlu1 %v9749_v41  ;;  %v4535_v11 = vpop.f32.mrf.mxu0 }
 0x9be   : > { %v9754_v38 = vsel %vm3164_vm0, %v4759_v62, -1e+30 }
 0x9bf   : > { %v6240_v12 = vpop.f32.mrf.mxu1  ;;  %4945 = vmax.xlane.f32.xlu0 %v9754_v38  ;;  %v4536_v7 = vpop.f32.mrf.mxu0 }
 0x9c0   : > { %v4762_v10 = vadd.f32 %v6236_v31, %v4536_v7 }
 0x9c1   : > { %v4538_v16 = vpop.f32.mrf.mxu0  ;;  %v4769_v24 = vpop.f32.mrf.mxu1 }
 0x9c2   : > { %v9759_v45 = vsel %vm3164_vm0, %v4762_v10, -1e+30 }
 0x9c3   : > { %v9761_v47 = vpop.f32.mrf.mxu1  ;;  %4947 = vmax.xlane.f32.xlu1 %v9759_v45  ;;  %v4541_v33 = vpop.f32.mrf.mxu0 }
 0x9c4   : > { %v4767_v58 = vadd.f32 %v4766_v42, %v4541_v33 }
 0x9c5   : > { %v4543_v48 = vpop.f32.mrf.mxu0  ;;  %v4782_v52 = vpop.f32.mrf.mxu1 }
 0x9c6   : > { %v9766_v39 = vsel %vm3164_vm0, %v4767_v58, -1e+30 }
 0x9c7   : > { %v9768_v40 = vpop.f32.mrf.mxu1  ;;  %4949 = vmax.xlane.f32.xlu0 %v9766_v39  ;;  %v4544_v54 = vpop.f32.mrf.mxu0 }
 0x9c8   : > { %v4770_v31 = vadd.f32 %v4769_v24, %v4544_v54 }
 0x9c9   : > { %v4546_v44 = vpop.f32.mrf.mxu0  ;;  %v4785_v59 = vpop.f32.mrf.mxu1 }
 0x9ca   : > { %v9773_v15 = vsel %vm3164_vm0, %v4770_v31, -1e+30 }
 0x9cb   : > { %v6247_v8 = vpop.f32.mrf.mxu1  ;;  %4951 = vmax.xlane.f32.xlu1 %v9773_v15  ;;  %v4549_v18 = vpop.f32.mrf.mxu0 }
 0x9cc   : > { %v4775_v62 = vadd.f32 %v6239_v43, %v4549_v18  ;;  %v4807_v7 = vadd.f32 %v6247_v8, %v9590_v32 }
 0x9cd   : > { %v4551_v42 = vpop.f32.mrf.mxu0  ;;  %v4798_v11 = vpop.f32.mrf.mxu1 }
 0x9ce   : > { %v9779_v10 = vsel %vm3164_vm0, %v4775_v62, -1e+30  ;;  %v4799_v54 = vadd.f32 %v4798_v11, %v9586_v50  ;;  %v9786_v43 = vsel %vm3164_vm0, %v4807_v7, -1e+30 }
 0x9cf   : > { %v6248_v16 = vpop.f32.mrf.mxu1  ;;  %4953 = vmax.xlane.f32.xlu0 %v9779_v10  ;;  %v4552_v24 = vpop.f32.mrf.mxu0 }
 0x9d0   : > { %v4778_v33 = vadd.f32 %v6240_v12, %v4552_v24  ;;  %v4810_v31 = vadd.f32 %v6248_v16, %v9592_v22  ;;  %v9797_v22 = vsel %vm3164_vm0, %v4799_v54, -1e+30 }
 0x9d1   : > { %v4554_v58 = vpop.f32.mrf.mxu0  ;;  %v4801_v48 = vpop.f32.mrf.mxu1 }
 0x9d2   : > { %v9790_v32 = vsel %vm3164_vm0, %v4778_v33, -1e+30  ;;  %v4802_v50 = vadd.f32 %v4801_v48, %v9588_v21  ;;  %v9801_v42 = vsel %vm3164_vm0, %v4810_v31, -1e+30 }
 0x9d3   : > { %v6251_v44 = vpop.f32.mrf.mxu1  ;;  %4969 = vmax.xlane.f32.xlu0 %v9786_v43  ;;  %4955 = vmax.xlane.f32.xlu1 %v9790_v32  ;;  %v4557_v12 = vpop.f32.mrf.mxu0 }
 0x9d4   : > { %v4783_v62 = vadd.f32 %v4782_v52, %v4557_v12  ;;  %v4823_v24 = vadd.f32 %v6251_v44, %v9598_v61  ;;  %v9808_v21 = vsel %vm3164_vm0, %v4802_v50, -1e+30 }
 0x9d5   : > { %v4559_v8 = vpop.f32.mrf.mxu0  ;;  %v4814_v18 = vpop.f32.mrf.mxu1 }
 0x9d6   : > { %v9812_v52 = vsel %vm3164_vm0, %v4783_v62, -1e+30  ;;  %v4815_v31 = vadd.f32 %v4814_v18, %v9594_v27 }
 0x9d7   : > { %v6252_v11 = vpop.f32.mrf.mxu1  ;;  %4965 = vmax.xlane.f32.xlu0 %v9797_v22  ;;  %4971 = vmax.xlane.f32.xlu1 %v9801_v42  ;;  %v4560_v7 = vpop.f32.mrf.mxu0 }
 0x9d8   : > { %v4786_v33 = vadd.f32 %v4785_v59, %v4560_v7  ;;  %v4826_v61 = vadd.f32 %v6252_v11, %v9600_v34  ;;  %v9820_v59 = vsel %vm3164_vm0, %v4823_v24, -1e+30  ;;  %v9832_v34 = vsel %vm3164_vm0, %v4815_v31, -1e+30 }
 0x9d9   : > { %v4562_v16 = vpop.f32.mrf.mxu0  ;;  %v4817_v58 = vpop.f32.mrf.mxu1 }
 0x9da   : > { %v9824_v44 = vsel %vm3164_vm0, %v4786_v33, -1e+30  ;;  %v4818_v62 = vadd.f32 %v4817_v58, %v9596_v49  ;;  %v9836_v18 = vsel %vm3164_vm0, %v4826_v61, -1e+30 }
 0x9db   : > { %4967 = vmax.xlane.f32.xlu1 %v9808_v21  ;;  %4957 = vmax.xlane.f32.xlu0 %v9812_v52  ;;  %v4565_v48 = vpop.f32.mrf.mxu0  ;;  %v6255_v12 = vpop.f32.mrf.mxu1 }
 0x9dc   : > { %v4791_v27 = vadd.f32 %v9761_v47, %v4565_v48  ;;  %v4839_v7 = vadd.f32 %v6255_v12, %v9610_v60  ;;  %v9844_v49 = vsel %vm3164_vm0, %v4818_v62, -1e+30 }
 0x9dd   : > { %v4567_v54 = vpop.f32.mrf.mxu0  ;;  %v4830_v11 = vpop.f32.mrf.mxu1 }
 0x9de   : > { %v9848_v47 = vsel %vm3164_vm0, %v4791_v27, -1e+30  ;;  %v4831_v33 = vadd.f32 %v4830_v11, %v9604_v30  ;;  %v9856_v60 = vsel %vm3164_vm0, %v4839_v7, -1e+30 }
 0x9df   : > { %4977 = vmax.xlane.f32.xlu0 %v9820_v59  ;;  %4959 = vmax.xlane.f32.xlu1 %v9824_v44  ;;  %v4568_v8 = vpop.f32.mrf.mxu0  ;;  %v6256_v24 = vpop.f32.mrf.mxu1 }
 0x9e0   : > { %v4794_v16 = vadd.f32 %v9768_v40, %v4568_v8  ;;  %v4842_v58 = vadd.f32 %v6256_v24, %v9612_v4  ;;  %v9867_v30 = vsel %vm3164_vm0, %v4831_v33, -1e+30 }
 0x9e1   : > { %v4570_v50 = vpop.f32.mrf.mxu0  ;;  %v4833_v48 = vpop.f32.mrf.mxu1 }
 0x9e2   : > { %v9860_v40 = vsel %vm3164_vm0, %v4794_v16, -1e+30  ;;  %v4834_v54 = vadd.f32 %v4833_v48, %v9608_v35  ;;  %v9871_v4 = vsel %vm3164_vm0, %v4842_v58, -1e+30 }
 0x9e3   : > { %4973 = vmax.xlane.f32.xlu0 %v9832_v34  ;;  %4979 = vmax.xlane.f32.xlu1 %v9836_v18 }
 0x9e4   : > { %v9877_v31 = vsel %vm3164_vm0, %v4834_v54, -1e+30 }
 0x9e7   : > { %4975 = vmax.xlane.f32.xlu1 %v9844_v49  ;;  %4961 = vmax.xlane.f32.xlu0 %v9848_v47 }
 0x9eb   : > { %4985 = vmax.xlane.f32.xlu0 %v9856_v60  ;;  %4963 = vmax.xlane.f32.xlu1 %v9860_v40 }
 0x9ef   : > { %4981 = vmax.xlane.f32.xlu0 %v9867_v30  ;;  %4987 = vmax.xlane.f32.xlu1 %v9871_v4 }
 0x9f3   : > { %4983 = vmax.xlane.f32.xlu1 %v9877_v31 }
 0xa10   : > { %v4898_v61 = vpop.xlane.xlu1 %4897 }
 0xa11   : > { %v4991_v35 = vsub.f32 %v9618_v19, %v4898_v61 }
 0xa12   : > { %v4894_v12 = vpop.xlane.xlu0 %4893 }
 0xa13   : > { %v5041_v8 = vmul.f32 1.442695, %v4991_v35  ;;  %v4989_v50 = vsub.f32 %v9625_v17, %v4894_v12 }
 0xa14   : > { %v4900_v62 = vpop.xlane.xlu1 %4899 }
 0xa15   : > { %6874 = vpow2.f32 %v5041_v8  ;;  %v5037_v27 = vmul.f32 1.442695, %v4989_v50  ;;  %v4992_v11 = vsub.f32 %v9630_v55, %v4900_v62 }
 0xa16   : > { %v4896_v7 = vpop.xlane.xlu0 %4895 }
 0xa17   : > { %v5043_v16 = vmul.f32 1.442695, %v4992_v11  ;;  %v4990_v24 = vsub.f32 %v9635_v53, %v4896_v7  ;;  %6876 = vpow2.f32 %v5037_v27 }
 0xa19   : > { %6878 = vpow2.f32 %v5043_v16  ;;  %v5039_v33 = vmul.f32 1.442695, %v4990_v24 }
 0xa1a   : > { %v4906_v58 = vpop.xlane.xlu0 %4905 }
 0xa1b   : > { %v4995_v48 = vsub.f32 %v9640_v28, %v4906_v58  ;;  %6880 = vpow2.f32 %v5039_v33 }
 0xa1c   : > { %v4908_v19 = vpop.xlane.xlu1 %4907 }
 0xa1d   : > { %v5049_v54 = vmul.f32 1.442695, %v4995_v48  ;;  %v4996_v17 = vsub.f32 %v9645_v37, %v4908_v19 }
 0xa1e   : > { %v4902_v61 = vpop.xlane.xlu0 %4901 }
 0xa1f   : > { %6882 = vpow2.f32 %v5049_v54  ;;  %v5051_v35 = vmul.f32 1.442695, %v4996_v17  ;;  %v4993_v55 = vsub.f32 %v9650_v36, %v4902_v61 }
 0xa20   : > { %v4904_v12 = vpop.xlane.xlu1 %4903 }
 0xa21   : > { %6884 = vpow2.f32 %v5051_v35  ;;  %v5045_v8 = vmul.f32 1.442695, %v4993_v55  ;;  %v4994_v53 = vsub.f32 %v9655_v51, %v4904_v12 }
 0xa22   : > { %v9888_v50 = vpop.eup %6874  ;;  %v4914_v62 = vpop.xlane.xlu0 %4913 }
 0xa23   : > { %6886 = vpow2.f32 %v5045_v8  ;;  %v5047_v28 = vmul.f32 1.442695, %v4994_v53  ;;  %v4999_v27 = vsub.f32 %v9661_v0, %v4914_v62  ;;  %5137 = vadd.xlane.f32.xlu0 %v9888_v50 }
 0xa24   : > { %v4916_v37 = vpop.xlane.xlu1 %4915  ;;  %v9892_v11 = vpop.eup %6876 }
 0xa25   : > { %6888 = vpow2.f32 %v5047_v28  ;;  %v5057_v7 = vmul.f32 1.442695, %v4999_v27  ;;  %v5000_v36 = vsub.f32 %v9667_v20, %v4916_v37 }
 0xa26   : > { %v9895_v16 = vpop.eup %6878  ;;  %v4910_v24 = vpop.xlane.xlu0 %4909 }
 0xa27   : > { %6890 = vpow2.f32 %v5057_v7  ;;  %v5059_v51 = vmul.f32 1.442695, %v5000_v36  ;;  %v4997_v33 = vsub.f32 %v9672_v25, %v4910_v24  ;;  %5133 = vadd.xlane.f32.xlu0 %v9892_v11  ;;  %5139 = vadd.xlane.f32.xlu1 %v9895_v16 }
 0xa28   : > { %v4912_v0 = vpop.xlane.xlu1 %4911  ;;  %v9901_v19 = vpop.eup %6880 }
 0xa29   : > { %6892 = vpow2.f32 %v5059_v51  ;;  %v5053_v58 = vmul.f32 1.442695, %v4997_v33  ;;  %v4998_v48 = vsub.f32 %v9677_v13, %v4912_v0 }
 0xa2a   : > { %v4922_v54 = vpop.xlane.xlu0 %4921 }
 0xa2b   : > { %6894 = vpow2.f32 %v5053_v58  ;;  %v5055_v20 = vmul.f32 1.442695, %v4998_v48  ;;  %v5003_v17 = vsub.f32 %v9683_v63, %v4922_v54  ;;  %5135 = vadd.xlane.f32.xlu1 %v9901_v19 }
 0xa2c   : > { %v9905_v61 = vpop.eup %6882  ;;  %v4924_v25 = vpop.xlane.xlu1 %4923 }
 0xa2d   : > { %6896 = vpow2.f32 %v5055_v20  ;;  %v5065_v35 = vmul.f32 1.442695, %v5003_v17  ;;  %v5004_v55 = vsub.f32 %v9689_v5, %v4924_v25  ;;  %5145 = vadd.xlane.f32.xlu0 %v9905_v61 }
 0xa2e   : > { %v9909_v12 = vpop.eup %6884  ;;  %v4918_v13 = vpop.xlane.xlu0 %4917 }
 0xa2f   : > { %6898 = vpow2.f32 %v5065_v35  ;;  %v5067_v8 = vmul.f32 1.442695, %v5004_v55  ;;  %v5001_v53 = vsub.f32 %v9694_v56, %v4918_v13  ;;  %5147 = vadd.xlane.f32.xlu1 %v9909_v12 }
 0xa30   : > { %v9913_v63 = vpop.eup %6886  ;;  %v4920_v62 = vpop.xlane.xlu1 %4919 }
 0xa31   : > { %6900 = vpow2.f32 %v5067_v8  ;;  %v5061_v28 = vmul.f32 1.442695, %v5001_v53  ;;  %v5002_v27 = vsub.f32 %v9699_v46, %v4920_v62  ;;  %5141 = vadd.xlane.f32.xlu0 %v9913_v63 }
 0xa32   : > { %v9917_v5 = vpop.eup %6888  ;;  %v4930_v37 = vpop.xlane.xlu0 %4929 }
 0xa33   : > { %6902 = vpow2.f32 %v5061_v28  ;;  %v5063_v7 = vmul.f32 1.442695, %v5002_v27  ;;  %v5007_v36 = vsub.f32 %v9704_v1, %v4930_v37  ;;  %5143 = vadd.xlane.f32.xlu1 %v9917_v5 }
 0xa34   : > { %v9921_v56 = vpop.eup %6890  ;;  %v4932_v24 = vpop.xlane.xlu1 %4931 }
 0xa35   : > { %6904 = vpow2.f32 %v5063_v7  ;;  %v5073_v51 = vmul.f32 1.442695, %v5007_v36  ;;  %v5008_v33 = vsub.f32 %v9709_v26, %v4932_v24  ;;  %5153 = vadd.xlane.f32.xlu0 %v9921_v56 }
 0xa36   : > { %v9925_v46 = vpop.eup %6892  ;;  %v4926_v0 = vpop.xlane.xlu0 %4925 }
 0xa37   : > { %6906 = vpow2.f32 %v5073_v51  ;;  %v5075_v58 = vmul.f32 1.442695, %v5008_v33  ;;  %v5005_v48 = vsub.f32 %v9714_v2, %v4926_v0  ;;  %5155 = vadd.xlane.f32.xlu1 %v9925_v46 }
 0xa38   : > { %v9929_v1 = vpop.eup %6894  ;;  %v4928_v54 = vpop.xlane.xlu1 %4927 }
 0xa39   : > { %6908 = vpow2.f32 %v5075_v58  ;;  %v5069_v20 = vmul.f32 1.442695, %v5005_v48  ;;  %v5006_v17 = vsub.f32 %v9719_v29, %v4928_v54  ;;  %5149 = vadd.xlane.f32.xlu0 %v9929_v1 }
 0xa3a   : > { %v9933_v26 = vpop.eup %6896  ;;  %v4938_v25 = vpop.xlane.xlu0 %4937 }
 0xa3b   : > { %6910 = vpow2.f32 %v5069_v20  ;;  %v5071_v35 = vmul.f32 1.442695, %v5006_v17  ;;  %v5011_v55 = vsub.f32 %v9724_v14, %v4938_v25  ;;  %5151 = vadd.xlane.f32.xlu1 %v9933_v26 }
 0xa3c   : > { %v9937_v2 = vpop.eup %6898  ;;  %v4940_v13 = vpop.xlane.xlu1 %4939 }
 0xa3d   : > { %6912 = vpow2.f32 %v5071_v35  ;;  %v5081_v8 = vmul.f32 1.442695, %v5011_v55  ;;  %v5012_v53 = vsub.f32 %v9729_v57, %v4940_v13  ;;  %5161 = vadd.xlane.f32.xlu0 %v9937_v2 }
 0xa3e   : > { %v9941_v29 = vpop.eup %6900  ;;  %v4934_v62 = vpop.xlane.xlu0 %4933 }
 0xa3f   : > { %6914 = vpow2.f32 %v5081_v8  ;;  %v5083_v28 = vmul.f32 1.442695, %v5012_v53  ;;  %v5009_v27 = vsub.f32 %v9734_v23, %v4934_v62  ;;  %5163 = vadd.xlane.f32.xlu1 %v9941_v29 }
 0xa40   : > { %v9945_v14 = vpop.eup %6902  ;;  %v4936_v37 = vpop.xlane.xlu1 %4935 }
 0xa41   : > { %6916 = vpow2.f32 %v5083_v28  ;;  %v5077_v7 = vmul.f32 1.442695, %v5009_v27  ;;  %v5010_v36 = vsub.f32 %v9739_v3, %v4936_v37  ;;  %5157 = vadd.xlane.f32.xlu0 %v9945_v14 }
 0xa42   : > { %v9949_v57 = vpop.eup %6904  ;;  %v4942_v24 = vpop.xlane.xlu0 %4941 }
 0xa43   : > { %6918 = vpow2.f32 %v5077_v7  ;;  %v5079_v51 = vmul.f32 1.442695, %v5010_v36  ;;  %v5013_v33 = vsub.f32 %v9744_v9, %v4942_v24  ;;  %5159 = vadd.xlane.f32.xlu1 %v9949_v57 }
 0xa44   : > { %v9953_v23 = vpop.eup %6906 }
 0xa45   : > { %6920 = vpow2.f32 %v5079_v51  ;;  %v5085_v0 = vmul.f32 1.442695, %v5013_v33  ;;  %5169 = vadd.xlane.f32.xlu0 %v9953_v23 }
 0xa46   : > { %v9956_v58 = vpop.eup %6908  ;;  %v4944_v3 = vpop.xlane.xlu1 %4943 }
 0xa47   : > { %6922 = vpow2.f32 %v5085_v0  ;;  %v5014_v48 = vsub.f32 %v9749_v41, %v4944_v3  ;;  %5171 = vadd.xlane.f32.xlu1 %v9956_v58 }
 0xa48   : > { %v9960_v54 = vpop.eup %6910  ;;  %v4946_v20 = vpop.xlane.xlu0 %4945 }
 0xa49   : > { %v5087_v9 = vmul.f32 1.442695, %v5014_v48  ;;  %v5015_v17 = vsub.f32 %v9754_v38, %v4946_v20  ;;  %5165 = vadd.xlane.f32.xlu0 %v9960_v54 }
 0xa4a   : > { %v9964_v25 = vpop.eup %6912 }
 0xa4b   : > { %6924 = vpow2.f32 %v5087_v9  ;;  %v5089_v35 = vmul.f32 1.442695, %v5015_v17  ;;  %5167 = vadd.xlane.f32.xlu1 %v9964_v25 }
 0xa4c   : > { %v9967_v55 = vpop.eup %6914  ;;  %v4948_v13 = vpop.xlane.xlu1 %4947 }
 0xa4d   : > { %6926 = vpow2.f32 %v5089_v35  ;;  %v5016_v41 = vsub.f32 %v9759_v45, %v4948_v13  ;;  %5177 = vadd.xlane.f32.xlu0 %v9967_v55 }
 0xa4e   : > { %v9971_v8 = vpop.eup %6916 }
 0xa4f   : > { %v5091_v53 = vmul.f32 1.442695, %v5016_v41  ;;  %5179 = vadd.xlane.f32.xlu1 %v9971_v8 }
 0xa50   : > { %v9974_v38 = vpop.eup %6918  ;;  %v4950_v62 = vpop.xlane.xlu0 %4949 }
 0xa51   : > { %6928 = vpow2.f32 %v5091_v53  ;;  %v5017_v28 = vsub.f32 %v9766_v39, %v4950_v62  ;;  %5173 = vadd.xlane.f32.xlu0 %v9974_v38 }
 0xa52   : > { %v9978_v27 = vpop.eup %6920 }
 0xa53   : > { %v5093_v37 = vmul.f32 1.442695, %v5017_v28  ;;  %5175 = vadd.xlane.f32.xlu1 %v9978_v27 }
 0xa54   : > { %v9981_v45 = vpop.eup %6922  ;;  %v4952_v7 = vpop.xlane.xlu1 %4951 }
 0xa55   : > { %6930 = vpow2.f32 %v5093_v37  ;;  %v5018_v36 = vsub.f32 %v9773_v15, %v4952_v7  ;;  %5181 = vadd.xlane.f32.xlu0 %v9981_v45 }
 0xa57   : > { %v5095_v24 = vmul.f32 1.442695, %v5018_v36 }
 0xa58   : > { %v9985_v51 = vpop.eup %6924  ;;  %v4954_v33 = vpop.xlane.xlu0 %4953 }
 0xa59   : > { %6932 = vpow2.f32 %v5095_v24  ;;  %v5019_v39 = vsub.f32 %v9779_v10, %v4954_v33  ;;  %5183 = vadd.xlane.f32.xlu1 %v9985_v51 }
 0xa5a   : > { %v9989_v0 = vpop.eup %6926 }
 0xa5b   : > { %v5097_v3 = vmul.f32 1.442695, %v5019_v39  ;;  %5185 = vadd.xlane.f32.xlu0 %v9989_v0 }
 0xa5c   : > { %v4970_v48 = vpop.xlane.xlu0 %4969  ;;  %v4956_v20 = vpop.xlane.xlu1 %4955 }
 0xa5d   : > { %6934 = vpow2.f32 %v5097_v3  ;;  %v5027_v15 = vsub.f32 %v9786_v43, %v4970_v48  ;;  %v5020_v9 = vsub.f32 %v9790_v32, %v4956_v20 }
 0xa5e   : > { %v9994_v17 = vpop.eup %6928 }
 0xa5f   : > { %v5113_v35 = vmul.f32 1.442695, %v5027_v15  ;;  %v5099_v13 = vmul.f32 1.442695, %v5020_v9  ;;  %5187 = vadd.xlane.f32.xlu1 %v9994_v17 }
 0xa60   : > { %v4966_v10 = vpop.xlane.xlu0 %4965  ;;  %v4972_v41 = vpop.xlane.xlu1 %4971 }
 0xa61   : > { %6936 = vpow2.f32 %v5113_v35  ;;  %v5025_v53 = vsub.f32 %v9797_v22, %v4966_v10  ;;  %v5028_v62 = vsub.f32 %v9801_v42, %v4972_v41 }
 0xa62   : > { %v9999_v28 = vpop.eup %6930  ;;  %6938 = vpow2.f32 %v5099_v13 }
 0xa63   : > { %v5109_v37 = vmul.f32 1.442695, %v5025_v53  ;;  %v5115_v43 = vmul.f32 1.442695, %v5028_v62  ;;  %5189 = vadd.xlane.f32.xlu0 %v9999_v28 }
 0xa64   : > { %v4968_v32 = vpop.xlane.xlu1 %4967  ;;  %v4958_v7 = vpop.xlane.xlu0 %4957 }
 0xa65   : > { %6940 = vpow2.f32 %v5109_v37  ;;  %v5026_v36 = vsub.f32 %v9808_v21, %v4968_v32  ;;  %v5021_v24 = vsub.f32 %v9812_v52, %v4958_v7 }
 0xa66   : > { %v10004_v33 = vpop.eup %6932  ;;  %6942 = vpow2.f32 %v5115_v43 }
 0xa67   : > { %v5111_v22 = vmul.f32 1.442695, %v5026_v36  ;;  %v5101_v39 = vmul.f32 1.442695, %v5021_v24  ;;  %5191 = vadd.xlane.f32.xlu1 %v10004_v33 }
 0xa68   : > { %v4978_v42 = vpop.xlane.xlu0 %4977  ;;  %v4960_v3 = vpop.xlane.xlu1 %4959 }
 0xa69   : > { %6944 = vpow2.f32 %v5111_v22  ;;  %v5031_v48 = vsub.f32 %v9820_v59, %v4978_v42  ;;  %v5022_v20 = vsub.f32 %v9824_v44, %v4960_v3 }
 0xa6a   : > { %v10009_v15 = vpop.eup %6934  ;;  %6946 = vpow2.f32 %v5101_v39 }
 0xa6b   : > { %v5121_v21 = vmul.f32 1.442695, %v5031_v48  ;;  %v5103_v9 = vmul.f32 1.442695, %v5022_v20  ;;  %5193 = vadd.xlane.f32.xlu0 %v10009_v15 }
 0xa6c   : > { %v4974_v52 = vpop.xlane.xlu0 %4973  ;;  %v4980_v35 = vpop.xlane.xlu1 %4979 }
 0xa6d   : > { %6948 = vpow2.f32 %v5121_v21  ;;  %v5029_v13 = vsub.f32 %v9832_v34, %v4974_v52  ;;  %v5032_v10 = vsub.f32 %v9836_v18, %v4980_v35 }
 0xa6e   : > { %v10014_v41 = vpop.eup %6936  ;;  %6950 = vpow2.f32 %v5103_v9 }
 0xa6f   : > { %v10016_v59 = vpop.eup %6938  ;;  %v5117_v44 = vmul.f32 1.442695, %v5029_v13  ;;  %v5123_v53 = vmul.f32 1.442695, %v5032_v10  ;;  %5209 = vadd.xlane.f32.xlu0 %v10014_v41 }
 0xa70   : > { %5195 = vadd.xlane.f32.xlu1 %v10016_v59  ;;  %v4976_v62 = vpop.xlane.xlu1 %4975  ;;  %v4962_v37 = vpop.xlane.xlu0 %4961 }
 0xa71   : > { %6952 = vpow2.f32 %v5117_v44  ;;  %v5030_v43 = vsub.f32 %v9844_v49, %v4976_v62  ;;  %v5023_v34 = vsub.f32 %v9848_v47, %v4962_v37 }
 0xa72   : > { %v10022_v32 = vpop.eup %6940  ;;  %6954 = vpow2.f32 %v5123_v53 }
 0xa73   : > { %v10024_v18 = vpop.eup %6942  ;;  %v5119_v7 = vmul.f32 1.442695, %v5030_v43  ;;  %v5105_v36 = vmul.f32 1.442695, %v5023_v34  ;;  %5205 = vadd.xlane.f32.xlu0 %v10022_v32 }
 0xa74   : > { %5211 = vadd.xlane.f32.xlu1 %v10024_v18  ;;  %v4986_v24 = vpop.xlane.xlu0 %4985  ;;  %v4964_v22 = vpop.xlane.xlu1 %4963 }
 0xa75   : > { %6956 = vpow2.f32 %v5119_v7  ;;  %v5024_v39 = vsub.f32 %v9860_v40, %v4964_v22  ;;  %v5035_v3 = vsub.f32 %v9856_v60, %v4986_v24 }
 0xa76   : > { %v10029_v42 = vpop.eup %6944  ;;  %6958 = vpow2.f32 %v5105_v36 }
 0xa77   : > { %v10031_v49 = vpop.eup %6946  ;;  %v5107_v47 = vmul.f32 1.442695, %v5024_v39  ;;  %v5129_v35 = vmul.f32 1.442695, %v5035_v3 }
 0xa78   : > { %5197 = vadd.xlane.f32.xlu0 %v10031_v49  ;;  %5207 = vadd.xlane.f32.xlu1 %v10029_v42  ;;  %v4982_v48 = vpop.xlane.xlu0 %4981  ;;  %v4988_v20 = vpop.xlane.xlu1 %4987 }
 0xa79   : > { %v5033_v21 = vsub.f32 %v9867_v30, %v4982_v48  ;;  %6960 = vpow2.f32 %v5107_v47  ;;  %v5036_v13 = vsub.f32 %v9871_v4, %v4988_v20 }
 0xa7a   : > { %v10037_v9 = vpop.eup %6948 }
 0xa7b   : > { %v10039_v40 = vpop.eup %6950  ;;  %v5125_v52 = vmul.f32 1.442695, %v5033_v21  ;;  %v5131_v62 = vmul.f32 1.442695, %v5036_v13 }
 0xa7c   : > { %5217 = vadd.xlane.f32.xlu0 %v10037_v9  ;;  %5199 = vadd.xlane.f32.xlu1 %v10039_v40  ;;  %v4984_v60 = vpop.xlane.xlu1 %4983 }
 0xa7d   : > { %6962 = vpow2.f32 %v5125_v52  ;;  %v5034_v10 = vsub.f32 %v9877_v31, %v4984_v60 }
 0xa7e   : > { %v10045_v44 = vpop.eup %6952  ;;  %6964 = vpow2.f32 %v5129_v35 }
 0xa7f   : > { %v10047_v30 = vpop.eup %6954  ;;  %v5127_v53 = vmul.f32 1.442695, %v5034_v10 }
 0xa80   : > { %5213 = vadd.xlane.f32.xlu0 %v10045_v44  ;;  %5219 = vadd.xlane.f32.xlu1 %v10047_v30 }
 0xa81   : > { %6966 = vpow2.f32 %v5127_v53 }
 0xa82   : > { %v10051_v37 = vpop.eup %6956  ;;  %6968 = vpow2.f32 %v5131_v62 }
 0xa83   : > { %v10053_v43 = vpop.eup %6958 }
 0xa84   : > { %5201 = vadd.xlane.f32.xlu0 %v10053_v43  ;;  %5215 = vadd.xlane.f32.xlu1 %v10051_v37 }
 0xa86   : > { %v10057_v4 = vpop.eup %6960 }
 0xa88   : > { %5203 = vadd.xlane.f32.xlu1 %v10057_v4 }
 0xa8a   : > { %v10060_v31 = vpop.eup %6962 }
 0xa8b   : > { %5221 = vadd.xlane.f32.xlu0 %v10060_v31  ;;  %v10063_v34 = vpop.eup %6964 }
 0xa8e   : > { %v10065_v7 = vpop.eup %6966 }
 0xa8f   : > { %5225 = vadd.xlane.f32.xlu0 %v10063_v34  ;;  %5223 = vadd.xlane.f32.xlu1 %v10065_v7  ;;  %v10069_v36 = vpop.eup %6968 }
 0xa93   : > { %5227 = vadd.xlane.f32.xlu1 %v10069_v36 }
 0xaac   : > { %v5138_v24 = vpop.xlane.xlu0 %5137 }
 0xaad   : > { %6970 = vrcp.f32 %v5138_v24 }
 0xab0   : > { %v5134_v22 = vpop.xlane.xlu0 %5133  ;;  %v5140_v39 = vpop.xlane.xlu1 %5139 }
 0xab1   : > { %6972 = vrcp.f32 %v5134_v22 }
 0xab2   : > { %6974 = vrcp.f32 %v5140_v39 }
 0xab4   : > { %v5136_v47 = vpop.xlane.xlu1 %5135 }
 0xab5   : > { %6976 = vrcp.f32 %v5136_v47 }
 0xab6   : > { %v5146_v3 = vpop.xlane.xlu0 %5145 }
 0xab7   : > { %6978 = vrcp.f32 %v5146_v3 }
 0xab8   : > { %v5148_v48 = vpop.xlane.xlu1 %5147 }
 0xab9   : > { %6980 = vrcp.f32 %v5148_v48 }
 0xaba   : > { %v6971_v20 = vpop.eup %6970  ;;  %v5142_v21 = vpop.xlane.xlu0 %5141 }
 0xabb   : > { %v5279_v52 = vmul.f32 %v6971_v20, %v9888_v50  ;;  %6982 = vrcp.f32 %v5142_v21 }
 0xabc   : > { %v5144_v35 = vpop.xlane.xlu1 %5143 }
 0xabd   : > { %5327 = vst [vmem:[%s10278_s10 + $0x10] sm:$0xff] %v5279_v52  ;;  %6984 = vrcp.f32 %v5144_v35 }
 0xabe   : > { %v6973_v60 = vpop.eup %6972  ;;  %v5154_v13 = vpop.xlane.xlu0 %5153 }
 0xabf   : > { %v6975_v10 = vpop.eup %6974  ;;  %v5277_v53 = vmul.f32 %v6973_v60, %v9892_v11  ;;  %6986 = vrcp.f32 %v5154_v13 }
 0xac0   : > { %v5280_v62 = vmul.f32 %v6975_v10, %v9895_v16  ;;  %v5156_v24 = vpop.xlane.xlu1 %5155 }
 0xac1   : > { %5325 = vst [vmem:[%s10278_s10] sm:$0xff] %v5277_v53  ;;  %6988 = vrcp.f32 %v5156_v24 }
 0xac2   : > { %v6977_v50 = vpop.eup %6976  ;;  %5328 = vst [vmem:[%s10278_s10 + $0x18] sm:$0xff] %v5280_v62  ;;  %v5150_v22 = vpop.xlane.xlu0 %5149 }
 0xac3   : > { %v5278_v39 = vmul.f32 %v6977_v50, %v9901_v19  ;;  %6990 = vrcp.f32 %v5150_v22 }
 0xac4   : > { %v6979_v47 = vpop.eup %6978  ;;  %v5152_v11 = vpop.xlane.xlu1 %5151 }
 0xac5   : > { %5326 = vst [vmem:[%s10278_s10 + $0x8] sm:$0xff] %v5278_v39  ;;  %v5283_v16 = vmul.f32 %v6979_v47, %v9905_v61  ;;  %6992 = vrcp.f32 %v5152_v11 }
 0xac6   : > { %v6981_v3 = vpop.eup %6980  ;;  %v5162_v48 = vpop.xlane.xlu0 %5161 }
 0xac7   : > { %5331 = vst [vmem:[%s10278_s10 + $0x30] sm:$0xff] %v5283_v16  ;;  %v5284_v20 = vmul.f32 %v6981_v3, %v9909_v12  ;;  %6994 = vrcp.f32 %v5162_v48 }
 0xac8   : > { %v6983_v19 = vpop.eup %6982  ;;  %v5164_v21 = vpop.xlane.xlu1 %5163 }
 0xac9   : > { %5332 = vst [vmem:[%s10278_s10 + $0x38] sm:$0xff] %v5284_v20  ;;  %v5281_v52 = vmul.f32 %v6983_v19, %v9913_v63  ;;  %6996 = vrcp.f32 %v5164_v21 }
 0xaca   : > { %v6985_v61 = vpop.eup %6984  ;;  %v5158_v35 = vpop.xlane.xlu0 %5157 }
 0xacb   : > { %5329 = vst [vmem:[%s10278_s10 + $0x20] sm:$0xff] %v5281_v52  ;;  %v5282_v60 = vmul.f32 %v6985_v61, %v9917_v5  ;;  %6998 = vrcp.f32 %v5158_v35 }
 0xacc   : > { %v6987_v12 = vpop.eup %6986  ;;  %v5160_v13 = vpop.xlane.xlu1 %5159 }
 0xacd   : > { %5330 = vst [vmem:[%s10278_s10 + $0x28] sm:$0xff] %v5282_v60  ;;  %v5287_v10 = vmul.f32 %v6987_v12, %v9921_v56  ;;  %7000 = vrcp.f32 %v5160_v13 }
 0xace   : > { %v6989_v63 = vpop.eup %6988  ;;  %v5170_v53 = vpop.xlane.xlu0 %5169 }
 0xacf   : > { %5335 = vst [vmem:[%s10278_s10 + $0x50] sm:$0xff] %v5287_v10  ;;  %v5288_v62 = vmul.f32 %v6989_v63, %v9925_v46  ;;  %7002 = vrcp.f32 %v5170_v53 }
 0xad0   : > { %v6991_v5 = vpop.eup %6990  ;;  %v5172_v24 = vpop.xlane.xlu1 %5171 }
 0xad1   : > { %5336 = vst [vmem:[%s10278_s10 + $0x58] sm:$0xff] %v5288_v62  ;;  %v5285_v50 = vmul.f32 %v6991_v5, %v9929_v1  ;;  %7004 = vrcp.f32 %v5172_v24 }
 0xad2   : > { %v6993_v56 = vpop.eup %6992  ;;  %v5166_v22 = vpop.xlane.xlu0 %5165 }
 0xad3   : > { %5333 = vst [vmem:[%s10278_s10 + $0x40] sm:$0xff] %v5285_v50  ;;  %v5286_v39 = vmul.f32 %v6993_v56, %v9933_v26  ;;  %7006 = vrcp.f32 %v5166_v22 }
 0xad4   : > { %v6995_v46 = vpop.eup %6994  ;;  %v5168_v47 = vpop.xlane.xlu1 %5167 }
 0xad5   : > { %5334 = vst [vmem:[%s10278_s10 + $0x48] sm:$0xff] %v5286_v39  ;;  %v5291_v11 = vmul.f32 %v6995_v46, %v9937_v2  ;;  %7008 = vrcp.f32 %v5168_v47 }
 0xad6   : > { %v6997_v1 = vpop.eup %6996  ;;  %v5178_v16 = vpop.xlane.xlu0 %5177 }
 0xad7   : > { %5339 = vst [vmem:[%s10278_s10 + $0x70] sm:$0xff] %v5291_v11  ;;  %v5292_v3 = vmul.f32 %v6997_v1, %v9941_v29  ;;  %7010 = vrcp.f32 %v5178_v16 }
 0xad8   : > { %v6999_v26 = vpop.eup %6998  ;;  %v5180_v48 = vpop.xlane.xlu1 %5179 }
 0xad9   : > { %5340 = vst [vmem:[%s10278_s10 + $0x78] sm:$0xff] %v5292_v3  ;;  %v5289_v20 = vmul.f32 %v6999_v26, %v9945_v14  ;;  %7012 = vrcp.f32 %v5180_v48 }
 0xada   : > { %v7001_v2 = vpop.eup %7000  ;;  %v5174_v19 = vpop.xlane.xlu0 %5173 }
 0xadb   : > { %5337 = vst [vmem:[%s10278_s10 + $0x60] sm:$0xff] %v5289_v20  ;;  %v5290_v21 = vmul.f32 %v7001_v2, %v9949_v57  ;;  %7014 = vrcp.f32 %v5174_v19 }
 0xadc   : > { %v7003_v29 = vpop.eup %7002  ;;  %v5176_v52 = vpop.xlane.xlu1 %5175 }
 0xadd   : > { %5338 = vst [vmem:[%s10278_s10 + $0x68] sm:$0xff] %v5290_v21  ;;  %v5295_v61 = vmul.f32 %v7003_v29, %v9953_v23  ;;  %7016 = vrcp.f32 %v5176_v52 }
 0xade   : > { %v7005_v14 = vpop.eup %7004  ;;  %v5182_v35 = vpop.xlane.xlu0 %5181 }
 0xadf   : > { %5343 = vst [vmem:[%s10278_s10 + $0x90] sm:$0xff] %v5295_v61  ;;  %v5296_v60 = vmul.f32 %v7005_v14, %v9956_v58  ;;  %7018 = vrcp.f32 %v5182_v35 }
 0xae0   : > { %v7007_v57 = vpop.eup %7006 }
 0xae1   : > { %5344 = vst [vmem:[%s10278_s10 + $0x98] sm:$0xff] %v5296_v60  ;;  %v5293_v12 = vmul.f32 %v7007_v57, %v9960_v54 }
 0xae2   : > { %v7009_v13 = vpop.eup %7008  ;;  %v5184_v10 = vpop.xlane.xlu1 %5183 }
 0xae3   : > { %5341 = vst [vmem:[%s10278_s10 + $0x80] sm:$0xff] %v5293_v12  ;;  %v5294_v23 = vmul.f32 %v7009_v13, %v9964_v25  ;;  %7020 = vrcp.f32 %v5184_v10 }
 0xae4   : > { %v7011_v63 = vpop.eup %7010  ;;  %v5186_v53 = vpop.xlane.xlu0 %5185 }
 0xae5   : > { %5342 = vst [vmem:[%s10278_s10 + $0x88] sm:$0xff] %v5294_v23  ;;  %v5299_v58 = vmul.f32 %v7011_v63, %v9967_v55  ;;  %7022 = vrcp.f32 %v5186_v53 }
 0xae6   : > { %v7013_v62 = vpop.eup %7012 }
 0xae7   : > { %5347 = vst [vmem:[%s10278_s10 + $0xb0] sm:$0xff] %v5299_v58  ;;  %v5300_v54 = vmul.f32 %v7013_v62, %v9971_v8 }
 0xae8   : > { %v7015_v5 = vpop.eup %7014  ;;  %v5188_v24 = vpop.xlane.xlu1 %5187 }
 0xae9   : > { %5348 = vst [vmem:[%s10278_s10 + $0xb8] sm:$0xff] %v5300_v54  ;;  %v5297_v25 = vmul.f32 %v7015_v5, %v9974_v38  ;;  %7024 = vrcp.f32 %v5188_v24 }
 0xaea   : > { %v7017_v50 = vpop.eup %7016 }
 0xaeb   : > { %5345 = vst [vmem:[%s10278_s10 + $0xa0] sm:$0xff] %v5297_v25  ;;  %v5298_v55 = vmul.f32 %v7017_v50, %v9978_v27 }
 0xaec   : > { %v7019_v56 = vpop.eup %7018  ;;  %v5190_v22 = vpop.xlane.xlu0 %5189 }
 0xaed   : > { %5346 = vst [vmem:[%s10278_s10 + $0xa8] sm:$0xff] %v5298_v55  ;;  %v5301_v8 = vmul.f32 %v7019_v56, %v9981_v45  ;;  %7026 = vrcp.f32 %v5190_v22 }
 0xaef   : > { %5349 = vst [vmem:[%s10278_s10 + $0xc0] sm:$0xff] %v5301_v8 }
 0xaf0   : > { %v7021_v38 = vpop.eup %7020  ;;  %v5192_v39 = vpop.xlane.xlu1 %5191 }
 0xaf1   : > { %v5302_v46 = vmul.f32 %v7021_v38, %v9985_v51  ;;  %7028 = vrcp.f32 %v5192_v39 }
 0xaf2   : > { %v7023_v47 = vpop.eup %7022 }
 0xaf3   : > { %5350 = vst [vmem:[%s10278_s10 + $0xc8] sm:$0xff] %v5302_v46  ;;  %v5303_v27 = vmul.f32 %v7023_v47, %v9989_v0 }
 0xaf4   : > { %v5194_v11 = vpop.xlane.xlu0 %5193 }
 0xaf5   : > { %5351 = vst [vmem:[%s10278_s10 + $0xd0] sm:$0xff] %v5303_v27  ;;  %7030 = vrcp.f32 %v5194_v11 }
 0xaf6   : > { %v7025_v45 = vpop.eup %7024 }
 0xaf7   : > { %v5304_v1 = vmul.f32 %v7025_v45, %v9994_v17 }
 0xaf8   : > { %v5210_v16 = vpop.xlane.xlu0 %5209 }
 0xaf9   : > { %5352 = vst [vmem:[%s10278_s10 + $0xd8] sm:$0xff] %v5304_v1  ;;  %7032 = vrcp.f32 %v5210_v16  ;;  %v5196_v51 = vpop.xlane.xlu1 %5195 }
 0xafa   : > { %v7027_v3 = vpop.eup %7026  ;;  %7034 = vrcp.f32 %v5196_v51 }
 0xafb   : > { %v5305_v0 = vmul.f32 %v7027_v3, %v9999_v28 }
 0xafc   : > { %v5206_v26 = vpop.xlane.xlu0 %5205 }
 0xafd   : > { %5353 = vst [vmem:[%s10278_s10 + $0xe0] sm:$0xff] %v5305_v0  ;;  %7036 = vrcp.f32 %v5206_v26  ;;  %v5212_v48 = vpop.xlane.xlu1 %5211 }
 0xafe   : > { %v7029_v20 = vpop.eup %7028  ;;  %7038 = vrcp.f32 %v5212_v48 }
 0xaff   : > { %v5306_v17 = vmul.f32 %v7029_v20, %v10004_v33 }
 0xb01   : > { %5354 = vst [vmem:[%s10278_s10 + $0xe8] sm:$0xff] %v5306_v17  ;;  %v5198_v2 = vpop.xlane.xlu0 %5197  ;;  %v5208_v19 = vpop.xlane.xlu1 %5207 }
 0xb02   : > { %v7031_v21 = vpop.eup %7030  ;;  %7040 = vrcp.f32 %v5198_v2 }
 0xb03   : > { %v5307_v28 = vmul.f32 %v7031_v21, %v10009_v15  ;;  %7042 = vrcp.f32 %v5208_v19 }
 0xb05   : > { %5355 = vst [vmem:[%s10278_s10 + $0xf0] sm:$0xff] %v5307_v28  ;;  %v5218_v29 = vpop.xlane.xlu0 %5217  ;;  %v5200_v52 = vpop.xlane.xlu1 %5199 }
 0xb06   : > { %v7033_v61 = vpop.eup %7032  ;;  %7044 = vrcp.f32 %v5218_v29 }
 0xb07   : > { %v7035_v33 = vpop.eup %7034  ;;  %v5315_v14 = vmul.f32 %v7033_v61, %v10014_v41  ;;  %7046 = vrcp.f32 %v5200_v52 }
 0xb08   : > { %v5308_v35 = vmul.f32 %v7035_v33, %v10016_v59 }
 0xb09   : > { %5363 = vst [vmem:[%s10278_s10 + $0x130] sm:$0xff] %v5315_v14  ;;  %v5214_v15 = vpop.xlane.xlu0 %5213  ;;  %v5220_v60 = vpop.xlane.xlu1 %5219 }
 0xb0a   : > { %v7037_v57 = vpop.eup %7036  ;;  %5356 = vst [vmem:[%s10278_s10 + $0xf8] sm:$0xff] %v5308_v35  ;;  %7048 = vrcp.f32 %v5214_v15 }
 0xb0b   : > { %v7039_v12 = vpop.eup %7038  ;;  %v5313_v13 = vmul.f32 %v7037_v57, %v10022_v32  ;;  %7050 = vrcp.f32 %v5220_v60 }
 0xb0c   : > { %v5316_v41 = vmul.f32 %v7039_v12, %v10024_v18 }
 0xb0d   : > { %5361 = vst [vmem:[%s10278_s10 + $0x120] sm:$0xff] %v5313_v13  ;;  %v5202_v59 = vpop.xlane.xlu0 %5201  ;;  %v5216_v10 = vpop.xlane.xlu1 %5215 }
 0xb0e   : > { %5364 = vst [vmem:[%s10278_s10 + $0x138] sm:$0xff] %v5316_v41  ;;  %7052 = vrcp.f32 %v5202_v59 }
 0xb0f   : > { %v7041_v23 = vpop.eup %7040  ;;  %7054 = vrcp.f32 %v5216_v10 }
 0xb10   : > { %v7043_v63 = vpop.eup %7042  ;;  %v5309_v53 = vmul.f32 %v7041_v23, %v10031_v49 }
 0xb11   : > { %v5314_v32 = vmul.f32 %v7043_v63, %v10029_v42  ;;  %v5204_v58 = vpop.xlane.xlu1 %5203 }
 0xb12   : > { %5357 = vst [vmem:[%s10278_s10 + $0x100] sm:$0xff] %v5309_v53  ;;  %7056 = vrcp.f32 %v5204_v58 }
 0xb13   : > { %v7045_v18 = vpop.eup %7044  ;;  %5362 = vst [vmem:[%s10278_s10 + $0x128] sm:$0xff] %v5314_v32 }
 0xb14   : > { %v7047_v62 = vpop.eup %7046  ;;  %v5319_v54 = vmul.f32 %v7045_v18, %v10037_v9  ;;  %v5222_v5 = vpop.xlane.xlu0 %5221 }
 0xb15   : > { %v5310_v24 = vmul.f32 %v7047_v62, %v10039_v40  ;;  %7058 = vrcp.f32 %v5222_v5 }
 0xb16   : > { %5367 = vst [vmem:[%s10278_s10 + $0x150] sm:$0xff] %v5319_v54 }
 0xb17   : > { %v7049_v42 = vpop.eup %7048  ;;  %5358 = vst [vmem:[%s10278_s10 + $0x108] sm:$0xff] %v5310_v24 }
 0xb18   : > { %v7051_v49 = vpop.eup %7050  ;;  %v5317_v25 = vmul.f32 %v7049_v42, %v10045_v44  ;;  %v5226_v50 = vpop.xlane.xlu0 %5225 }
 0xb19   : > { %v5224_v55 = vpop.xlane.xlu1 %5223  ;;  %v5320_v9 = vmul.f32 %v7051_v49, %v10047_v30  ;;  %7060 = vrcp.f32 %v5226_v50 }
 0xb1a   : > { %5365 = vst [vmem:[%s10278_s10 + $0x140] sm:$0xff] %v5317_v25  ;;  %7062 = vrcp.f32 %v5224_v55 }
 0xb1b   : > { %v7053_v40 = vpop.eup %7052  ;;  %5368 = vst [vmem:[%s10278_s10 + $0x158] sm:$0xff] %v5320_v9 }
 0xb1c   : > { %v7055_v56 = vpop.eup %7054  ;;  %v5311_v22 = vmul.f32 %v7053_v40, %v10053_v43 }
 0xb1d   : > { %v5228_v8 = vpop.xlane.xlu1 %5227  ;;  %v5318_v44 = vmul.f32 %v7055_v56, %v10051_v37 }
 0xb1e   : > { %7064 = vrcp.f32 %v5228_v8  ;;  %5359 = vst [vmem:[%s10278_s10 + $0x110] sm:$0xff] %v5311_v22 }
 0xb1f   : > { %v7057_v30 = vpop.eup %7056  ;;  %5366 = vst [vmem:[%s10278_s10 + $0x148] sm:$0xff] %v5318_v44 }
 0xb20   : > { %v5312_v38 = vmul.f32 %v7057_v30, %v10057_v4 }
 0xb22   : > { %v7059_v39 = vpop.eup %7058  ;;  %5360 = vst [vmem:[%s10278_s10 + $0x118] sm:$0xff] %v5312_v38 }
 0xb23   : > { %v5321_v43 = vmul.f32 %v7059_v39, %v10060_v31 }
 0xb25   : > { %5369 = vst [vmem:[%s10278_s10 + $0x160] sm:$0xff] %v5321_v43 }
 0xb26   : > { %v7061_v37 = vpop.eup %7060 }
 0xb27   : > { %v7063_v46 = vpop.eup %7062  ;;  %v5323_v47 = vmul.f32 %v7061_v37, %v10063_v34 }
 0xb28   : > { %v5322_v27 = vmul.f32 %v7063_v46, %v10065_v7 }
 0xb29   : > { %5371 = vst [vmem:[%s10278_s10 + $0x170] sm:$0xff] %v5323_v47 }
 0xb2a   : > { %5370 = vst [vmem:[%s10278_s10 + $0x168] sm:$0xff] %v5322_v27  ;;  %3841 = sbr.rel (!%p3839_p0) target bundleno = 2129 (0x851), region = 79 }
 0xb2b   : > { %v7065_v4 = vpop.eup %7064 }
 0xb2c   : > { %v5324_v31 = vmul.f32 %v7065_v4, %v10069_v36 }
 0xb2e   : > { %5372 = vst [vmem:[%s10278_s10 + $0x178] sm:$0xff] %v5324_v31 }

</bundles_post_ra>
